<compile_context>
chip_gen: v6e
topology: v6e:2x2x1
jax: 0.10.0
libtpu: 0.0.40
codegen_flags: <defaults>
</compile_context>

<pallas_src>
import functools

import jax
import jax.numpy as jnp
from jax.experimental import pallas as pl
from jax.experimental.pallas import tpu as pltpu


# ----------------------------------------------------------------------------
# Single fused kernel: 4 LSTM layers + Linear(hidden -> output_size)
# ----------------------------------------------------------------------------
def _lstm_reg_kernel(*refs, num_layers, hidden, batch, seq):
    nl = num_layers
    x_ref = refs[0]                              # (S*B, I)  layer-0 input
    lp = refs[1:1 + 3 * nl]                      # per layer: w_ih, w_hh, bias
    reg_w_ref = refs[1 + 3 * nl]                 # (H, O)
    reg_b_ref = refs[2 + 3 * nl]                 # (1, O)
    out_ref = refs[3 + 3 * nl]                   # (S*B, O)
    act_scs = refs[4 + 3 * nl: 6 + 3 * nl]       # two (S*B, H) VMEM ping-pong bufs

    H = hidden
    B = batch
    S = seq

    x_in = x_ref[...]                            # (S*B, I) for the first layer

    for l in range(nl):
        w_ih = lp[3 * l][...]                    # (I_l, 4H)
        w_hh = lp[3 * l + 1][...]                # (H,   4H)
        bias = lp[3 * l + 2][...]                # (1,   4H)

        # Input projection + bias for every timestep in ONE MXU pass.  This hoists
        # all x@W_ih work and the bias broadcast out of the serial recurrence.
        xwb = jnp.dot(x_in, w_ih, preferred_element_type=jnp.float32) + bias  # (S*B, 4H)

        dst = act_scs[l % 2]
        h = jnp.zeros((B, H), jnp.float32)
        c = jnp.zeros((B, H), jnp.float32)
        for t in range(S):                       # fully unrolled recurrence
            g = xwb[t * B:(t + 1) * B, :] + jnp.dot(
                h, w_hh, preferred_element_type=jnp.float32)      # (B, 4H)
            i_g = jax.nn.sigmoid(g[:, 0 * H:1 * H])
            f_g = jax.nn.sigmoid(g[:, 1 * H:2 * H])
            g_g = jnp.tanh(g[:, 2 * H:3 * H])
            o_g = jax.nn.sigmoid(g[:, 3 * H:4 * H])
            c = f_g * c + i_g * g_g
            h = o_g * jnp.tanh(c)
            dst[t * B:(t + 1) * B, :] = h        # layer output, (S*B, H) layout
        x_in = dst[...]                          # feeds next layer / the head

    # Regression head: (S*B, H) @ (H, O) + b
    out_ref[...] = (
        jnp.dot(x_in, reg_w_ref[...], preferred_element_type=jnp.float32)
        + reg_b_ref[...]
    )


def lstm_reg_forward(x, params):
    """x: (S, B, I) float32 -> (S, B, output_size) float32."""
    S, B, I = x.shape
    H = params["lstm"][0][1].shape[0]
    O = params["reg_w"].shape[1]
    nl = len(params["lstm"])

    args = [x.reshape(S * B, I)]
    for w_ih, w_hh, b in params["lstm"]:
        args += [w_ih, w_hh, b]
    args += [params["reg_w"], params["reg_b"]]

    kernel = functools.partial(
        _lstm_reg_kernel, num_layers=nl, hidden=H, batch=B, seq=S)

    out = pl.pallas_call(
        kernel,
        out_shape=jax.ShapeDtypeStruct((S * B, O), jnp.float32),
        scratch_shapes=[
            pltpu.VMEM((S * B, H), jnp.float32),   # layer-output ping buffer
            pltpu.VMEM((S * B, H), jnp.float32),   # layer-output pong buffer
        ],
    )(*args)
    return out.reshape(S, B, O)


# ----------------------------------------------------------------------------
# Pure-JAX reference (mirrors the PyTorch module) for a correctness check.
# ----------------------------------------------------------------------------
def lstm_reg_reference(x, params):
    S, B, _ = x.shape
    h_seq = x
    for w_ih, w_hh, b in params["lstm"]:
        H = w_hh.shape[0]
        h = jnp.zeros((B, H), jnp.float32)
        c = jnp.zeros((B, H), jnp.float32)
        outs = []
        for t in range(S):
            g = h_seq[t] @ w_ih + h @ w_hh + b
            i_g = jax.nn.sigmoid(g[:, 0 * H:1 * H])
            f_g = jax.nn.sigmoid(g[:, 1 * H:2 * H])
            g_g = jnp.tanh(g[:, 2 * H:3 * H])
            o_g = jax.nn.sigmoid(g[:, 3 * H:4 * H])
            c = f_g * c + i_g * g_g
            h = o_g * jnp.tanh(c)
            outs.append(h)
        h_seq = jnp.stack(outs, axis=0)
    flat = h_seq.reshape(S * B, -1)
    out = flat @ params["reg_w"] + params["reg_b"]
    return out.reshape(S, B, -1)


def init_params(key, input_size, hidden_size, output_size, num_layers):
    params = {"lstm": []}
    k = 1.0 / jnp.sqrt(hidden_size)
    keys = jax.random.split(key, num_layers * 4 + 2)
    idx = 0
    in_sz = input_size
    for _ in range(num_layers):
        w_ih = jax.random.uniform(keys[idx], (in_sz, 4 * hidden_size),
                                  minval=-k, maxval=k, dtype=jnp.float32); idx += 1
        w_hh = jax.random.uniform(keys[idx], (hidden_size, 4 * hidden_size),
                                  minval=-k, maxval=k, dtype=jnp.float32); idx += 1
        b_ih = jax.random.uniform(keys[idx], (1, 4 * hidden_size),
                                  minval=-k, maxval=k, dtype=jnp.float32); idx += 1
        b_hh = jax.random.uniform(keys[idx], (1, 4 * hidden_size),
                                  minval=-k, maxval=k, dtype=jnp.float32); idx += 1
        params["lstm"].append((w_ih, w_hh, b_ih + b_hh))
        in_sz = hidden_size
    params["reg_w"] = jax.random.uniform(keys[idx], (hidden_size, output_size),
                                         minval=-k, maxval=k, dtype=jnp.float32); idx += 1
    params["reg_b"] = jax.random.uniform(keys[idx], (1, output_size),
                                         minval=-k, maxval=k, dtype=jnp.float32)
    return params


if __name__ == "__main__":
    INPUT_SIZE = 8
    HIDDEN_SIZE = 32
    OUTPUT_SIZE = 1
    NUM_LAYERS = 4
    SEQ = 8
    BATCH = 4

    key = jax.random.PRNGKey(0)
    k_x, k_p = jax.random.split(key)
    x = jax.random.normal(k_x, (SEQ, BATCH, INPUT_SIZE), dtype=jnp.float32)
    params = init_params(k_p, INPUT_SIZE, HIDDEN_SIZE, OUTPUT_SIZE, NUM_LAYERS)

    out = lstm_reg_forward(x, params)
    out = jax.block_until_ready(out)
    assert out.shape == (SEQ, BATCH, OUTPUT_SIZE), out.shape

    ref = jax.block_until_ready(lstm_reg_reference(x, params))
    max_err = float(jnp.max(jnp.abs(out - ref)))
    assert max_err < 1e-3, f"mismatch vs reference: {max_err}"

    print("KERNEL_OK")
</pallas_src>

<mosaic_0001>
module attributes {stable_mosaic.version = 11 : i64} {
  func.func @_lstm_reg_kernel(%arg0: memref<32x8xf32, #tpu.memory_space<vmem>>, %arg1: memref<8x128xf32, #tpu.memory_space<vmem>>, %arg2: memref<32x128xf32, #tpu.memory_space<vmem>>, %arg3: memref<1x128xf32, #tpu.memory_space<vmem>>, %arg4: memref<32x128xf32, #tpu.memory_space<vmem>>, %arg5: memref<32x128xf32, #tpu.memory_space<vmem>>, %arg6: memref<1x128xf32, #tpu.memory_space<vmem>>, %arg7: memref<32x128xf32, #tpu.memory_space<vmem>>, %arg8: memref<32x128xf32, #tpu.memory_space<vmem>>, %arg9: memref<1x128xf32, #tpu.memory_space<vmem>>, %arg10: memref<32x128xf32, #tpu.memory_space<vmem>>, %arg11: memref<32x128xf32, #tpu.memory_space<vmem>>, %arg12: memref<1x128xf32, #tpu.memory_space<vmem>>, %arg13: memref<32x1xf32, #tpu.memory_space<vmem>>, %arg14: memref<1x1xf32, #tpu.memory_space<vmem>>, %arg15: memref<32x1xf32, #tpu.memory_space<vmem>>, %arg16: memref<32x32xf32, #tpu.memory_space<vmem>>, %arg17: memref<32x32xf32, #tpu.memory_space<vmem>>) attributes {dimension_semantics = [], scalar_prefetch = 0 : i64, scratch_operands = 2 : i64, tpu.core_type = #tpu.core_type<tc>} {
    %c0 = arith.constant 0 : index
    %c0_0 = arith.constant 0 : index
    %0 = vector.load %arg0[%c0, %c0_0] : memref<32x8xf32, #tpu.memory_space<vmem>>, vector<32x8xf32>
    %c0_1 = arith.constant 0 : index
    %c0_2 = arith.constant 0 : index
    %1 = vector.load %arg1[%c0_1, %c0_2] : memref<8x128xf32, #tpu.memory_space<vmem>>, vector<8x128xf32>
    %c0_3 = arith.constant 0 : index
    %c0_4 = arith.constant 0 : index
    %2 = vector.load %arg2[%c0_3, %c0_4] : memref<32x128xf32, #tpu.memory_space<vmem>>, vector<32x128xf32>
    %c0_5 = arith.constant 0 : index
    %c0_6 = arith.constant 0 : index
    %3 = vector.load %arg3[%c0_5, %c0_6] : memref<1x128xf32, #tpu.memory_space<vmem>>, vector<1x128xf32>
    %cst = arith.constant dense<0.000000e+00> : vector<32x128xf32>
    %4 = tpu.matmul %0, %1, %cst {dimension_numbers = #tpu.dot_dimension_numbers<[1], [0], [0], [1], [0, 0, 1, 1], [], []>} : vector<32x8xf32>, vector<8x128xf32>, vector<32x128xf32> -> vector<32x128xf32>
    %5 = vector.broadcast %3 : vector<1x128xf32> to vector<32x128xf32>
    %6 = arith.addf %4, %5 : vector<32x128xf32>
    %cst_7 = arith.constant 0.000000e+00 : f32
    %7 = vector.broadcast %cst_7 : f32 to vector<4x32xf32>
    %cst_8 = arith.constant 0.000000e+00 : f32
    %8 = vector.broadcast %cst_8 : f32 to vector<4x32xf32>
    %9 = vector.extract_strided_slice %6 {offsets = [0, 0], sizes = [4, 128], strides = [1, 1]} : vector<32x128xf32> to vector<4x128xf32>
    %cst_9 = arith.constant dense<0.000000e+00> : vector<4x128xf32>
    %10 = tpu.matmul %7, %2, %cst_9 {dimension_numbers = #tpu.dot_dimension_numbers<[1], [0], [0], [1], [0, 0, 1, 1], [], []>} : vector<4x32xf32>, vector<32x128xf32>, vector<4x128xf32> -> vector<4x128xf32>
    %11 = arith.addf %9, %10 : vector<4x128xf32>
    %12 = vector.extract_strided_slice %11 {offsets = [0, 0], sizes = [4, 32], strides = [1, 1]} : vector<4x128xf32> to vector<4x32xf32>
    %13 = arith.negf %12 : vector<4x32xf32>
    %14 = math.exp %13 : vector<4x32xf32>
    %cst_10 = arith.constant 1.000000e+00 : f32
    %15 = vector.broadcast %cst_10 : f32 to vector<4x32xf32>
    %16 = arith.addf %15, %14 : vector<4x32xf32>
    %17 = arith.divf %15, %16 : vector<4x32xf32>
    %18 = vector.extract_strided_slice %11 {offsets = [0, 32], sizes = [4, 32], strides = [1, 1]} : vector<4x128xf32> to vector<4x32xf32>
    %19 = arith.negf %18 : vector<4x32xf32>
    %20 = math.exp %19 : vector<4x32xf32>
    %cst_11 = arith.constant 1.000000e+00 : f32
    %21 = vector.broadcast %cst_11 : f32 to vector<4x32xf32>
    %22 = arith.addf %21, %20 : vector<4x32xf32>
    %23 = arith.divf %21, %22 : vector<4x32xf32>
    %24 = vector.extract_strided_slice %11 {offsets = [0, 64], sizes = [4, 32], strides = [1, 1]} : vector<4x128xf32> to vector<4x32xf32>
    %25 = math.tanh %24 : vector<4x32xf32>
    %26 = vector.extract_strided_slice %11 {offsets = [0, 96], sizes = [4, 32], strides = [1, 1]} : vector<4x128xf32> to vector<4x32xf32>
    %27 = arith.negf %26 : vector<4x32xf32>
    %28 = math.exp %27 : vector<4x32xf32>
    %cst_12 = arith.constant 1.000000e+00 : f32
    %29 = vector.broadcast %cst_12 : f32 to vector<4x32xf32>
    %30 = arith.addf %29, %28 : vector<4x32xf32>
    %31 = arith.divf %29, %30 : vector<4x32xf32>
    %32 = arith.mulf %23, %8 : vector<4x32xf32>
    %33 = arith.mulf %17, %25 : vector<4x32xf32>
    %34 = arith.addf %32, %33 : vector<4x32xf32>
    %35 = math.tanh %34 : vector<4x32xf32>
    %36 = arith.mulf %31, %35 : vector<4x32xf32>
    %c0_13 = arith.constant 0 : index
    %c0_14 = arith.constant 0 : index
    %37 = vector.load %arg16[%c0_13, %c0_14] : memref<32x32xf32, #tpu.memory_space<vmem>>, vector<4x32xf32>
    tpu.vector_store %arg16[%c0_13, %c0_14], %36 {strides = array<i32>} : memref<32x32xf32, #tpu.memory_space<vmem>>, vector<4x32xf32>,
    %38 = vector.extract_strided_slice %6 {offsets = [4, 0], sizes = [4, 128], strides = [1, 1]} : vector<32x128xf32> to vector<4x128xf32>
    %cst_15 = arith.constant dense<0.000000e+00> : vector<4x128xf32>
    %39 = tpu.matmul %36, %2, %cst_15 {dimension_numbers = #tpu.dot_dimension_numbers<[1], [0], [0], [1], [0, 0, 1, 1], [], []>} : vector<4x32xf32>, vector<32x128xf32>, vector<4x128xf32> -> vector<4x128xf32>
    %40 = arith.addf %38, %39 : vector<4x128xf32>
    %41 = vector.extract_strided_slice %40 {offsets = [0, 0], sizes = [4, 32], strides = [1, 1]} : vector<4x128xf32> to vector<4x32xf32>
    %42 = arith.negf %41 : vector<4x32xf32>
    %43 = math.exp %42 : vector<4x32xf32>
    %cst_16 = arith.constant 1.000000e+00 : f32
    %44 = vector.broadcast %cst_16 : f32 to vector<4x32xf32>
    %45 = arith.addf %44, %43 : vector<4x32xf32>
    %46 = arith.divf %44, %45 : vector<4x32xf32>
    %47 = vector.extract_strided_slice %40 {offsets = [0, 32], sizes = [4, 32], strides = [1, 1]} : vector<4x128xf32> to vector<4x32xf32>
    %48 = arith.negf %47 : vector<4x32xf32>
    %49 = math.exp %48 : vector<4x32xf32>
    %cst_17 = arith.constant 1.000000e+00 : f32
    %50 = vector.broadcast %cst_17 : f32 to vector<4x32xf32>
    %51 = arith.addf %50, %49 : vector<4x32xf32>
    %52 = arith.divf %50, %51 : vector<4x32xf32>
    %53 = vector.extract_strided_slice %40 {offsets = [0, 64], sizes = [4, 32], strides = [1, 1]} : vector<4x128xf32> to vector<4x32xf32>
    %54 = math.tanh %53 : vector<4x32xf32>
    %55 = vector.extract_strided_slice %40 {offsets = [0, 96], sizes = [4, 32], strides = [1, 1]} : vector<4x128xf32> to vector<4x32xf32>
    %56 = arith.negf %55 : vector<4x32xf32>
    %57 = math.exp %56 : vector<4x32xf32>
    %cst_18 = arith.constant 1.000000e+00 : f32
    %58 = vector.broadcast %cst_18 : f32 to vector<4x32xf32>
    %59 = arith.addf %58, %57 : vector<4x32xf32>
    %60 = arith.divf %58, %59 : vector<4x32xf32>
    %61 = arith.mulf %52, %34 : vector<4x32xf32>
    %62 = arith.mulf %46, %54 : vector<4x32xf32>
    %63 = arith.addf %61, %62 : vector<4x32xf32>
    %64 = math.tanh %63 : vector<4x32xf32>
    %65 = arith.mulf %60, %64 : vector<4x32xf32>
    %c4 = arith.constant 4 : index
    %c0_19 = arith.constant 0 : index
    %66 = vector.load %arg16[%c4, %c0_19] : memref<32x32xf32, #tpu.memory_space<vmem>>, vector<4x32xf32>
    tpu.vector_store %arg16[%c4, %c0_19], %65 {strides = array<i32>} : memref<32x32xf32, #tpu.memory_space<vmem>>, vector<4x32xf32>,
    %67 = vector.extract_strided_slice %6 {offsets = [8, 0], sizes = [4, 128], strides = [1, 1]} : vector<32x128xf32> to vector<4x128xf32>
    %cst_20 = arith.constant dense<0.000000e+00> : vector<4x128xf32>
    %68 = tpu.matmul %65, %2, %cst_20 {dimension_numbers = #tpu.dot_dimension_numbers<[1], [0], [0], [1], [0, 0, 1, 1], [], []>} : vector<4x32xf32>, vector<32x128xf32>, vector<4x128xf32> -> vector<4x128xf32>
    %69 = arith.addf %67, %68 : vector<4x128xf32>
    %70 = vector.extract_strided_slice %69 {offsets = [0, 0], sizes = [4, 32], strides = [1, 1]} : vector<4x128xf32> to vector<4x32xf32>
    %71 = arith.negf %70 : vector<4x32xf32>
    %72 = math.exp %71 : vector<4x32xf32>
    %cst_21 = arith.constant 1.000000e+00 : f32
    %73 = vector.broadcast %cst_21 : f32 to vector<4x32xf32>
    %74 = arith.addf %73, %72 : vector<4x32xf32>
    %75 = arith.divf %73, %74 : vector<4x32xf32>
    %76 = vector.extract_strided_slice %69 {offsets = [0, 32], sizes = [4, 32], strides = [1, 1]} : vector<4x128xf32> to vector<4x32xf32>
    %77 = arith.negf %76 : vector<4x32xf32>
    %78 = math.exp %77 : vector<4x32xf32>
    %cst_22 = arith.constant 1.000000e+00 : f32
    %79 = vector.broadcast %cst_22 : f32 to vector<4x32xf32>
    %80 = arith.addf %79, %78 : vector<4x32xf32>
    %81 = arith.divf %79, %80 : vector<4x32xf32>
    %82 = vector.extract_strided_slice %69 {offsets = [0, 64], sizes = [4, 32], strides = [1, 1]} : vector<4x128xf32> to vector<4x32xf32>
    %83 = math.tanh %82 : vector<4x32xf32>
    %84 = vector.extract_strided_slice %69 {offsets = [0, 96], sizes = [4, 32], strides = [1, 1]} : vector<4x128xf32> to vector<4x32xf32>
    %85 = arith.negf %84 : vector<4x32xf32>
    %86 = math.exp %85 : vector<4x32xf32>
    %cst_23 = arith.constant 1.000000e+00 : f32
    %87 = vector.broadcast %cst_23 : f32 to vector<4x32xf32>
    %88 = arith.addf %87, %86 : vector<4x32xf32>
    %89 = arith.divf %87, %88 : vector<4x32xf32>
    %90 = arith.mulf %81, %63 : vector<4x32xf32>
    %91 = arith.mulf %75, %83 : vector<4x32xf32>
    %92 = arith.addf %90, %91 : vector<4x32xf32>
    %93 = math.tanh %92 : vector<4x32xf32>
    %94 = arith.mulf %89, %93 : vector<4x32xf32>
    %c8 = arith.constant 8 : index
    %c0_24 = arith.constant 0 : index
    %95 = vector.load %arg16[%c8, %c0_24] : memref<32x32xf32, #tpu.memory_space<vmem>>, vector<4x32xf32>
    tpu.vector_store %arg16[%c8, %c0_24], %94 {strides = array<i32>} : memref<32x32xf32, #tpu.memory_space<vmem>>, vector<4x32xf32>,
    %96 = vector.extract_strided_slice %6 {offsets = [12, 0], sizes = [4, 128], strides = [1, 1]} : vector<32x128xf32> to vector<4x128xf32>
    %cst_25 = arith.constant dense<0.000000e+00> : vector<4x128xf32>
    %97 = tpu.matmul %94, %2, %cst_25 {dimension_numbers = #tpu.dot_dimension_numbers<[1], [0], [0], [1], [0, 0, 1, 1], [], []>} : vector<4x32xf32>, vector<32x128xf32>, vector<4x128xf32> -> vector<4x128xf32>
    %98 = arith.addf %96, %97 : vector<4x128xf32>
    %99 = vector.extract_strided_slice %98 {offsets = [0, 0], sizes = [4, 32], strides = [1, 1]} : vector<4x128xf32> to vector<4x32xf32>
    %100 = arith.negf %99 : vector<4x32xf32>
    %101 = math.exp %100 : vector<4x32xf32>
    %cst_26 = arith.constant 1.000000e+00 : f32
    %102 = vector.broadcast %cst_26 : f32 to vector<4x32xf32>
    %103 = arith.addf %102, %101 : vector<4x32xf32>
    %104 = arith.divf %102, %103 : vector<4x32xf32>
    %105 = vector.extract_strided_slice %98 {offsets = [0, 32], sizes = [4, 32], strides = [1, 1]} : vector<4x128xf32> to vector<4x32xf32>
    %106 = arith.negf %105 : vector<4x32xf32>
    %107 = math.exp %106 : vector<4x32xf32>
    %cst_27 = arith.constant 1.000000e+00 : f32
    %108 = vector.broadcast %cst_27 : f32 to vector<4x32xf32>
    %109 = arith.addf %108, %107 : vector<4x32xf32>
    %110 = arith.divf %108, %109 : vector<4x32xf32>
    %111 = vector.extract_strided_slice %98 {offsets = [0, 64], sizes = [4, 32], strides = [1, 1]} : vector<4x128xf32> to vector<4x32xf32>
    %112 = math.tanh %111 : vector<4x32xf32>
    %113 = vector.extract_strided_slice %98 {offsets = [0, 96], sizes = [4, 32], strides = [1, 1]} : vector<4x128xf32> to vector<4x32xf32>
    %114 = arith.negf %113 : vector<4x32xf32>
    %115 = math.exp %114 : vector<4x32xf32>
    %cst_28 = arith.constant 1.000000e+00 : f32
    %116 = vector.broadcast %cst_28 : f32 to vector<4x32xf32>
    %117 = arith.addf %116, %115 : vector<4x32xf32>
    %118 = arith.divf %116, %117 : vector<4x32xf32>
    %119 = arith.mulf %110, %92 : vector<4x32xf32>
    %120 = arith.mulf %104, %112 : vector<4x32xf32>
    %121 = arith.addf %119, %120 : vector<4x32xf32>
    %122 = math.tanh %121 : vector<4x32xf32>
    %123 = arith.mulf %118, %122 : vector<4x32xf32>
    %c12 = arith.constant 12 : index
    %c0_29 = arith.constant 0 : index
    %124 = vector.load %arg16[%c12, %c0_29] : memref<32x32xf32, #tpu.memory_space<vmem>>, vector<4x32xf32>
    tpu.vector_store %arg16[%c12, %c0_29], %123 {strides = array<i32>} : memref<32x32xf32, #tpu.memory_space<vmem>>, vector<4x32xf32>,
    %125 = vector.extract_strided_slice %6 {offsets = [16, 0], sizes = [4, 128], strides = [1, 1]} : vector<32x128xf32> to vector<4x128xf32>
    %cst_30 = arith.constant dense<0.000000e+00> : vector<4x128xf32>
    %126 = tpu.matmul %123, %2, %cst_30 {dimension_numbers = #tpu.dot_dimension_numbers<[1], [0], [0], [1], [0, 0, 1, 1], [], []>} : vector<4x32xf32>, vector<32x128xf32>, vector<4x128xf32> -> vector<4x128xf32>
    %127 = arith.addf %125, %126 : vector<4x128xf32>
    %128 = vector.extract_strided_slice %127 {offsets = [0, 0], sizes = [4, 32], strides = [1, 1]} : vector<4x128xf32> to vector<4x32xf32>
    %129 = arith.negf %128 : vector<4x32xf32>
    %130 = math.exp %129 : vector<4x32xf32>
    %cst_31 = arith.constant 1.000000e+00 : f32
    %131 = vector.broadcast %cst_31 : f32 to vector<4x32xf32>
    %132 = arith.addf %131, %130 : vector<4x32xf32>
    %133 = arith.divf %131, %132 : vector<4x32xf32>
    %134 = vector.extract_strided_slice %127 {offsets = [0, 32], sizes = [4, 32], strides = [1, 1]} : vector<4x128xf32> to vector<4x32xf32>
    %135 = arith.negf %134 : vector<4x32xf32>
    %136 = math.exp %135 : vector<4x32xf32>
    %cst_32 = arith.constant 1.000000e+00 : f32
    %137 = vector.broadcast %cst_32 : f32 to vector<4x32xf32>
    %138 = arith.addf %137, %136 : vector<4x32xf32>
    %139 = arith.divf %137, %138 : vector<4x32xf32>
    %140 = vector.extract_strided_slice %127 {offsets = [0, 64], sizes = [4, 32], strides = [1, 1]} : vector<4x128xf32> to vector<4x32xf32>
    %141 = math.tanh %140 : vector<4x32xf32>
    %142 = vector.extract_strided_slice %127 {offsets = [0, 96], sizes = [4, 32], strides = [1, 1]} : vector<4x128xf32> to vector<4x32xf32>
    %143 = arith.negf %142 : vector<4x32xf32>
    %144 = math.exp %143 : vector<4x32xf32>
    %cst_33 = arith.constant 1.000000e+00 : f32
    %145 = vector.broadcast %cst_33 : f32 to vector<4x32xf32>
    %146 = arith.addf %145, %144 : vector<4x32xf32>
    %147 = arith.divf %145, %146 : vector<4x32xf32>
    %148 = arith.mulf %139, %121 : vector<4x32xf32>
    %149 = arith.mulf %133, %141 : vector<4x32xf32>
    %150 = arith.addf %148, %149 : vector<4x32xf32>
    %151 = math.tanh %150 : vector<4x32xf32>
    %152 = arith.mulf %147, %151 : vector<4x32xf32>
    %c16 = arith.constant 16 : index
    %c0_34 = arith.constant 0 : index
    %153 = vector.load %arg16[%c16, %c0_34] : memref<32x32xf32, #tpu.memory_space<vmem>>, vector<4x32xf32>
    tpu.vector_store %arg16[%c16, %c0_34], %152 {strides = array<i32>} : memref<32x32xf32, #tpu.memory_space<vmem>>, vector<4x32xf32>,
    %154 = vector.extract_strided_slice %6 {offsets = [20, 0], sizes = [4, 128], strides = [1, 1]} : vector<32x128xf32> to vector<4x128xf32>
    %cst_35 = arith.constant dense<0.000000e+00> : vector<4x128xf32>
    %155 = tpu.matmul %152, %2, %cst_35 {dimension_numbers = #tpu.dot_dimension_numbers<[1], [0], [0], [1], [0, 0, 1, 1], [], []>} : vector<4x32xf32>, vector<32x128xf32>, vector<4x128xf32> -> vector<4x128xf32>
    %156 = arith.addf %154, %155 : vector<4x128xf32>
    %157 = vector.extract_strided_slice %156 {offsets = [0, 0], sizes = [4, 32], strides = [1, 1]} : vector<4x128xf32> to vector<4x32xf32>
    %158 = arith.negf %157 : vector<4x32xf32>
    %159 = math.exp %158 : vector<4x32xf32>
    %cst_36 = arith.constant 1.000000e+00 : f32
    %160 = vector.broadcast %cst_36 : f32 to vector<4x32xf32>
    %161 = arith.addf %160, %159 : vector<4x32xf32>
    %162 = arith.divf %160, %161 : vector<4x32xf32>
    %163 = vector.extract_strided_slice %156 {offsets = [0, 32], sizes = [4, 32], strides = [1, 1]} : vector<4x128xf32> to vector<4x32xf32>
    %164 = arith.negf %163 : vector<4x32xf32>
    %165 = math.exp %164 : vector<4x32xf32>
    %cst_37 = arith.constant 1.000000e+00 : f32
    %166 = vector.broadcast %cst_37 : f32 to vector<4x32xf32>
    %167 = arith.addf %166, %165 : vector<4x32xf32>
    %168 = arith.divf %166, %167 : vector<4x32xf32>
    %169 = vector.extract_strided_slice %156 {offsets = [0, 64], sizes = [4, 32], strides = [1, 1]} : vector<4x128xf32> to vector<4x32xf32>
    %170 = math.tanh %169 : vector<4x32xf32>
    %171 = vector.extract_strided_slice %156 {offsets = [0, 96], sizes = [4, 32], strides = [1, 1]} : vector<4x128xf32> to vector<4x32xf32>
    %172 = arith.negf %171 : vector<4x32xf32>
    %173 = math.exp %172 : vector<4x32xf32>
    %cst_38 = arith.constant 1.000000e+00 : f32
    %174 = vector.broadcast %cst_38 : f32 to vector<4x32xf32>
    %175 = arith.addf %174, %173 : vector<4x32xf32>
    %176 = arith.divf %174, %175 : vector<4x32xf32>
    %177 = arith.mulf %168, %150 : vector<4x32xf32>
    %178 = arith.mulf %162, %170 : vector<4x32xf32>
    %179 = arith.addf %177, %178 : vector<4x32xf32>
    %180 = math.tanh %179 : vector<4x32xf32>
    %181 = arith.mulf %176, %180 : vector<4x32xf32>
    %c20 = arith.constant 20 : index
    %c0_39 = arith.constant 0 : index
    %182 = vector.load %arg16[%c20, %c0_39] : memref<32x32xf32, #tpu.memory_space<vmem>>, vector<4x32xf32>
    tpu.vector_store %arg16[%c20, %c0_39], %181 {strides = array<i32>} : memref<32x32xf32, #tpu.memory_space<vmem>>, vector<4x32xf32>,
    %183 = vector.extract_strided_slice %6 {offsets = [24, 0], sizes = [4, 128], strides = [1, 1]} : vector<32x128xf32> to vector<4x128xf32>
    %cst_40 = arith.constant dense<0.000000e+00> : vector<4x128xf32>
    %184 = tpu.matmul %181, %2, %cst_40 {dimension_numbers = #tpu.dot_dimension_numbers<[1], [0], [0], [1], [0, 0, 1, 1], [], []>} : vector<4x32xf32>, vector<32x128xf32>, vector<4x128xf32> -> vector<4x128xf32>
    %185 = arith.addf %183, %184 : vector<4x128xf32>
    %186 = vector.extract_strided_slice %185 {offsets = [0, 0], sizes = [4, 32], strides = [1, 1]} : vector<4x128xf32> to vector<4x32xf32>
    %187 = arith.negf %186 : vector<4x32xf32>
    %188 = math.exp %187 : vector<4x32xf32>
    %cst_41 = arith.constant 1.000000e+00 : f32
    %189 = vector.broadcast %cst_41 : f32 to vector<4x32xf32>
    %190 = arith.addf %189, %188 : vector<4x32xf32>
    %191 = arith.divf %189, %190 : vector<4x32xf32>
    %192 = vector.extract_strided_slice %185 {offsets = [0, 32], sizes = [4, 32], strides = [1, 1]} : vector<4x128xf32> to vector<4x32xf32>
    %193 = arith.negf %192 : vector<4x32xf32>
    %194 = math.exp %193 : vector<4x32xf32>
    %cst_42 = arith.constant 1.000000e+00 : f32
    %195 = vector.broadcast %cst_42 : f32 to vector<4x32xf32>
    %196 = arith.addf %195, %194 : vector<4x32xf32>
    %197 = arith.divf %195, %196 : vector<4x32xf32>
    %198 = vector.extract_strided_slice %185 {offsets = [0, 64], sizes = [4, 32], strides = [1, 1]} : vector<4x128xf32> to vector<4x32xf32>
    %199 = math.tanh %198 : vector<4x32xf32>
    %200 = vector.extract_strided_slice %185 {offsets = [0, 96], sizes = [4, 32], strides = [1, 1]} : vector<4x128xf32> to vector<4x32xf32>
    %201 = arith.negf %200 : vector<4x32xf32>
    %202 = math.exp %201 : vector<4x32xf32>
    %cst_43 = arith.constant 1.000000e+00 : f32
    %203 = vector.broadcast %cst_43 : f32 to vector<4x32xf32>
    %204 = arith.addf %203, %202 : vector<4x32xf32>
    %205 = arith.divf %203, %204 : vector<4x32xf32>
    %206 = arith.mulf %197, %179 : vector<4x32xf32>
    %207 = arith.mulf %191, %199 : vector<4x32xf32>
    %208 = arith.addf %206, %207 : vector<4x32xf32>
    %209 = math.tanh %208 : vector<4x32xf32>
    %210 = arith.mulf %205, %209 : vector<4x32xf32>
    %c24 = arith.constant 24 : index
    %c0_44 = arith.constant 0 : index
    %211 = vector.load %arg16[%c24, %c0_44] : memref<32x32xf32, #tpu.memory_space<vmem>>, vector<4x32xf32>
    tpu.vector_store %arg16[%c24, %c0_44], %210 {strides = array<i32>} : memref<32x32xf32, #tpu.memory_space<vmem>>, vector<4x32xf32>,
    %212 = vector.extract_strided_slice %6 {offsets = [28, 0], sizes = [4, 128], strides = [1, 1]} : vector<32x128xf32> to vector<4x128xf32>
    %cst_45 = arith.constant dense<0.000000e+00> : vector<4x128xf32>
    %213 = tpu.matmul %210, %2, %cst_45 {dimension_numbers = #tpu.dot_dimension_numbers<[1], [0], [0], [1], [0, 0, 1, 1], [], []>} : vector<4x32xf32>, vector<32x128xf32>, vector<4x128xf32> -> vector<4x128xf32>
    %214 = arith.addf %212, %213 : vector<4x128xf32>
    %215 = vector.extract_strided_slice %214 {offsets = [0, 0], sizes = [4, 32], strides = [1, 1]} : vector<4x128xf32> to vector<4x32xf32>
    %216 = arith.negf %215 : vector<4x32xf32>
    %217 = math.exp %216 : vector<4x32xf32>
    %cst_46 = arith.constant 1.000000e+00 : f32
    %218 = vector.broadcast %cst_46 : f32 to vector<4x32xf32>
    %219 = arith.addf %218, %217 : vector<4x32xf32>
    %220 = arith.divf %218, %219 : vector<4x32xf32>
    %221 = vector.extract_strided_slice %214 {offsets = [0, 32], sizes = [4, 32], strides = [1, 1]} : vector<4x128xf32> to vector<4x32xf32>
    %222 = arith.negf %221 : vector<4x32xf32>
    %223 = math.exp %222 : vector<4x32xf32>
    %cst_47 = arith.constant 1.000000e+00 : f32
    %224 = vector.broadcast %cst_47 : f32 to vector<4x32xf32>
    %225 = arith.addf %224, %223 : vector<4x32xf32>
    %226 = arith.divf %224, %225 : vector<4x32xf32>
    %227 = vector.extract_strided_slice %214 {offsets = [0, 64], sizes = [4, 32], strides = [1, 1]} : vector<4x128xf32> to vector<4x32xf32>
    %228 = math.tanh %227 : vector<4x32xf32>
    %229 = vector.extract_strided_slice %214 {offsets = [0, 96], sizes = [4, 32], strides = [1, 1]} : vector<4x128xf32> to vector<4x32xf32>
    %230 = arith.negf %229 : vector<4x32xf32>
    %231 = math.exp %230 : vector<4x32xf32>
    %cst_48 = arith.constant 1.000000e+00 : f32
    %232 = vector.broadcast %cst_48 : f32 to vector<4x32xf32>
    %233 = arith.addf %232, %231 : vector<4x32xf32>
    %234 = arith.divf %232, %233 : vector<4x32xf32>
    %235 = arith.mulf %226, %208 : vector<4x32xf32>
    %236 = arith.mulf %220, %228 : vector<4x32xf32>
    %237 = arith.addf %235, %236 : vector<4x32xf32>
    %238 = math.tanh %237 : vector<4x32xf32>
    %239 = arith.mulf %234, %238 : vector<4x32xf32>
    %c28 = arith.constant 28 : index
    %c0_49 = arith.constant 0 : index
    %240 = vector.load %arg16[%c28, %c0_49] : memref<32x32xf32, #tpu.memory_space<vmem>>, vector<4x32xf32>
    tpu.vector_store %arg16[%c28, %c0_49], %239 {strides = array<i32>} : memref<32x32xf32, #tpu.memory_space<vmem>>, vector<4x32xf32>,
    %c0_50 = arith.constant 0 : index
    %c0_51 = arith.constant 0 : index
    %241 = vector.load %arg16[%c0_50, %c0_51] : memref<32x32xf32, #tpu.memory_space<vmem>>, vector<32x32xf32>
    %c0_52 = arith.constant 0 : index
    %c0_53 = arith.constant 0 : index
    %242 = vector.load %arg4[%c0_52, %c0_53] : memref<32x128xf32, #tpu.memory_space<vmem>>, vector<32x128xf32>
    %c0_54 = arith.constant 0 : index
    %c0_55 = arith.constant 0 : index
    %243 = vector.load %arg5[%c0_54, %c0_55] : memref<32x128xf32, #tpu.memory_space<vmem>>, vector<32x128xf32>
    %c0_56 = arith.constant 0 : index
    %c0_57 = arith.constant 0 : index
    %244 = vector.load %arg6[%c0_56, %c0_57] : memref<1x128xf32, #tpu.memory_space<vmem>>, vector<1x128xf32>
    %cst_58 = arith.constant dense<0.000000e+00> : vector<32x128xf32>
    %245 = tpu.matmul %241, %242, %cst_58 {dimension_numbers = #tpu.dot_dimension_numbers<[1], [0], [0], [1], [0, 0, 1, 1], [], []>} : vector<32x32xf32>, vector<32x128xf32>, vector<32x128xf32> -> vector<32x128xf32>
    %246 = vector.broadcast %244 : vector<1x128xf32> to vector<32x128xf32>
    %247 = arith.addf %245, %246 : vector<32x128xf32>
    %cst_59 = arith.constant 0.000000e+00 : f32
    %248 = vector.broadcast %cst_59 : f32 to vector<4x32xf32>
    %cst_60 = arith.constant 0.000000e+00 : f32
    %249 = vector.broadcast %cst_60 : f32 to vector<4x32xf32>
    %250 = vector.extract_strided_slice %247 {offsets = [0, 0], sizes = [4, 128], strides = [1, 1]} : vector<32x128xf32> to vector<4x128xf32>
    %cst_61 = arith.constant dense<0.000000e+00> : vector<4x128xf32>
    %251 = tpu.matmul %248, %243, %cst_61 {dimension_numbers = #tpu.dot_dimension_numbers<[1], [0], [0], [1], [0, 0, 1, 1], [], []>} : vector<4x32xf32>, vector<32x128xf32>, vector<4x128xf32> -> vector<4x128xf32>
    %252 = arith.addf %250, %251 : vector<4x128xf32>
    %253 = vector.extract_strided_slice %252 {offsets = [0, 0], sizes = [4, 32], strides = [1, 1]} : vector<4x128xf32> to vector<4x32xf32>
    %254 = arith.negf %253 : vector<4x32xf32>
    %255 = math.exp %254 : vector<4x32xf32>
    %cst_62 = arith.constant 1.000000e+00 : f32
    %256 = vector.broadcast %cst_62 : f32 to vector<4x32xf32>
    %257 = arith.addf %256, %255 : vector<4x32xf32>
    %258 = arith.divf %256, %257 : vector<4x32xf32>
    %259 = vector.extract_strided_slice %252 {offsets = [0, 32], sizes = [4, 32], strides = [1, 1]} : vector<4x128xf32> to vector<4x32xf32>
    %260 = arith.negf %259 : vector<4x32xf32>
    %261 = math.exp %260 : vector<4x32xf32>
    %cst_63 = arith.constant 1.000000e+00 : f32
    %262 = vector.broadcast %cst_63 : f32 to vector<4x32xf32>
    %263 = arith.addf %262, %261 : vector<4x32xf32>
    %264 = arith.divf %262, %263 : vector<4x32xf32>
    %265 = vector.extract_strided_slice %252 {offsets = [0, 64], sizes = [4, 32], strides = [1, 1]} : vector<4x128xf32> to vector<4x32xf32>
    %266 = math.tanh %265 : vector<4x32xf32>
    %267 = vector.extract_strided_slice %252 {offsets = [0, 96], sizes = [4, 32], strides = [1, 1]} : vector<4x128xf32> to vector<4x32xf32>
    %268 = arith.negf %267 : vector<4x32xf32>
    %269 = math.exp %268 : vector<4x32xf32>
    %cst_64 = arith.constant 1.000000e+00 : f32
    %270 = vector.broadcast %cst_64 : f32 to vector<4x32xf32>
    %271 = arith.addf %270, %269 : vector<4x32xf32>
    %272 = arith.divf %270, %271 : vector<4x32xf32>
    %273 = arith.mulf %264, %249 : vector<4x32xf32>
    %274 = arith.mulf %258, %266 : vector<4x32xf32>
    %275 = arith.addf %273, %274 : vector<4x32xf32>
    %276 = math.tanh %275 : vector<4x32xf32>
    %277 = arith.mulf %272, %276 : vector<4x32xf32>
    %c0_65 = arith.constant 0 : index
    %c0_66 = arith.constant 0 : index
    %278 = vector.load %arg17[%c0_65, %c0_66] : memref<32x32xf32, #tpu.memory_space<vmem>>, vector<4x32xf32>
    tpu.vector_store %arg17[%c0_65, %c0_66], %277 {strides = array<i32>} : memref<32x32xf32, #tpu.memory_space<vmem>>, vector<4x32xf32>,
    %279 = vector.extract_strided_slice %247 {offsets = [4, 0], sizes = [4, 128], strides = [1, 1]} : vector<32x128xf32> to vector<4x128xf32>
    %cst_67 = arith.constant dense<0.000000e+00> : vector<4x128xf32>
    %280 = tpu.matmul %277, %243, %cst_67 {dimension_numbers = #tpu.dot_dimension_numbers<[1], [0], [0], [1], [0, 0, 1, 1], [], []>} : vector<4x32xf32>, vector<32x128xf32>, vector<4x128xf32> -> vector<4x128xf32>
    %281 = arith.addf %279, %280 : vector<4x128xf32>
    %282 = vector.extract_strided_slice %281 {offsets = [0, 0], sizes = [4, 32], strides = [1, 1]} : vector<4x128xf32> to vector<4x32xf32>
    %283 = arith.negf %282 : vector<4x32xf32>
    %284 = math.exp %283 : vector<4x32xf32>
    %cst_68 = arith.constant 1.000000e+00 : f32
    %285 = vector.broadcast %cst_68 : f32 to vector<4x32xf32>
    %286 = arith.addf %285, %284 : vector<4x32xf32>
    %287 = arith.divf %285, %286 : vector<4x32xf32>
    %288 = vector.extract_strided_slice %281 {offsets = [0, 32], sizes = [4, 32], strides = [1, 1]} : vector<4x128xf32> to vector<4x32xf32>
    %289 = arith.negf %288 : vector<4x32xf32>
    %290 = math.exp %289 : vector<4x32xf32>
    %cst_69 = arith.constant 1.000000e+00 : f32
    %291 = vector.broadcast %cst_69 : f32 to vector<4x32xf32>
    %292 = arith.addf %291, %290 : vector<4x32xf32>
    %293 = arith.divf %291, %292 : vector<4x32xf32>
    %294 = vector.extract_strided_slice %281 {offsets = [0, 64], sizes = [4, 32], strides = [1, 1]} : vector<4x128xf32> to vector<4x32xf32>
    %295 = math.tanh %294 : vector<4x32xf32>
    %296 = vector.extract_strided_slice %281 {offsets = [0, 96], sizes = [4, 32], strides = [1, 1]} : vector<4x128xf32> to vector<4x32xf32>
    %297 = arith.negf %296 : vector<4x32xf32>
    %298 = math.exp %297 : vector<4x32xf32>
    %cst_70 = arith.constant 1.000000e+00 : f32
    %299 = vector.broadcast %cst_70 : f32 to vector<4x32xf32>
    %300 = arith.addf %299, %298 : vector<4x32xf32>
    %301 = arith.divf %299, %300 : vector<4x32xf32>
    %302 = arith.mulf %293, %275 : vector<4x32xf32>
    %303 = arith.mulf %287, %295 : vector<4x32xf32>
    %304 = arith.addf %302, %303 : vector<4x32xf32>
    %305 = math.tanh %304 : vector<4x32xf32>
    %306 = arith.mulf %301, %305 : vector<4x32xf32>
    %c4_71 = arith.constant 4 : index
    %c0_72 = arith.constant 0 : index
    %307 = vector.load %arg17[%c4_71, %c0_72] : memref<32x32xf32, #tpu.memory_space<vmem>>, vector<4x32xf32>
    tpu.vector_store %arg17[%c4_71, %c0_72], %306 {strides = array<i32>} : memref<32x32xf32, #tpu.memory_space<vmem>>, vector<4x32xf32>,
    %308 = vector.extract_strided_slice %247 {offsets = [8, 0], sizes = [4, 128], strides = [1, 1]} : vector<32x128xf32> to vector<4x128xf32>
    %cst_73 = arith.constant dense<0.000000e+00> : vector<4x128xf32>
    %309 = tpu.matmul %306, %243, %cst_73 {dimension_numbers = #tpu.dot_dimension_numbers<[1], [0], [0], [1], [0, 0, 1, 1], [], []>} : vector<4x32xf32>, vector<32x128xf32>, vector<4x128xf32> -> vector<4x128xf32>
    %310 = arith.addf %308, %309 : vector<4x128xf32>
    %311 = vector.extract_strided_slice %310 {offsets = [0, 0], sizes = [4, 32], strides = [1, 1]} : vector<4x128xf32> to vector<4x32xf32>
    %312 = arith.negf %311 : vector<4x32xf32>
    %313 = math.exp %312 : vector<4x32xf32>
    %cst_74 = arith.constant 1.000000e+00 : f32
    %314 = vector.broadcast %cst_74 : f32 to vector<4x32xf32>
    %315 = arith.addf %314, %313 : vector<4x32xf32>
    %316 = arith.divf %314, %315 : vector<4x32xf32>
    %317 = vector.extract_strided_slice %310 {offsets = [0, 32], sizes = [4, 32], strides = [1, 1]} : vector<4x128xf32> to vector<4x32xf32>
    %318 = arith.negf %317 : vector<4x32xf32>
    %319 = math.exp %318 : vector<4x32xf32>
    %cst_75 = arith.constant 1.000000e+00 : f32
    %320 = vector.broadcast %cst_75 : f32 to vector<4x32xf32>
    %321 = arith.addf %320, %319 : vector<4x32xf32>
    %322 = arith.divf %320, %321 : vector<4x32xf32>
    %323 = vector.extract_strided_slice %310 {offsets = [0, 64], sizes = [4, 32], strides = [1, 1]} : vector<4x128xf32> to vector<4x32xf32>
    %324 = math.tanh %323 : vector<4x32xf32>
    %325 = vector.extract_strided_slice %310 {offsets = [0, 96], sizes = [4, 32], strides = [1, 1]} : vector<4x128xf32> to vector<4x32xf32>
    %326 = arith.negf %325 : vector<4x32xf32>
    %327 = math.exp %326 : vector<4x32xf32>
    %cst_76 = arith.constant 1.000000e+00 : f32
    %328 = vector.broadcast %cst_76 : f32 to vector<4x32xf32>
    %329 = arith.addf %328, %327 : vector<4x32xf32>
    %330 = arith.divf %328, %329 : vector<4x32xf32>
    %331 = arith.mulf %322, %304 : vector<4x32xf32>
    %332 = arith.mulf %316, %324 : vector<4x32xf32>
    %333 = arith.addf %331, %332 : vector<4x32xf32>
    %334 = math.tanh %333 : vector<4x32xf32>
    %335 = arith.mulf %330, %334 : vector<4x32xf32>
    %c8_77 = arith.constant 8 : index
    %c0_78 = arith.constant 0 : index
    %336 = vector.load %arg17[%c8_77, %c0_78] : memref<32x32xf32, #tpu.memory_space<vmem>>, vector<4x32xf32>
    tpu.vector_store %arg17[%c8_77, %c0_78], %335 {strides = array<i32>} : memref<32x32xf32, #tpu.memory_space<vmem>>, vector<4x32xf32>,
    %337 = vector.extract_strided_slice %247 {offsets = [12, 0], sizes = [4, 128], strides = [1, 1]} : vector<32x128xf32> to vector<4x128xf32>
    %cst_79 = arith.constant dense<0.000000e+00> : vector<4x128xf32>
    %338 = tpu.matmul %335, %243, %cst_79 {dimension_numbers = #tpu.dot_dimension_numbers<[1], [0], [0], [1], [0, 0, 1, 1], [], []>} : vector<4x32xf32>, vector<32x128xf32>, vector<4x128xf32> -> vector<4x128xf32>
    %339 = arith.addf %337, %338 : vector<4x128xf32>
    %340 = vector.extract_strided_slice %339 {offsets = [0, 0], sizes = [4, 32], strides = [1, 1]} : vector<4x128xf32> to vector<4x32xf32>
    %341 = arith.negf %340 : vector<4x32xf32>
    %342 = math.exp %341 : vector<4x32xf32>
    %cst_80 = arith.constant 1.000000e+00 : f32
    %343 = vector.broadcast %cst_80 : f32 to vector<4x32xf32>
    %344 = arith.addf %343, %342 : vector<4x32xf32>
    %345 = arith.divf %343, %344 : vector<4x32xf32>
    %346 = vector.extract_strided_slice %339 {offsets = [0, 32], sizes = [4, 32], strides = [1, 1]} : vector<4x128xf32> to vector<4x32xf32>
    %347 = arith.negf %346 : vector<4x32xf32>
    %348 = math.exp %347 : vector<4x32xf32>
    %cst_81 = arith.constant 1.000000e+00 : f32
    %349 = vector.broadcast %cst_81 : f32 to vector<4x32xf32>
    %350 = arith.addf %349, %348 : vector<4x32xf32>
    %351 = arith.divf %349, %350 : vector<4x32xf32>
    %352 = vector.extract_strided_slice %339 {offsets = [0, 64], sizes = [4, 32], strides = [1, 1]} : vector<4x128xf32> to vector<4x32xf32>
    %353 = math.tanh %352 : vector<4x32xf32>
    %354 = vector.extract_strided_slice %339 {offsets = [0, 96], sizes = [4, 32], strides = [1, 1]} : vector<4x128xf32> to vector<4x32xf32>
    %355 = arith.negf %354 : vector<4x32xf32>
    %356 = math.exp %355 : vector<4x32xf32>
    %cst_82 = arith.constant 1.000000e+00 : f32
    %357 = vector.broadcast %cst_82 : f32 to vector<4x32xf32>
    %358 = arith.addf %357, %356 : vector<4x32xf32>
    %359 = arith.divf %357, %358 : vector<4x32xf32>
    %360 = arith.mulf %351, %333 : vector<4x32xf32>
    %361 = arith.mulf %345, %353 : vector<4x32xf32>
    %362 = arith.addf %360, %361 : vector<4x32xf32>
    %363 = math.tanh %362 : vector<4x32xf32>
    %364 = arith.mulf %359, %363 : vector<4x32xf32>
    %c12_83 = arith.constant 12 : index
    %c0_84 = arith.constant 0 : index
    %365 = vector.load %arg17[%c12_83, %c0_84] : memref<32x32xf32, #tpu.memory_space<vmem>>, vector<4x32xf32>
    tpu.vector_store %arg17[%c12_83, %c0_84], %364 {strides = array<i32>} : memref<32x32xf32, #tpu.memory_space<vmem>>, vector<4x32xf32>,
    %366 = vector.extract_strided_slice %247 {offsets = [16, 0], sizes = [4, 128], strides = [1, 1]} : vector<32x128xf32> to vector<4x128xf32>
    %cst_85 = arith.constant dense<0.000000e+00> : vector<4x128xf32>
    %367 = tpu.matmul %364, %243, %cst_85 {dimension_numbers = #tpu.dot_dimension_numbers<[1], [0], [0], [1], [0, 0, 1, 1], [], []>} : vector<4x32xf32>, vector<32x128xf32>, vector<4x128xf32> -> vector<4x128xf32>
    %368 = arith.addf %366, %367 : vector<4x128xf32>
    %369 = vector.extract_strided_slice %368 {offsets = [0, 0], sizes = [4, 32], strides = [1, 1]} : vector<4x128xf32> to vector<4x32xf32>
    %370 = arith.negf %369 : vector<4x32xf32>
    %371 = math.exp %370 : vector<4x32xf32>
    %cst_86 = arith.constant 1.000000e+00 : f32
    %372 = vector.broadcast %cst_86 : f32 to vector<4x32xf32>
    %373 = arith.addf %372, %371 : vector<4x32xf32>
    %374 = arith.divf %372, %373 : vector<4x32xf32>
    %375 = vector.extract_strided_slice %368 {offsets = [0, 32], sizes = [4, 32], strides = [1, 1]} : vector<4x128xf32> to vector<4x32xf32>
    %376 = arith.negf %375 : vector<4x32xf32>
    %377 = math.exp %376 : vector<4x32xf32>
    %cst_87 = arith.constant 1.000000e+00 : f32
    %378 = vector.broadcast %cst_87 : f32 to vector<4x32xf32>
    %379 = arith.addf %378, %377 : vector<4x32xf32>
    %380 = arith.divf %378, %379 : vector<4x32xf32>
    %381 = vector.extract_strided_slice %368 {offsets = [0, 64], sizes = [4, 32], strides = [1, 1]} : vector<4x128xf32> to vector<4x32xf32>
    %382 = math.tanh %381 : vector<4x32xf32>
    %383 = vector.extract_strided_slice %368 {offsets = [0, 96], sizes = [4, 32], strides = [1, 1]} : vector<4x128xf32> to vector<4x32xf32>
    %384 = arith.negf %383 : vector<4x32xf32>
    %385 = math.exp %384 : vector<4x32xf32>
    %cst_88 = arith.constant 1.000000e+00 : f32
    %386 = vector.broadcast %cst_88 : f32 to vector<4x32xf32>
    %387 = arith.addf %386, %385 : vector<4x32xf32>
    %388 = arith.divf %386, %387 : vector<4x32xf32>
    %389 = arith.mulf %380, %362 : vector<4x32xf32>
    %390 = arith.mulf %374, %382 : vector<4x32xf32>
    %391 = arith.addf %389, %390 : vector<4x32xf32>
    %392 = math.tanh %391 : vector<4x32xf32>
    %393 = arith.mulf %388, %392 : vector<4x32xf32>
    %c16_89 = arith.constant 16 : index
    %c0_90 = arith.constant 0 : index
    %394 = vector.load %arg17[%c16_89, %c0_90] : memref<32x32xf32, #tpu.memory_space<vmem>>, vector<4x32xf32>
    tpu.vector_store %arg17[%c16_89, %c0_90], %393 {strides = array<i32>} : memref<32x32xf32, #tpu.memory_space<vmem>>, vector<4x32xf32>,
    %395 = vector.extract_strided_slice %247 {offsets = [20, 0], sizes = [4, 128], strides = [1, 1]} : vector<32x128xf32> to vector<4x128xf32>
    %cst_91 = arith.constant dense<0.000000e+00> : vector<4x128xf32>
    %396 = tpu.matmul %393, %243, %cst_91 {dimension_numbers = #tpu.dot_dimension_numbers<[1], [0], [0], [1], [0, 0, 1, 1], [], []>} : vector<4x32xf32>, vector<32x128xf32>, vector<4x128xf32> -> vector<4x128xf32>
    %397 = arith.addf %395, %396 : vector<4x128xf32>
    %398 = vector.extract_strided_slice %397 {offsets = [0, 0], sizes = [4, 32], strides = [1, 1]} : vector<4x128xf32> to vector<4x32xf32>
    %399 = arith.negf %398 : vector<4x32xf32>
    %400 = math.exp %399 : vector<4x32xf32>
    %cst_92 = arith.constant 1.000000e+00 : f32
    %401 = vector.broadcast %cst_92 : f32 to vector<4x32xf32>
    %402 = arith.addf %401, %400 : vector<4x32xf32>
    %403 = arith.divf %401, %402 : vector<4x32xf32>
    %404 = vector.extract_strided_slice %397 {offsets = [0, 32], sizes = [4, 32], strides = [1, 1]} : vector<4x128xf32> to vector<4x32xf32>
    %405 = arith.negf %404 : vector<4x32xf32>
    %406 = math.exp %405 : vector<4x32xf32>
    %cst_93 = arith.constant 1.000000e+00 : f32
    %407 = vector.broadcast %cst_93 : f32 to vector<4x32xf32>
    %408 = arith.addf %407, %406 : vector<4x32xf32>
    %409 = arith.divf %407, %408 : vector<4x32xf32>
    %410 = vector.extract_strided_slice %397 {offsets = [0, 64], sizes = [4, 32], strides = [1, 1]} : vector<4x128xf32> to vector<4x32xf32>
    %411 = math.tanh %410 : vector<4x32xf32>
    %412 = vector.extract_strided_slice %397 {offsets = [0, 96], sizes = [4, 32], strides = [1, 1]} : vector<4x128xf32> to vector<4x32xf32>
    %413 = arith.negf %412 : vector<4x32xf32>
    %414 = math.exp %413 : vector<4x32xf32>
    %cst_94 = arith.constant 1.000000e+00 : f32
    %415 = vector.broadcast %cst_94 : f32 to vector<4x32xf32>
    %416 = arith.addf %415, %414 : vector<4x32xf32>
    %417 = arith.divf %415, %416 : vector<4x32xf32>
    %418 = arith.mulf %409, %391 : vector<4x32xf32>
    %419 = arith.mulf %403, %411 : vector<4x32xf32>
    %420 = arith.addf %418, %419 : vector<4x32xf32>
    %421 = math.tanh %420 : vector<4x32xf32>
    %422 = arith.mulf %417, %421 : vector<4x32xf32>
    %c20_95 = arith.constant 20 : index
    %c0_96 = arith.constant 0 : index
    %423 = vector.load %arg17[%c20_95, %c0_96] : memref<32x32xf32, #tpu.memory_space<vmem>>, vector<4x32xf32>
    tpu.vector_store %arg17[%c20_95, %c0_96], %422 {strides = array<i32>} : memref<32x32xf32, #tpu.memory_space<vmem>>, vector<4x32xf32>,
    %424 = vector.extract_strided_slice %247 {offsets = [24, 0], sizes = [4, 128], strides = [1, 1]} : vector<32x128xf32> to vector<4x128xf32>
    %cst_97 = arith.constant dense<0.000000e+00> : vector<4x128xf32>
    %425 = tpu.matmul %422, %243, %cst_97 {dimension_numbers = #tpu.dot_dimension_numbers<[1], [0], [0], [1], [0, 0, 1, 1], [], []>} : vector<4x32xf32>, vector<32x128xf32>, vector<4x128xf32> -> vector<4x128xf32>
    %426 = arith.addf %424, %425 : vector<4x128xf32>
    %427 = vector.extract_strided_slice %426 {offsets = [0, 0], sizes = [4, 32], strides = [1, 1]} : vector<4x128xf32> to vector<4x32xf32>
    %428 = arith.negf %427 : vector<4x32xf32>
    %429 = math.exp %428 : vector<4x32xf32>
    %cst_98 = arith.constant 1.000000e+00 : f32
    %430 = vector.broadcast %cst_98 : f32 to vector<4x32xf32>
    %431 = arith.addf %430, %429 : vector<4x32xf32>
    %432 = arith.divf %430, %431 : vector<4x32xf32>
    %433 = vector.extract_strided_slice %426 {offsets = [0, 32], sizes = [4, 32], strides = [1, 1]} : vector<4x128xf32> to vector<4x32xf32>
    %434 = arith.negf %433 : vector<4x32xf32>
    %435 = math.exp %434 : vector<4x32xf32>
    %cst_99 = arith.constant 1.000000e+00 : f32
    %436 = vector.broadcast %cst_99 : f32 to vector<4x32xf32>
    %437 = arith.addf %436, %435 : vector<4x32xf32>
    %438 = arith.divf %436, %437 : vector<4x32xf32>
    %439 = vector.extract_strided_slice %426 {offsets = [0, 64], sizes = [4, 32], strides = [1, 1]} : vector<4x128xf32> to vector<4x32xf32>
    %440 = math.tanh %439 : vector<4x32xf32>
    %441 = vector.extract_strided_slice %426 {offsets = [0, 96], sizes = [4, 32], strides = [1, 1]} : vector<4x128xf32> to vector<4x32xf32>
    %442 = arith.negf %441 : vector<4x32xf32>
    %443 = math.exp %442 : vector<4x32xf32>
    %cst_100 = arith.constant 1.000000e+00 : f32
    %444 = vector.broadcast %cst_100 : f32 to vector<4x32xf32>
    %445 = arith.addf %444, %443 : vector<4x32xf32>
    %446 = arith.divf %444, %445 : vector<4x32xf32>
    %447 = arith.mulf %438, %420 : vector<4x32xf32>
    %448 = arith.mulf %432, %440 : vector<4x32xf32>
    %449 = arith.addf %447, %448 : vector<4x32xf32>
    %450 = math.tanh %449 : vector<4x32xf32>
    %451 = arith.mulf %446, %450 : vector<4x32xf32>
    %c24_101 = arith.constant 24 : index
    %c0_102 = arith.constant 0 : index
    %452 = vector.load %arg17[%c24_101, %c0_102] : memref<32x32xf32, #tpu.memory_space<vmem>>, vector<4x32xf32>
    tpu.vector_store %arg17[%c24_101, %c0_102], %451 {strides = array<i32>} : memref<32x32xf32, #tpu.memory_space<vmem>>, vector<4x32xf32>,
    %453 = vector.extract_strided_slice %247 {offsets = [28, 0], sizes = [4, 128], strides = [1, 1]} : vector<32x128xf32> to vector<4x128xf32>
    %cst_103 = arith.constant dense<0.000000e+00> : vector<4x128xf32>
    %454 = tpu.matmul %451, %243, %cst_103 {dimension_numbers = #tpu.dot_dimension_numbers<[1], [0], [0], [1], [0, 0, 1, 1], [], []>} : vector<4x32xf32>, vector<32x128xf32>, vector<4x128xf32> -> vector<4x128xf32>
    %455 = arith.addf %453, %454 : vector<4x128xf32>
    %456 = vector.extract_strided_slice %455 {offsets = [0, 0], sizes = [4, 32], strides = [1, 1]} : vector<4x128xf32> to vector<4x32xf32>
    %457 = arith.negf %456 : vector<4x32xf32>
    %458 = math.exp %457 : vector<4x32xf32>
    %cst_104 = arith.constant 1.000000e+00 : f32
    %459 = vector.broadcast %cst_104 : f32 to vector<4x32xf32>
    %460 = arith.addf %459, %458 : vector<4x32xf32>
    %461 = arith.divf %459, %460 : vector<4x32xf32>
    %462 = vector.extract_strided_slice %455 {offsets = [0, 32], sizes = [4, 32], strides = [1, 1]} : vector<4x128xf32> to vector<4x32xf32>
    %463 = arith.negf %462 : vector<4x32xf32>
    %464 = math.exp %463 : vector<4x32xf32>
    %cst_105 = arith.constant 1.000000e+00 : f32
    %465 = vector.broadcast %cst_105 : f32 to vector<4x32xf32>
    %466 = arith.addf %465, %464 : vector<4x32xf32>
    %467 = arith.divf %465, %466 : vector<4x32xf32>
    %468 = vector.extract_strided_slice %455 {offsets = [0, 64], sizes = [4, 32], strides = [1, 1]} : vector<4x128xf32> to vector<4x32xf32>
    %469 = math.tanh %468 : vector<4x32xf32>
    %470 = vector.extract_strided_slice %455 {offsets = [0, 96], sizes = [4, 32], strides = [1, 1]} : vector<4x128xf32> to vector<4x32xf32>
    %471 = arith.negf %470 : vector<4x32xf32>
    %472 = math.exp %471 : vector<4x32xf32>
    %cst_106 = arith.constant 1.000000e+00 : f32
    %473 = vector.broadcast %cst_106 : f32 to vector<4x32xf32>
    %474 = arith.addf %473, %472 : vector<4x32xf32>
    %475 = arith.divf %473, %474 : vector<4x32xf32>
    %476 = arith.mulf %467, %449 : vector<4x32xf32>
    %477 = arith.mulf %461, %469 : vector<4x32xf32>
    %478 = arith.addf %476, %477 : vector<4x32xf32>
    %479 = math.tanh %478 : vector<4x32xf32>
    %480 = arith.mulf %475, %479 : vector<4x32xf32>
    %c28_107 = arith.constant 28 : index
    %c0_108 = arith.constant 0 : index
    %481 = vector.load %arg17[%c28_107, %c0_108] : memref<32x32xf32, #tpu.memory_space<vmem>>, vector<4x32xf32>
    tpu.vector_store %arg17[%c28_107, %c0_108], %480 {strides = array<i32>} : memref<32x32xf32, #tpu.memory_space<vmem>>, vector<4x32xf32>,
    %c0_109 = arith.constant 0 : index
    %c0_110 = arith.constant 0 : index
    %482 = vector.load %arg17[%c0_109, %c0_110] : memref<32x32xf32, #tpu.memory_space<vmem>>, vector<32x32xf32>
    %c0_111 = arith.constant 0 : index
    %c0_112 = arith.constant 0 : index
    %483 = vector.load %arg7[%c0_111, %c0_112] : memref<32x128xf32, #tpu.memory_space<vmem>>, vector<32x128xf32>
    %c0_113 = arith.constant 0 : index
    %c0_114 = arith.constant 0 : index
    %484 = vector.load %arg8[%c0_113, %c0_114] : memref<32x128xf32, #tpu.memory_space<vmem>>, vector<32x128xf32>
    %c0_115 = arith.constant 0 : index
    %c0_116 = arith.constant 0 : index
    %485 = vector.load %arg9[%c0_115, %c0_116] : memref<1x128xf32, #tpu.memory_space<vmem>>, vector<1x128xf32>
    %cst_117 = arith.constant dense<0.000000e+00> : vector<32x128xf32>
    %486 = tpu.matmul %482, %483, %cst_117 {dimension_numbers = #tpu.dot_dimension_numbers<[1], [0], [0], [1], [0, 0, 1, 1], [], []>} : vector<32x32xf32>, vector<32x128xf32>, vector<32x128xf32> -> vector<32x128xf32>
    %487 = vector.broadcast %485 : vector<1x128xf32> to vector<32x128xf32>
    %488 = arith.addf %486, %487 : vector<32x128xf32>
    %cst_118 = arith.constant 0.000000e+00 : f32
    %489 = vector.broadcast %cst_118 : f32 to vector<4x32xf32>
    %cst_119 = arith.constant 0.000000e+00 : f32
    %490 = vector.broadcast %cst_119 : f32 to vector<4x32xf32>
    %491 = vector.extract_strided_slice %488 {offsets = [0, 0], sizes = [4, 128], strides = [1, 1]} : vector<32x128xf32> to vector<4x128xf32>
    %cst_120 = arith.constant dense<0.000000e+00> : vector<4x128xf32>
    %492 = tpu.matmul %489, %484, %cst_120 {dimension_numbers = #tpu.dot_dimension_numbers<[1], [0], [0], [1], [0, 0, 1, 1], [], []>} : vector<4x32xf32>, vector<32x128xf32>, vector<4x128xf32> -> vector<4x128xf32>
    %493 = arith.addf %491, %492 : vector<4x128xf32>
    %494 = vector.extract_strided_slice %493 {offsets = [0, 0], sizes = [4, 32], strides = [1, 1]} : vector<4x128xf32> to vector<4x32xf32>
    %495 = arith.negf %494 : vector<4x32xf32>
    %496 = math.exp %495 : vector<4x32xf32>
    %cst_121 = arith.constant 1.000000e+00 : f32
    %497 = vector.broadcast %cst_121 : f32 to vector<4x32xf32>
    %498 = arith.addf %497, %496 : vector<4x32xf32>
    %499 = arith.divf %497, %498 : vector<4x32xf32>
    %500 = vector.extract_strided_slice %493 {offsets = [0, 32], sizes = [4, 32], strides = [1, 1]} : vector<4x128xf32> to vector<4x32xf32>
    %501 = arith.negf %500 : vector<4x32xf32>
    %502 = math.exp %501 : vector<4x32xf32>
    %cst_122 = arith.constant 1.000000e+00 : f32
    %503 = vector.broadcast %cst_122 : f32 to vector<4x32xf32>
    %504 = arith.addf %503, %502 : vector<4x32xf32>
    %505 = arith.divf %503, %504 : vector<4x32xf32>
    %506 = vector.extract_strided_slice %493 {offsets = [0, 64], sizes = [4, 32], strides = [1, 1]} : vector<4x128xf32> to vector<4x32xf32>
    %507 = math.tanh %506 : vector<4x32xf32>
    %508 = vector.extract_strided_slice %493 {offsets = [0, 96], sizes = [4, 32], strides = [1, 1]} : vector<4x128xf32> to vector<4x32xf32>
    %509 = arith.negf %508 : vector<4x32xf32>
    %510 = math.exp %509 : vector<4x32xf32>
    %cst_123 = arith.constant 1.000000e+00 : f32
    %511 = vector.broadcast %cst_123 : f32 to vector<4x32xf32>
    %512 = arith.addf %511, %510 : vector<4x32xf32>
    %513 = arith.divf %511, %512 : vector<4x32xf32>
    %514 = arith.mulf %505, %490 : vector<4x32xf32>
    %515 = arith.mulf %499, %507 : vector<4x32xf32>
    %516 = arith.addf %514, %515 : vector<4x32xf32>
    %517 = math.tanh %516 : vector<4x32xf32>
    %518 = arith.mulf %513, %517 : vector<4x32xf32>
    %c0_124 = arith.constant 0 : index
    %c0_125 = arith.constant 0 : index
    %519 = vector.load %arg16[%c0_124, %c0_125] : memref<32x32xf32, #tpu.memory_space<vmem>>, vector<4x32xf32>
    tpu.vector_store %arg16[%c0_124, %c0_125], %518 {strides = array<i32>} : memref<32x32xf32, #tpu.memory_space<vmem>>, vector<4x32xf32>,
    %520 = vector.extract_strided_slice %488 {offsets = [4, 0], sizes = [4, 128], strides = [1, 1]} : vector<32x128xf32> to vector<4x128xf32>
    %cst_126 = arith.constant dense<0.000000e+00> : vector<4x128xf32>
    %521 = tpu.matmul %518, %484, %cst_126 {dimension_numbers = #tpu.dot_dimension_numbers<[1], [0], [0], [1], [0, 0, 1, 1], [], []>} : vector<4x32xf32>, vector<32x128xf32>, vector<4x128xf32> -> vector<4x128xf32>
    %522 = arith.addf %520, %521 : vector<4x128xf32>
    %523 = vector.extract_strided_slice %522 {offsets = [0, 0], sizes = [4, 32], strides = [1, 1]} : vector<4x128xf32> to vector<4x32xf32>
    %524 = arith.negf %523 : vector<4x32xf32>
    %525 = math.exp %524 : vector<4x32xf32>
    %cst_127 = arith.constant 1.000000e+00 : f32
    %526 = vector.broadcast %cst_127 : f32 to vector<4x32xf32>
    %527 = arith.addf %526, %525 : vector<4x32xf32>
    %528 = arith.divf %526, %527 : vector<4x32xf32>
    %529 = vector.extract_strided_slice %522 {offsets = [0, 32], sizes = [4, 32], strides = [1, 1]} : vector<4x128xf32> to vector<4x32xf32>
    %530 = arith.negf %529 : vector<4x32xf32>
    %531 = math.exp %530 : vector<4x32xf32>
    %cst_128 = arith.constant 1.000000e+00 : f32
    %532 = vector.broadcast %cst_128 : f32 to vector<4x32xf32>
    %533 = arith.addf %532, %531 : vector<4x32xf32>
    %534 = arith.divf %532, %533 : vector<4x32xf32>
    %535 = vector.extract_strided_slice %522 {offsets = [0, 64], sizes = [4, 32], strides = [1, 1]} : vector<4x128xf32> to vector<4x32xf32>
    %536 = math.tanh %535 : vector<4x32xf32>
    %537 = vector.extract_strided_slice %522 {offsets = [0, 96], sizes = [4, 32], strides = [1, 1]} : vector<4x128xf32> to vector<4x32xf32>
    %538 = arith.negf %537 : vector<4x32xf32>
    %539 = math.exp %538 : vector<4x32xf32>
    %cst_129 = arith.constant 1.000000e+00 : f32
    %540 = vector.broadcast %cst_129 : f32 to vector<4x32xf32>
    %541 = arith.addf %540, %539 : vector<4x32xf32>
    %542 = arith.divf %540, %541 : vector<4x32xf32>
    %543 = arith.mulf %534, %516 : vector<4x32xf32>
    %544 = arith.mulf %528, %536 : vector<4x32xf32>
    %545 = arith.addf %543, %544 : vector<4x32xf32>
    %546 = math.tanh %545 : vector<4x32xf32>
    %547 = arith.mulf %542, %546 : vector<4x32xf32>
    %c4_130 = arith.constant 4 : index
    %c0_131 = arith.constant 0 : index
    %548 = vector.load %arg16[%c4_130, %c0_131] : memref<32x32xf32, #tpu.memory_space<vmem>>, vector<4x32xf32>
    tpu.vector_store %arg16[%c4_130, %c0_131], %547 {strides = array<i32>} : memref<32x32xf32, #tpu.memory_space<vmem>>, vector<4x32xf32>,
    %549 = vector.extract_strided_slice %488 {offsets = [8, 0], sizes = [4, 128], strides = [1, 1]} : vector<32x128xf32> to vector<4x128xf32>
    %cst_132 = arith.constant dense<0.000000e+00> : vector<4x128xf32>
    %550 = tpu.matmul %547, %484, %cst_132 {dimension_numbers = #tpu.dot_dimension_numbers<[1], [0], [0], [1], [0, 0, 1, 1], [], []>} : vector<4x32xf32>, vector<32x128xf32>, vector<4x128xf32> -> vector<4x128xf32>
    %551 = arith.addf %549, %550 : vector<4x128xf32>
    %552 = vector.extract_strided_slice %551 {offsets = [0, 0], sizes = [4, 32], strides = [1, 1]} : vector<4x128xf32> to vector<4x32xf32>
    %553 = arith.negf %552 : vector<4x32xf32>
    %554 = math.exp %553 : vector<4x32xf32>
    %cst_133 = arith.constant 1.000000e+00 : f32
    %555 = vector.broadcast %cst_133 : f32 to vector<4x32xf32>
    %556 = arith.addf %555, %554 : vector<4x32xf32>
    %557 = arith.divf %555, %556 : vector<4x32xf32>
    %558 = vector.extract_strided_slice %551 {offsets = [0, 32], sizes = [4, 32], strides = [1, 1]} : vector<4x128xf32> to vector<4x32xf32>
    %559 = arith.negf %558 : vector<4x32xf32>
    %560 = math.exp %559 : vector<4x32xf32>
    %cst_134 = arith.constant 1.000000e+00 : f32
    %561 = vector.broadcast %cst_134 : f32 to vector<4x32xf32>
    %562 = arith.addf %561, %560 : vector<4x32xf32>
    %563 = arith.divf %561, %562 : vector<4x32xf32>
    %564 = vector.extract_strided_slice %551 {offsets = [0, 64], sizes = [4, 32], strides = [1, 1]} : vector<4x128xf32> to vector<4x32xf32>
    %565 = math.tanh %564 : vector<4x32xf32>
    %566 = vector.extract_strided_slice %551 {offsets = [0, 96], sizes = [4, 32], strides = [1, 1]} : vector<4x128xf32> to vector<4x32xf32>
    %567 = arith.negf %566 : vector<4x32xf32>
    %568 = math.exp %567 : vector<4x32xf32>
    %cst_135 = arith.constant 1.000000e+00 : f32
    %569 = vector.broadcast %cst_135 : f32 to vector<4x32xf32>
    %570 = arith.addf %569, %568 : vector<4x32xf32>
    %571 = arith.divf %569, %570 : vector<4x32xf32>
    %572 = arith.mulf %563, %545 : vector<4x32xf32>
    %573 = arith.mulf %557, %565 : vector<4x32xf32>
    %574 = arith.addf %572, %573 : vector<4x32xf32>
    %575 = math.tanh %574 : vector<4x32xf32>
    %576 = arith.mulf %571, %575 : vector<4x32xf32>
    %c8_136 = arith.constant 8 : index
    %c0_137 = arith.constant 0 : index
    %577 = vector.load %arg16[%c8_136, %c0_137] : memref<32x32xf32, #tpu.memory_space<vmem>>, vector<4x32xf32>
    tpu.vector_store %arg16[%c8_136, %c0_137], %576 {strides = array<i32>} : memref<32x32xf32, #tpu.memory_space<vmem>>, vector<4x32xf32>,
    %578 = vector.extract_strided_slice %488 {offsets = [12, 0], sizes = [4, 128], strides = [1, 1]} : vector<32x128xf32> to vector<4x128xf32>
    %cst_138 = arith.constant dense<0.000000e+00> : vector<4x128xf32>
    %579 = tpu.matmul %576, %484, %cst_138 {dimension_numbers = #tpu.dot_dimension_numbers<[1], [0], [0], [1], [0, 0, 1, 1], [], []>} : vector<4x32xf32>, vector<32x128xf32>, vector<4x128xf32> -> vector<4x128xf32>
    %580 = arith.addf %578, %579 : vector<4x128xf32>
    %581 = vector.extract_strided_slice %580 {offsets = [0, 0], sizes = [4, 32], strides = [1, 1]} : vector<4x128xf32> to vector<4x32xf32>
    %582 = arith.negf %581 : vector<4x32xf32>
    %583 = math.exp %582 : vector<4x32xf32>
    %cst_139 = arith.constant 1.000000e+00 : f32
    %584 = vector.broadcast %cst_139 : f32 to vector<4x32xf32>
    %585 = arith.addf %584, %583 : vector<4x32xf32>
    %586 = arith.divf %584, %585 : vector<4x32xf32>
    %587 = vector.extract_strided_slice %580 {offsets = [0, 32], sizes = [4, 32], strides = [1, 1]} : vector<4x128xf32> to vector<4x32xf32>
    %588 = arith.negf %587 : vector<4x32xf32>
    %589 = math.exp %588 : vector<4x32xf32>
    %cst_140 = arith.constant 1.000000e+00 : f32
    %590 = vector.broadcast %cst_140 : f32 to vector<4x32xf32>
    %591 = arith.addf %590, %589 : vector<4x32xf32>
    %592 = arith.divf %590, %591 : vector<4x32xf32>
    %593 = vector.extract_strided_slice %580 {offsets = [0, 64], sizes = [4, 32], strides = [1, 1]} : vector<4x128xf32> to vector<4x32xf32>
    %594 = math.tanh %593 : vector<4x32xf32>
    %595 = vector.extract_strided_slice %580 {offsets = [0, 96], sizes = [4, 32], strides = [1, 1]} : vector<4x128xf32> to vector<4x32xf32>
    %596 = arith.negf %595 : vector<4x32xf32>
    %597 = math.exp %596 : vector<4x32xf32>
    %cst_141 = arith.constant 1.000000e+00 : f32
    %598 = vector.broadcast %cst_141 : f32 to vector<4x32xf32>
    %599 = arith.addf %598, %597 : vector<4x32xf32>
    %600 = arith.divf %598, %599 : vector<4x32xf32>
    %601 = arith.mulf %592, %574 : vector<4x32xf32>
    %602 = arith.mulf %586, %594 : vector<4x32xf32>
    %603 = arith.addf %601, %602 : vector<4x32xf32>
    %604 = math.tanh %603 : vector<4x32xf32>
    %605 = arith.mulf %600, %604 : vector<4x32xf32>
    %c12_142 = arith.constant 12 : index
    %c0_143 = arith.constant 0 : index
    %606 = vector.load %arg16[%c12_142, %c0_143] : memref<32x32xf32, #tpu.memory_space<vmem>>, vector<4x32xf32>
    tpu.vector_store %arg16[%c12_142, %c0_143], %605 {strides = array<i32>} : memref<32x32xf32, #tpu.memory_space<vmem>>, vector<4x32xf32>,
    %607 = vector.extract_strided_slice %488 {offsets = [16, 0], sizes = [4, 128], strides = [1, 1]} : vector<32x128xf32> to vector<4x128xf32>
    %cst_144 = arith.constant dense<0.000000e+00> : vector<4x128xf32>
    %608 = tpu.matmul %605, %484, %cst_144 {dimension_numbers = #tpu.dot_dimension_numbers<[1], [0], [0], [1], [0, 0, 1, 1], [], []>} : vector<4x32xf32>, vector<32x128xf32>, vector<4x128xf32> -> vector<4x128xf32>
    %609 = arith.addf %607, %608 : vector<4x128xf32>
    %610 = vector.extract_strided_slice %609 {offsets = [0, 0], sizes = [4, 32], strides = [1, 1]} : vector<4x128xf32> to vector<4x32xf32>
    %611 = arith.negf %610 : vector<4x32xf32>
    %612 = math.exp %611 : vector<4x32xf32>
    %cst_145 = arith.constant 1.000000e+00 : f32
    %613 = vector.broadcast %cst_145 : f32 to vector<4x32xf32>
    %614 = arith.addf %613, %612 : vector<4x32xf32>
    %615 = arith.divf %613, %614 : vector<4x32xf32>
    %616 = vector.extract_strided_slice %609 {offsets = [0, 32], sizes = [4, 32], strides = [1, 1]} : vector<4x128xf32> to vector<4x32xf32>
    %617 = arith.negf %616 : vector<4x32xf32>
    %618 = math.exp %617 : vector<4x32xf32>
    %cst_146 = arith.constant 1.000000e+00 : f32
    %619 = vector.broadcast %cst_146 : f32 to vector<4x32xf32>
    %620 = arith.addf %619, %618 : vector<4x32xf32>
    %621 = arith.divf %619, %620 : vector<4x32xf32>
    %622 = vector.extract_strided_slice %609 {offsets = [0, 64], sizes = [4, 32], strides = [1, 1]} : vector<4x128xf32> to vector<4x32xf32>
    %623 = math.tanh %622 : vector<4x32xf32>
    %624 = vector.extract_strided_slice %609 {offsets = [0, 96], sizes = [4, 32], strides = [1, 1]} : vector<4x128xf32> to vector<4x32xf32>
    %625 = arith.negf %624 : vector<4x32xf32>
    %626 = math.exp %625 : vector<4x32xf32>
    %cst_147 = arith.constant 1.000000e+00 : f32
    %627 = vector.broadcast %cst_147 : f32 to vector<4x32xf32>
    %628 = arith.addf %627, %626 : vector<4x32xf32>
    %629 = arith.divf %627, %628 : vector<4x32xf32>
    %630 = arith.mulf %621, %603 : vector<4x32xf32>
    %631 = arith.mulf %615, %623 : vector<4x32xf32>
    %632 = arith.addf %630, %631 : vector<4x32xf32>
    %633 = math.tanh %632 : vector<4x32xf32>
    %634 = arith.mulf %629, %633 : vector<4x32xf32>
    %c16_148 = arith.constant 16 : index
    %c0_149 = arith.constant 0 : index
    %635 = vector.load %arg16[%c16_148, %c0_149] : memref<32x32xf32, #tpu.memory_space<vmem>>, vector<4x32xf32>
    tpu.vector_store %arg16[%c16_148, %c0_149], %634 {strides = array<i32>} : memref<32x32xf32, #tpu.memory_space<vmem>>, vector<4x32xf32>,
    %636 = vector.extract_strided_slice %488 {offsets = [20, 0], sizes = [4, 128], strides = [1, 1]} : vector<32x128xf32> to vector<4x128xf32>
    %cst_150 = arith.constant dense<0.000000e+00> : vector<4x128xf32>
    %637 = tpu.matmul %634, %484, %cst_150 {dimension_numbers = #tpu.dot_dimension_numbers<[1], [0], [0], [1], [0, 0, 1, 1], [], []>} : vector<4x32xf32>, vector<32x128xf32>, vector<4x128xf32> -> vector<4x128xf32>
    %638 = arith.addf %636, %637 : vector<4x128xf32>
    %639 = vector.extract_strided_slice %638 {offsets = [0, 0], sizes = [4, 32], strides = [1, 1]} : vector<4x128xf32> to vector<4x32xf32>
    %640 = arith.negf %639 : vector<4x32xf32>
    %641 = math.exp %640 : vector<4x32xf32>
    %cst_151 = arith.constant 1.000000e+00 : f32
    %642 = vector.broadcast %cst_151 : f32 to vector<4x32xf32>
    %643 = arith.addf %642, %641 : vector<4x32xf32>
    %644 = arith.divf %642, %643 : vector<4x32xf32>
    %645 = vector.extract_strided_slice %638 {offsets = [0, 32], sizes = [4, 32], strides = [1, 1]} : vector<4x128xf32> to vector<4x32xf32>
    %646 = arith.negf %645 : vector<4x32xf32>
    %647 = math.exp %646 : vector<4x32xf32>
    %cst_152 = arith.constant 1.000000e+00 : f32
    %648 = vector.broadcast %cst_152 : f32 to vector<4x32xf32>
    %649 = arith.addf %648, %647 : vector<4x32xf32>
    %650 = arith.divf %648, %649 : vector<4x32xf32>
    %651 = vector.extract_strided_slice %638 {offsets = [0, 64], sizes = [4, 32], strides = [1, 1]} : vector<4x128xf32> to vector<4x32xf32>
    %652 = math.tanh %651 : vector<4x32xf32>
    %653 = vector.extract_strided_slice %638 {offsets = [0, 96], sizes = [4, 32], strides = [1, 1]} : vector<4x128xf32> to vector<4x32xf32>
    %654 = arith.negf %653 : vector<4x32xf32>
    %655 = math.exp %654 : vector<4x32xf32>
    %cst_153 = arith.constant 1.000000e+00 : f32
    %656 = vector.broadcast %cst_153 : f32 to vector<4x32xf32>
    %657 = arith.addf %656, %655 : vector<4x32xf32>
    %658 = arith.divf %656, %657 : vector<4x32xf32>
    %659 = arith.mulf %650, %632 : vector<4x32xf32>
    %660 = arith.mulf %644, %652 : vector<4x32xf32>
    %661 = arith.addf %659, %660 : vector<4x32xf32>
    %662 = math.tanh %661 : vector<4x32xf32>
    %663 = arith.mulf %658, %662 : vector<4x32xf32>
    %c20_154 = arith.constant 20 : index
    %c0_155 = arith.constant 0 : index
    %664 = vector.load %arg16[%c20_154, %c0_155] : memref<32x32xf32, #tpu.memory_space<vmem>>, vector<4x32xf32>
    tpu.vector_store %arg16[%c20_154, %c0_155], %663 {strides = array<i32>} : memref<32x32xf32, #tpu.memory_space<vmem>>, vector<4x32xf32>,
    %665 = vector.extract_strided_slice %488 {offsets = [24, 0], sizes = [4, 128], strides = [1, 1]} : vector<32x128xf32> to vector<4x128xf32>
    %cst_156 = arith.constant dense<0.000000e+00> : vector<4x128xf32>
    %666 = tpu.matmul %663, %484, %cst_156 {dimension_numbers = #tpu.dot_dimension_numbers<[1], [0], [0], [1], [0, 0, 1, 1], [], []>} : vector<4x32xf32>, vector<32x128xf32>, vector<4x128xf32> -> vector<4x128xf32>
    %667 = arith.addf %665, %666 : vector<4x128xf32>
    %668 = vector.extract_strided_slice %667 {offsets = [0, 0], sizes = [4, 32], strides = [1, 1]} : vector<4x128xf32> to vector<4x32xf32>
    %669 = arith.negf %668 : vector<4x32xf32>
    %670 = math.exp %669 : vector<4x32xf32>
    %cst_157 = arith.constant 1.000000e+00 : f32
    %671 = vector.broadcast %cst_157 : f32 to vector<4x32xf32>
    %672 = arith.addf %671, %670 : vector<4x32xf32>
    %673 = arith.divf %671, %672 : vector<4x32xf32>
    %674 = vector.extract_strided_slice %667 {offsets = [0, 32], sizes = [4, 32], strides = [1, 1]} : vector<4x128xf32> to vector<4x32xf32>
    %675 = arith.negf %674 : vector<4x32xf32>
    %676 = math.exp %675 : vector<4x32xf32>
    %cst_158 = arith.constant 1.000000e+00 : f32
    %677 = vector.broadcast %cst_158 : f32 to vector<4x32xf32>
    %678 = arith.addf %677, %676 : vector<4x32xf32>
    %679 = arith.divf %677, %678 : vector<4x32xf32>
    %680 = vector.extract_strided_slice %667 {offsets = [0, 64], sizes = [4, 32], strides = [1, 1]} : vector<4x128xf32> to vector<4x32xf32>
    %681 = math.tanh %680 : vector<4x32xf32>
    %682 = vector.extract_strided_slice %667 {offsets = [0, 96], sizes = [4, 32], strides = [1, 1]} : vector<4x128xf32> to vector<4x32xf32>
    %683 = arith.negf %682 : vector<4x32xf32>
    %684 = math.exp %683 : vector<4x32xf32>
    %cst_159 = arith.constant 1.000000e+00 : f32
    %685 = vector.broadcast %cst_159 : f32 to vector<4x32xf32>
    %686 = arith.addf %685, %684 : vector<4x32xf32>
    %687 = arith.divf %685, %686 : vector<4x32xf32>
    %688 = arith.mulf %679, %661 : vector<4x32xf32>
    %689 = arith.mulf %673, %681 : vector<4x32xf32>
    %690 = arith.addf %688, %689 : vector<4x32xf32>
    %691 = math.tanh %690 : vector<4x32xf32>
    %692 = arith.mulf %687, %691 : vector<4x32xf32>
    %c24_160 = arith.constant 24 : index
    %c0_161 = arith.constant 0 : index
    %693 = vector.load %arg16[%c24_160, %c0_161] : memref<32x32xf32, #tpu.memory_space<vmem>>, vector<4x32xf32>
    tpu.vector_store %arg16[%c24_160, %c0_161], %692 {strides = array<i32>} : memref<32x32xf32, #tpu.memory_space<vmem>>, vector<4x32xf32>,
    %694 = vector.extract_strided_slice %488 {offsets = [28, 0], sizes = [4, 128], strides = [1, 1]} : vector<32x128xf32> to vector<4x128xf32>
    %cst_162 = arith.constant dense<0.000000e+00> : vector<4x128xf32>
    %695 = tpu.matmul %692, %484, %cst_162 {dimension_numbers = #tpu.dot_dimension_numbers<[1], [0], [0], [1], [0, 0, 1, 1], [], []>} : vector<4x32xf32>, vector<32x128xf32>, vector<4x128xf32> -> vector<4x128xf32>
    %696 = arith.addf %694, %695 : vector<4x128xf32>
    %697 = vector.extract_strided_slice %696 {offsets = [0, 0], sizes = [4, 32], strides = [1, 1]} : vector<4x128xf32> to vector<4x32xf32>
    %698 = arith.negf %697 : vector<4x32xf32>
    %699 = math.exp %698 : vector<4x32xf32>
    %cst_163 = arith.constant 1.000000e+00 : f32
    %700 = vector.broadcast %cst_163 : f32 to vector<4x32xf32>
    %701 = arith.addf %700, %699 : vector<4x32xf32>
    %702 = arith.divf %700, %701 : vector<4x32xf32>
    %703 = vector.extract_strided_slice %696 {offsets = [0, 32], sizes = [4, 32], strides = [1, 1]} : vector<4x128xf32> to vector<4x32xf32>
    %704 = arith.negf %703 : vector<4x32xf32>
    %705 = math.exp %704 : vector<4x32xf32>
    %cst_164 = arith.constant 1.000000e+00 : f32
    %706 = vector.broadcast %cst_164 : f32 to vector<4x32xf32>
    %707 = arith.addf %706, %705 : vector<4x32xf32>
    %708 = arith.divf %706, %707 : vector<4x32xf32>
    %709 = vector.extract_strided_slice %696 {offsets = [0, 64], sizes = [4, 32], strides = [1, 1]} : vector<4x128xf32> to vector<4x32xf32>
    %710 = math.tanh %709 : vector<4x32xf32>
    %711 = vector.extract_strided_slice %696 {offsets = [0, 96], sizes = [4, 32], strides = [1, 1]} : vector<4x128xf32> to vector<4x32xf32>
    %712 = arith.negf %711 : vector<4x32xf32>
    %713 = math.exp %712 : vector<4x32xf32>
    %cst_165 = arith.constant 1.000000e+00 : f32
    %714 = vector.broadcast %cst_165 : f32 to vector<4x32xf32>
    %715 = arith.addf %714, %713 : vector<4x32xf32>
    %716 = arith.divf %714, %715 : vector<4x32xf32>
    %717 = arith.mulf %708, %690 : vector<4x32xf32>
    %718 = arith.mulf %702, %710 : vector<4x32xf32>
    %719 = arith.addf %717, %718 : vector<4x32xf32>
    %720 = math.tanh %719 : vector<4x32xf32>
    %721 = arith.mulf %716, %720 : vector<4x32xf32>
    %c28_166 = arith.constant 28 : index
    %c0_167 = arith.constant 0 : index
    %722 = vector.load %arg16[%c28_166, %c0_167] : memref<32x32xf32, #tpu.memory_space<vmem>>, vector<4x32xf32>
    tpu.vector_store %arg16[%c28_166, %c0_167], %721 {strides = array<i32>} : memref<32x32xf32, #tpu.memory_space<vmem>>, vector<4x32xf32>,
    %c0_168 = arith.constant 0 : index
    %c0_169 = arith.constant 0 : index
    %723 = vector.load %arg16[%c0_168, %c0_169] : memref<32x32xf32, #tpu.memory_space<vmem>>, vector<32x32xf32>
    %c0_170 = arith.constant 0 : index
    %c0_171 = arith.constant 0 : index
    %724 = vector.load %arg10[%c0_170, %c0_171] : memref<32x128xf32, #tpu.memory_space<vmem>>, vector<32x128xf32>
    %c0_172 = arith.constant 0 : index
    %c0_173 = arith.constant 0 : index
    %725 = vector.load %arg11[%c0_172, %c0_173] : memref<32x128xf32, #tpu.memory_space<vmem>>, vector<32x128xf32>
    %c0_174 = arith.constant 0 : index
    %c0_175 = arith.constant 0 : index
    %726 = vector.load %arg12[%c0_174, %c0_175] : memref<1x128xf32, #tpu.memory_space<vmem>>, vector<1x128xf32>
    %cst_176 = arith.constant dense<0.000000e+00> : vector<32x128xf32>
    %727 = tpu.matmul %723, %724, %cst_176 {dimension_numbers = #tpu.dot_dimension_numbers<[1], [0], [0], [1], [0, 0, 1, 1], [], []>} : vector<32x32xf32>, vector<32x128xf32>, vector<32x128xf32> -> vector<32x128xf32>
    %728 = vector.broadcast %726 : vector<1x128xf32> to vector<32x128xf32>
    %729 = arith.addf %727, %728 : vector<32x128xf32>
    %cst_177 = arith.constant 0.000000e+00 : f32
    %730 = vector.broadcast %cst_177 : f32 to vector<4x32xf32>
    %cst_178 = arith.constant 0.000000e+00 : f32
    %731 = vector.broadcast %cst_178 : f32 to vector<4x32xf32>
    %732 = vector.extract_strided_slice %729 {offsets = [0, 0], sizes = [4, 128], strides = [1, 1]} : vector<32x128xf32> to vector<4x128xf32>
    %cst_179 = arith.constant dense<0.000000e+00> : vector<4x128xf32>
    %733 = tpu.matmul %730, %725, %cst_179 {dimension_numbers = #tpu.dot_dimension_numbers<[1], [0], [0], [1], [0, 0, 1, 1], [], []>} : vector<4x32xf32>, vector<32x128xf32>, vector<4x128xf32> -> vector<4x128xf32>
    %734 = arith.addf %732, %733 : vector<4x128xf32>
    %735 = vector.extract_strided_slice %734 {offsets = [0, 0], sizes = [4, 32], strides = [1, 1]} : vector<4x128xf32> to vector<4x32xf32>
    %736 = arith.negf %735 : vector<4x32xf32>
    %737 = math.exp %736 : vector<4x32xf32>
    %cst_180 = arith.constant 1.000000e+00 : f32
    %738 = vector.broadcast %cst_180 : f32 to vector<4x32xf32>
    %739 = arith.addf %738, %737 : vector<4x32xf32>
    %740 = arith.divf %738, %739 : vector<4x32xf32>
    %741 = vector.extract_strided_slice %734 {offsets = [0, 32], sizes = [4, 32], strides = [1, 1]} : vector<4x128xf32> to vector<4x32xf32>
    %742 = arith.negf %741 : vector<4x32xf32>
    %743 = math.exp %742 : vector<4x32xf32>
    %cst_181 = arith.constant 1.000000e+00 : f32
    %744 = vector.broadcast %cst_181 : f32 to vector<4x32xf32>
    %745 = arith.addf %744, %743 : vector<4x32xf32>
    %746 = arith.divf %744, %745 : vector<4x32xf32>
    %747 = vector.extract_strided_slice %734 {offsets = [0, 64], sizes = [4, 32], strides = [1, 1]} : vector<4x128xf32> to vector<4x32xf32>
    %748 = math.tanh %747 : vector<4x32xf32>
    %749 = vector.extract_strided_slice %734 {offsets = [0, 96], sizes = [4, 32], strides = [1, 1]} : vector<4x128xf32> to vector<4x32xf32>
    %750 = arith.negf %749 : vector<4x32xf32>
    %751 = math.exp %750 : vector<4x32xf32>
    %cst_182 = arith.constant 1.000000e+00 : f32
    %752 = vector.broadcast %cst_182 : f32 to vector<4x32xf32>
    %753 = arith.addf %752, %751 : vector<4x32xf32>
    %754 = arith.divf %752, %753 : vector<4x32xf32>
    %755 = arith.mulf %746, %731 : vector<4x32xf32>
    %756 = arith.mulf %740, %748 : vector<4x32xf32>
    %757 = arith.addf %755, %756 : vector<4x32xf32>
    %758 = math.tanh %757 : vector<4x32xf32>
    %759 = arith.mulf %754, %758 : vector<4x32xf32>
    %c0_183 = arith.constant 0 : index
    %c0_184 = arith.constant 0 : index
    %760 = vector.load %arg17[%c0_183, %c0_184] : memref<32x32xf32, #tpu.memory_space<vmem>>, vector<4x32xf32>
    tpu.vector_store %arg17[%c0_183, %c0_184], %759 {strides = array<i32>} : memref<32x32xf32, #tpu.memory_space<vmem>>, vector<4x32xf32>,
    %761 = vector.extract_strided_slice %729 {offsets = [4, 0], sizes = [4, 128], strides = [1, 1]} : vector<32x128xf32> to vector<4x128xf32>
    %cst_185 = arith.constant dense<0.000000e+00> : vector<4x128xf32>
    %762 = tpu.matmul %759, %725, %cst_185 {dimension_numbers = #tpu.dot_dimension_numbers<[1], [0], [0], [1], [0, 0, 1, 1], [], []>} : vector<4x32xf32>, vector<32x128xf32>, vector<4x128xf32> -> vector<4x128xf32>
    %763 = arith.addf %761, %762 : vector<4x128xf32>
    %764 = vector.extract_strided_slice %763 {offsets = [0, 0], sizes = [4, 32], strides = [1, 1]} : vector<4x128xf32> to vector<4x32xf32>
    %765 = arith.negf %764 : vector<4x32xf32>
    %766 = math.exp %765 : vector<4x32xf32>
    %cst_186 = arith.constant 1.000000e+00 : f32
    %767 = vector.broadcast %cst_186 : f32 to vector<4x32xf32>
    %768 = arith.addf %767, %766 : vector<4x32xf32>
    %769 = arith.divf %767, %768 : vector<4x32xf32>
    %770 = vector.extract_strided_slice %763 {offsets = [0, 32], sizes = [4, 32], strides = [1, 1]} : vector<4x128xf32> to vector<4x32xf32>
    %771 = arith.negf %770 : vector<4x32xf32>
    %772 = math.exp %771 : vector<4x32xf32>
    %cst_187 = arith.constant 1.000000e+00 : f32
    %773 = vector.broadcast %cst_187 : f32 to vector<4x32xf32>
    %774 = arith.addf %773, %772 : vector<4x32xf32>
    %775 = arith.divf %773, %774 : vector<4x32xf32>
    %776 = vector.extract_strided_slice %763 {offsets = [0, 64], sizes = [4, 32], strides = [1, 1]} : vector<4x128xf32> to vector<4x32xf32>
    %777 = math.tanh %776 : vector<4x32xf32>
    %778 = vector.extract_strided_slice %763 {offsets = [0, 96], sizes = [4, 32], strides = [1, 1]} : vector<4x128xf32> to vector<4x32xf32>
    %779 = arith.negf %778 : vector<4x32xf32>
    %780 = math.exp %779 : vector<4x32xf32>
    %cst_188 = arith.constant 1.000000e+00 : f32
    %781 = vector.broadcast %cst_188 : f32 to vector<4x32xf32>
    %782 = arith.addf %781, %780 : vector<4x32xf32>
    %783 = arith.divf %781, %782 : vector<4x32xf32>
    %784 = arith.mulf %775, %757 : vector<4x32xf32>
    %785 = arith.mulf %769, %777 : vector<4x32xf32>
    %786 = arith.addf %784, %785 : vector<4x32xf32>
    %787 = math.tanh %786 : vector<4x32xf32>
    %788 = arith.mulf %783, %787 : vector<4x32xf32>
    %c4_189 = arith.constant 4 : index
    %c0_190 = arith.constant 0 : index
    %789 = vector.load %arg17[%c4_189, %c0_190] : memref<32x32xf32, #tpu.memory_space<vmem>>, vector<4x32xf32>
    tpu.vector_store %arg17[%c4_189, %c0_190], %788 {strides = array<i32>} : memref<32x32xf32, #tpu.memory_space<vmem>>, vector<4x32xf32>,
    %790 = vector.extract_strided_slice %729 {offsets = [8, 0], sizes = [4, 128], strides = [1, 1]} : vector<32x128xf32> to vector<4x128xf32>
    %cst_191 = arith.constant dense<0.000000e+00> : vector<4x128xf32>
    %791 = tpu.matmul %788, %725, %cst_191 {dimension_numbers = #tpu.dot_dimension_numbers<[1], [0], [0], [1], [0, 0, 1, 1], [], []>} : vector<4x32xf32>, vector<32x128xf32>, vector<4x128xf32> -> vector<4x128xf32>
    %792 = arith.addf %790, %791 : vector<4x128xf32>
    %793 = vector.extract_strided_slice %792 {offsets = [0, 0], sizes = [4, 32], strides = [1, 1]} : vector<4x128xf32> to vector<4x32xf32>
    %794 = arith.negf %793 : vector<4x32xf32>
    %795 = math.exp %794 : vector<4x32xf32>
    %cst_192 = arith.constant 1.000000e+00 : f32
    %796 = vector.broadcast %cst_192 : f32 to vector<4x32xf32>
    %797 = arith.addf %796, %795 : vector<4x32xf32>
    %798 = arith.divf %796, %797 : vector<4x32xf32>
    %799 = vector.extract_strided_slice %792 {offsets = [0, 32], sizes = [4, 32], strides = [1, 1]} : vector<4x128xf32> to vector<4x32xf32>
    %800 = arith.negf %799 : vector<4x32xf32>
    %801 = math.exp %800 : vector<4x32xf32>
    %cst_193 = arith.constant 1.000000e+00 : f32
    %802 = vector.broadcast %cst_193 : f32 to vector<4x32xf32>
    %803 = arith.addf %802, %801 : vector<4x32xf32>
    %804 = arith.divf %802, %803 : vector<4x32xf32>
    %805 = vector.extract_strided_slice %792 {offsets = [0, 64], sizes = [4, 32], strides = [1, 1]} : vector<4x128xf32> to vector<4x32xf32>
    %806 = math.tanh %805 : vector<4x32xf32>
    %807 = vector.extract_strided_slice %792 {offsets = [0, 96], sizes = [4, 32], strides = [1, 1]} : vector<4x128xf32> to vector<4x32xf32>
    %808 = arith.negf %807 : vector<4x32xf32>
    %809 = math.exp %808 : vector<4x32xf32>
    %cst_194 = arith.constant 1.000000e+00 : f32
    %810 = vector.broadcast %cst_194 : f32 to vector<4x32xf32>
    %811 = arith.addf %810, %809 : vector<4x32xf32>
    %812 = arith.divf %810, %811 : vector<4x32xf32>
    %813 = arith.mulf %804, %786 : vector<4x32xf32>
    %814 = arith.mulf %798, %806 : vector<4x32xf32>
    %815 = arith.addf %813, %814 : vector<4x32xf32>
    %816 = math.tanh %815 : vector<4x32xf32>
    %817 = arith.mulf %812, %816 : vector<4x32xf32>
    %c8_195 = arith.constant 8 : index
    %c0_196 = arith.constant 0 : index
    %818 = vector.load %arg17[%c8_195, %c0_196] : memref<32x32xf32, #tpu.memory_space<vmem>>, vector<4x32xf32>
    tpu.vector_store %arg17[%c8_195, %c0_196], %817 {strides = array<i32>} : memref<32x32xf32, #tpu.memory_space<vmem>>, vector<4x32xf32>,
    %819 = vector.extract_strided_slice %729 {offsets = [12, 0], sizes = [4, 128], strides = [1, 1]} : vector<32x128xf32> to vector<4x128xf32>
    %cst_197 = arith.constant dense<0.000000e+00> : vector<4x128xf32>
    %820 = tpu.matmul %817, %725, %cst_197 {dimension_numbers = #tpu.dot_dimension_numbers<[1], [0], [0], [1], [0, 0, 1, 1], [], []>} : vector<4x32xf32>, vector<32x128xf32>, vector<4x128xf32> -> vector<4x128xf32>
    %821 = arith.addf %819, %820 : vector<4x128xf32>
    %822 = vector.extract_strided_slice %821 {offsets = [0, 0], sizes = [4, 32], strides = [1, 1]} : vector<4x128xf32> to vector<4x32xf32>
    %823 = arith.negf %822 : vector<4x32xf32>
    %824 = math.exp %823 : vector<4x32xf32>
    %cst_198 = arith.constant 1.000000e+00 : f32
    %825 = vector.broadcast %cst_198 : f32 to vector<4x32xf32>
    %826 = arith.addf %825, %824 : vector<4x32xf32>
    %827 = arith.divf %825, %826 : vector<4x32xf32>
    %828 = vector.extract_strided_slice %821 {offsets = [0, 32], sizes = [4, 32], strides = [1, 1]} : vector<4x128xf32> to vector<4x32xf32>
    %829 = arith.negf %828 : vector<4x32xf32>
    %830 = math.exp %829 : vector<4x32xf32>
    %cst_199 = arith.constant 1.000000e+00 : f32
    %831 = vector.broadcast %cst_199 : f32 to vector<4x32xf32>
    %832 = arith.addf %831, %830 : vector<4x32xf32>
    %833 = arith.divf %831, %832 : vector<4x32xf32>
    %834 = vector.extract_strided_slice %821 {offsets = [0, 64], sizes = [4, 32], strides = [1, 1]} : vector<4x128xf32> to vector<4x32xf32>
    %835 = math.tanh %834 : vector<4x32xf32>
    %836 = vector.extract_strided_slice %821 {offsets = [0, 96], sizes = [4, 32], strides = [1, 1]} : vector<4x128xf32> to vector<4x32xf32>
    %837 = arith.negf %836 : vector<4x32xf32>
    %838 = math.exp %837 : vector<4x32xf32>
    %cst_200 = arith.constant 1.000000e+00 : f32
    %839 = vector.broadcast %cst_200 : f32 to vector<4x32xf32>
    %840 = arith.addf %839, %838 : vector<4x32xf32>
    %841 = arith.divf %839, %840 : vector<4x32xf32>
    %842 = arith.mulf %833, %815 : vector<4x32xf32>
    %843 = arith.mulf %827, %835 : vector<4x32xf32>
    %844 = arith.addf %842, %843 : vector<4x32xf32>
    %845 = math.tanh %844 : vector<4x32xf32>
    %846 = arith.mulf %841, %845 : vector<4x32xf32>
    %c12_201 = arith.constant 12 : index
    %c0_202 = arith.constant 0 : index
    %847 = vector.load %arg17[%c12_201, %c0_202] : memref<32x32xf32, #tpu.memory_space<vmem>>, vector<4x32xf32>
    tpu.vector_store %arg17[%c12_201, %c0_202], %846 {strides = array<i32>} : memref<32x32xf32, #tpu.memory_space<vmem>>, vector<4x32xf32>,
    %848 = vector.extract_strided_slice %729 {offsets = [16, 0], sizes = [4, 128], strides = [1, 1]} : vector<32x128xf32> to vector<4x128xf32>
    %cst_203 = arith.constant dense<0.000000e+00> : vector<4x128xf32>
    %849 = tpu.matmul %846, %725, %cst_203 {dimension_numbers = #tpu.dot_dimension_numbers<[1], [0], [0], [1], [0, 0, 1, 1], [], []>} : vector<4x32xf32>, vector<32x128xf32>, vector<4x128xf32> -> vector<4x128xf32>
    %850 = arith.addf %848, %849 : vector<4x128xf32>
    %851 = vector.extract_strided_slice %850 {offsets = [0, 0], sizes = [4, 32], strides = [1, 1]} : vector<4x128xf32> to vector<4x32xf32>
    %852 = arith.negf %851 : vector<4x32xf32>
    %853 = math.exp %852 : vector<4x32xf32>
    %cst_204 = arith.constant 1.000000e+00 : f32
    %854 = vector.broadcast %cst_204 : f32 to vector<4x32xf32>
    %855 = arith.addf %854, %853 : vector<4x32xf32>
    %856 = arith.divf %854, %855 : vector<4x32xf32>
    %857 = vector.extract_strided_slice %850 {offsets = [0, 32], sizes = [4, 32], strides = [1, 1]} : vector<4x128xf32> to vector<4x32xf32>
    %858 = arith.negf %857 : vector<4x32xf32>
    %859 = math.exp %858 : vector<4x32xf32>
    %cst_205 = arith.constant 1.000000e+00 : f32
    %860 = vector.broadcast %cst_205 : f32 to vector<4x32xf32>
    %861 = arith.addf %860, %859 : vector<4x32xf32>
    %862 = arith.divf %860, %861 : vector<4x32xf32>
    %863 = vector.extract_strided_slice %850 {offsets = [0, 64], sizes = [4, 32], strides = [1, 1]} : vector<4x128xf32> to vector<4x32xf32>
    %864 = math.tanh %863 : vector<4x32xf32>
    %865 = vector.extract_strided_slice %850 {offsets = [0, 96], sizes = [4, 32], strides = [1, 1]} : vector<4x128xf32> to vector<4x32xf32>
    %866 = arith.negf %865 : vector<4x32xf32>
    %867 = math.exp %866 : vector<4x32xf32>
    %cst_206 = arith.constant 1.000000e+00 : f32
    %868 = vector.broadcast %cst_206 : f32 to vector<4x32xf32>
    %869 = arith.addf %868, %867 : vector<4x32xf32>
    %870 = arith.divf %868, %869 : vector<4x32xf32>
    %871 = arith.mulf %862, %844 : vector<4x32xf32>
    %872 = arith.mulf %856, %864 : vector<4x32xf32>
    %873 = arith.addf %871, %872 : vector<4x32xf32>
    %874 = math.tanh %873 : vector<4x32xf32>
    %875 = arith.mulf %870, %874 : vector<4x32xf32>
    %c16_207 = arith.constant 16 : index
    %c0_208 = arith.constant 0 : index
    %876 = vector.load %arg17[%c16_207, %c0_208] : memref<32x32xf32, #tpu.memory_space<vmem>>, vector<4x32xf32>
    tpu.vector_store %arg17[%c16_207, %c0_208], %875 {strides = array<i32>} : memref<32x32xf32, #tpu.memory_space<vmem>>, vector<4x32xf32>,
    %877 = vector.extract_strided_slice %729 {offsets = [20, 0], sizes = [4, 128], strides = [1, 1]} : vector<32x128xf32> to vector<4x128xf32>
    %cst_209 = arith.constant dense<0.000000e+00> : vector<4x128xf32>
    %878 = tpu.matmul %875, %725, %cst_209 {dimension_numbers = #tpu.dot_dimension_numbers<[1], [0], [0], [1], [0, 0, 1, 1], [], []>} : vector<4x32xf32>, vector<32x128xf32>, vector<4x128xf32> -> vector<4x128xf32>
    %879 = arith.addf %877, %878 : vector<4x128xf32>
    %880 = vector.extract_strided_slice %879 {offsets = [0, 0], sizes = [4, 32], strides = [1, 1]} : vector<4x128xf32> to vector<4x32xf32>
    %881 = arith.negf %880 : vector<4x32xf32>
    %882 = math.exp %881 : vector<4x32xf32>
    %cst_210 = arith.constant 1.000000e+00 : f32
    %883 = vector.broadcast %cst_210 : f32 to vector<4x32xf32>
    %884 = arith.addf %883, %882 : vector<4x32xf32>
    %885 = arith.divf %883, %884 : vector<4x32xf32>
    %886 = vector.extract_strided_slice %879 {offsets = [0, 32], sizes = [4, 32], strides = [1, 1]} : vector<4x128xf32> to vector<4x32xf32>
    %887 = arith.negf %886 : vector<4x32xf32>
    %888 = math.exp %887 : vector<4x32xf32>
    %cst_211 = arith.constant 1.000000e+00 : f32
    %889 = vector.broadcast %cst_211 : f32 to vector<4x32xf32>
    %890 = arith.addf %889, %888 : vector<4x32xf32>
    %891 = arith.divf %889, %890 : vector<4x32xf32>
    %892 = vector.extract_strided_slice %879 {offsets = [0, 64], sizes = [4, 32], strides = [1, 1]} : vector<4x128xf32> to vector<4x32xf32>
    %893 = math.tanh %892 : vector<4x32xf32>
    %894 = vector.extract_strided_slice %879 {offsets = [0, 96], sizes = [4, 32], strides = [1, 1]} : vector<4x128xf32> to vector<4x32xf32>
    %895 = arith.negf %894 : vector<4x32xf32>
    %896 = math.exp %895 : vector<4x32xf32>
    %cst_212 = arith.constant 1.000000e+00 : f32
    %897 = vector.broadcast %cst_212 : f32 to vector<4x32xf32>
    %898 = arith.addf %897, %896 : vector<4x32xf32>
    %899 = arith.divf %897, %898 : vector<4x32xf32>
    %900 = arith.mulf %891, %873 : vector<4x32xf32>
    %901 = arith.mulf %885, %893 : vector<4x32xf32>
    %902 = arith.addf %900, %901 : vector<4x32xf32>
    %903 = math.tanh %902 : vector<4x32xf32>
    %904 = arith.mulf %899, %903 : vector<4x32xf32>
    %c20_213 = arith.constant 20 : index
    %c0_214 = arith.constant 0 : index
    %905 = vector.load %arg17[%c20_213, %c0_214] : memref<32x32xf32, #tpu.memory_space<vmem>>, vector<4x32xf32>
    tpu.vector_store %arg17[%c20_213, %c0_214], %904 {strides = array<i32>} : memref<32x32xf32, #tpu.memory_space<vmem>>, vector<4x32xf32>,
    %906 = vector.extract_strided_slice %729 {offsets = [24, 0], sizes = [4, 128], strides = [1, 1]} : vector<32x128xf32> to vector<4x128xf32>
    %cst_215 = arith.constant dense<0.000000e+00> : vector<4x128xf32>
    %907 = tpu.matmul %904, %725, %cst_215 {dimension_numbers = #tpu.dot_dimension_numbers<[1], [0], [0], [1], [0, 0, 1, 1], [], []>} : vector<4x32xf32>, vector<32x128xf32>, vector<4x128xf32> -> vector<4x128xf32>
    %908 = arith.addf %906, %907 : vector<4x128xf32>
    %909 = vector.extract_strided_slice %908 {offsets = [0, 0], sizes = [4, 32], strides = [1, 1]} : vector<4x128xf32> to vector<4x32xf32>
    %910 = arith.negf %909 : vector<4x32xf32>
    %911 = math.exp %910 : vector<4x32xf32>
    %cst_216 = arith.constant 1.000000e+00 : f32
    %912 = vector.broadcast %cst_216 : f32 to vector<4x32xf32>
    %913 = arith.addf %912, %911 : vector<4x32xf32>
    %914 = arith.divf %912, %913 : vector<4x32xf32>
    %915 = vector.extract_strided_slice %908 {offsets = [0, 32], sizes = [4, 32], strides = [1, 1]} : vector<4x128xf32> to vector<4x32xf32>
    %916 = arith.negf %915 : vector<4x32xf32>
    %917 = math.exp %916 : vector<4x32xf32>
    %cst_217 = arith.constant 1.000000e+00 : f32
    %918 = vector.broadcast %cst_217 : f32 to vector<4x32xf32>
    %919 = arith.addf %918, %917 : vector<4x32xf32>
    %920 = arith.divf %918, %919 : vector<4x32xf32>
    %921 = vector.extract_strided_slice %908 {offsets = [0, 64], sizes = [4, 32], strides = [1, 1]} : vector<4x128xf32> to vector<4x32xf32>
    %922 = math.tanh %921 : vector<4x32xf32>
    %923 = vector.extract_strided_slice %908 {offsets = [0, 96], sizes = [4, 32], strides = [1, 1]} : vector<4x128xf32> to vector<4x32xf32>
    %924 = arith.negf %923 : vector<4x32xf32>
    %925 = math.exp %924 : vector<4x32xf32>
    %cst_218 = arith.constant 1.000000e+00 : f32
    %926 = vector.broadcast %cst_218 : f32 to vector<4x32xf32>
    %927 = arith.addf %926, %925 : vector<4x32xf32>
    %928 = arith.divf %926, %927 : vector<4x32xf32>
    %929 = arith.mulf %920, %902 : vector<4x32xf32>
    %930 = arith.mulf %914, %922 : vector<4x32xf32>
    %931 = arith.addf %929, %930 : vector<4x32xf32>
    %932 = math.tanh %931 : vector<4x32xf32>
    %933 = arith.mulf %928, %932 : vector<4x32xf32>
    %c24_219 = arith.constant 24 : index
    %c0_220 = arith.constant 0 : index
    %934 = vector.load %arg17[%c24_219, %c0_220] : memref<32x32xf32, #tpu.memory_space<vmem>>, vector<4x32xf32>
    tpu.vector_store %arg17[%c24_219, %c0_220], %933 {strides = array<i32>} : memref<32x32xf32, #tpu.memory_space<vmem>>, vector<4x32xf32>,
    %935 = vector.extract_strided_slice %729 {offsets = [28, 0], sizes = [4, 128], strides = [1, 1]} : vector<32x128xf32> to vector<4x128xf32>
    %cst_221 = arith.constant dense<0.000000e+00> : vector<4x128xf32>
    %936 = tpu.matmul %933, %725, %cst_221 {dimension_numbers = #tpu.dot_dimension_numbers<[1], [0], [0], [1], [0, 0, 1, 1], [], []>} : vector<4x32xf32>, vector<32x128xf32>, vector<4x128xf32> -> vector<4x128xf32>
    %937 = arith.addf %935, %936 : vector<4x128xf32>
    %938 = vector.extract_strided_slice %937 {offsets = [0, 0], sizes = [4, 32], strides = [1, 1]} : vector<4x128xf32> to vector<4x32xf32>
    %939 = arith.negf %938 : vector<4x32xf32>
    %940 = math.exp %939 : vector<4x32xf32>
    %cst_222 = arith.constant 1.000000e+00 : f32
    %941 = vector.broadcast %cst_222 : f32 to vector<4x32xf32>
    %942 = arith.addf %941, %940 : vector<4x32xf32>
    %943 = arith.divf %941, %942 : vector<4x32xf32>
    %944 = vector.extract_strided_slice %937 {offsets = [0, 32], sizes = [4, 32], strides = [1, 1]} : vector<4x128xf32> to vector<4x32xf32>
    %945 = arith.negf %944 : vector<4x32xf32>
    %946 = math.exp %945 : vector<4x32xf32>
    %cst_223 = arith.constant 1.000000e+00 : f32
    %947 = vector.broadcast %cst_223 : f32 to vector<4x32xf32>
    %948 = arith.addf %947, %946 : vector<4x32xf32>
    %949 = arith.divf %947, %948 : vector<4x32xf32>
    %950 = vector.extract_strided_slice %937 {offsets = [0, 64], sizes = [4, 32], strides = [1, 1]} : vector<4x128xf32> to vector<4x32xf32>
    %951 = math.tanh %950 : vector<4x32xf32>
    %952 = vector.extract_strided_slice %937 {offsets = [0, 96], sizes = [4, 32], strides = [1, 1]} : vector<4x128xf32> to vector<4x32xf32>
    %953 = arith.negf %952 : vector<4x32xf32>
    %954 = math.exp %953 : vector<4x32xf32>
    %cst_224 = arith.constant 1.000000e+00 : f32
    %955 = vector.broadcast %cst_224 : f32 to vector<4x32xf32>
    %956 = arith.addf %955, %954 : vector<4x32xf32>
    %957 = arith.divf %955, %956 : vector<4x32xf32>
    %958 = arith.mulf %949, %931 : vector<4x32xf32>
    %959 = arith.mulf %943, %951 : vector<4x32xf32>
    %960 = arith.addf %958, %959 : vector<4x32xf32>
    %961 = math.tanh %960 : vector<4x32xf32>
    %962 = arith.mulf %957, %961 : vector<4x32xf32>
    %c28_225 = arith.constant 28 : index
    %c0_226 = arith.constant 0 : index
    %963 = vector.load %arg17[%c28_225, %c0_226] : memref<32x32xf32, #tpu.memory_space<vmem>>, vector<4x32xf32>
    tpu.vector_store %arg17[%c28_225, %c0_226], %962 {strides = array<i32>} : memref<32x32xf32, #tpu.memory_space<vmem>>, vector<4x32xf32>,
    %c0_227 = arith.constant 0 : index
    %c0_228 = arith.constant 0 : index
    %964 = vector.load %arg17[%c0_227, %c0_228] : memref<32x32xf32, #tpu.memory_space<vmem>>, vector<32x32xf32>
    %c0_229 = arith.constant 0 : index
    %c0_230 = arith.constant 0 : index
    %965 = vector.load %arg13[%c0_229, %c0_230] : memref<32x1xf32, #tpu.memory_space<vmem>>, vector<32x1xf32>
    %cst_231 = arith.constant dense<0.000000e+00> : vector<32x1xf32>
    %966 = tpu.matmul %964, %965, %cst_231 {dimension_numbers = #tpu.dot_dimension_numbers<[1], [0], [0], [1], [0, 0, 1, 1], [], []>} : vector<32x32xf32>, vector<32x1xf32>, vector<32x1xf32> -> vector<32x1xf32>
    %c0_232 = arith.constant 0 : index
    %c0_233 = arith.constant 0 : index
    %967 = vector.load %arg14[%c0_232, %c0_233] : memref<1x1xf32, #tpu.memory_space<vmem>>, vector<1x1xf32>
    %968 = vector.broadcast %967 : vector<1x1xf32> to vector<32x1xf32>
    %969 = arith.addf %966, %968 : vector<32x1xf32>
    %c0_234 = arith.constant 0 : index
    %c0_235 = arith.constant 0 : index
    %970 = vector.load %arg15[%c0_234, %c0_235] : memref<32x1xf32, #tpu.memory_space<vmem>>, vector<32x1xf32>
    tpu.vector_store %arg15[%c0_234, %c0_235], %969 {strides = array<i32>} : memref<32x1xf32, #tpu.memory_space<vmem>>, vector<32x1xf32>,
    return
  }
}

</mosaic_0001>

<bundles_post_ra>
// kernel: tpu_custom_call.1
= control target key start
LH: loop header
LB: loop body
LE: loop exit
PB: predicated region body
PF: predicated region fallthrough
CT: control target
= control target key end

     0   :  { %s6115_s0 = inlined_call_operand.vmem [shape: f32[32,8], index: 0, kind: input, shape index: {}]   ;;  %s6116_s1 = inlined_call_operand.vmem [shape: f32[8,128], index: 1, kind: input, shape index: {}]   ;;  %s6117_s2 = inlined_call_operand.vmem [shape: f32[32,128], index: 2, kind: input, shape index: {}]   ;;  %s6118_s3 = inlined_call_operand.vmem [shape: f32[1,128], index: 3, kind: input, shape index: {}]   ;;  %s6119_s4 = inlined_call_operand.vmem [shape: f32[32,128], index: 4, kind: input, shape index: {}]   ;;  %s6120_s5 = inlined_call_operand.hbm [shape: f32[32,128], index: 5, kind: input, shape index: {}]   ;;  %s6121_s6 = inlined_call_operand.vmem [shape: f32[1,128], index: 6, kind: input, shape index: {}]   ;;  %s6122_s7 = inlined_call_operand.hbm [shape: f32[32,128], index: 7, kind: input, shape index: {}]   ;;  %s6123_s8 = inlined_call_operand.hbm [shape: f32[32,128], index: 8, kind: input, shape index: {}]   ;;  %s6124_s9 = inlined_call_operand.vmem [shape: f32[1,128], index: 9, kind: input, shape index: {}]   ;;  %s6125_s10 = inlined_call_operand.hbm [shape: f32[32,128], index: 10, kind: input, shape index: {}]   ;;  %s6126_s11 = inlined_call_operand.hbm [shape: f32[32,128], index: 11, kind: input, shape index: {}]   ;;  %s6127_s12 = inlined_call_operand.vmem [shape: f32[1,128], index: 12, kind: input, shape index: {}]   ;;  %s6128_s13 = inlined_call_operand.vmem [shape: f32[32,1], index: 13, kind: input, shape index: {}]   ;;  %s6129_s14 = inlined_call_operand.<no memory space> [shape: f32[1,1], index: 14, kind: input, shape index: {}]   ;;  %s6130_s15 = inlined_call_operand.vmem [shape: f32[32,1], index: 15, kind: output, shape index: {}]  }
   0x1   :  { %v20_v0 = vstv %s6129_s14 }
   0x2   :  { %21 = vst [vmem:[#allocation4] sm:$0x1] %v20_v0 }
   0x3   :  { %22 = vsyncpa [#allocation6], 0 }
   0x4   :  { %23 = vsyncpa [#allocation8], 0 }
   0x5   :  { %24 = vsyncpa [#allocation11], 0  ;;  %s5207_s20 = smov [#allocation7]   ;;  %s5208_s22 = smov [#allocation10]  }
   0x6   :  { %s54_s21 = sshll.u32 %s5207_s20, 4  ;;  %s80_s23 = sshll.u32 %s5208_s22, 4  ;;  %s55_s21 = int_to_ptr.vmem [resolvable:$true] %s54_s21  ;;  %s81_s23 = int_to_ptr.vmem [resolvable:$true] %s80_s23 }
   0x7   :  { %s5109_s24 = scalar_lea.vmem %s55_s21, 512  ;;  %p5114_p1 = scmp.lt.s32.totalorder %s55_s21, %s55_s21 }
   0x8   :  { %p5110_p0 = scmp.ne.s32.totalorder %s55_s21, %s5109_s24  ;;  %p5115_p2 = scmp.lt.s32.totalorder %s5109_s24, %s5109_s24 }
   0xa   :  { %p5116_p3 = por %p5115_p2, %p5114_p1 }
   0xc   :  { %p5117_p4 = pnand %p5116_p3, %p5110_p0 }
   0xe   :  { %5120 = shalt.err (!%p5117_p4)
}
   0xf   :  { %s5209_s25 = smov 128   ;;  %s5210_s26 = smov 8  }
  0x10   :  { %60 = dma.hbm_to_vmem [thread:$0]  %s6122_s7, 512, %s55_s21, [#allocation8], %s5209_s25, %s5209_s25, %s5210_s26  }
  0x11   :  { %s5129_s28 = scalar_lea.vmem %s81_s23, 512  ;;  %p5134_p6 = scmp.lt.s32.totalorder %s81_s23, %s81_s23 }
  0x12   :  { %p5130_p5 = scmp.ne.s32.totalorder %s81_s23, %s5129_s28  ;;  %p5135_p7 = scmp.lt.s32.totalorder %s5129_s28, %s5129_s28 }
  0x14   :  { %p5136_p8 = por %p5135_p7, %p5134_p6 }
  0x16   :  { %p5137_p9 = pnand %p5136_p8, %p5130_p5 }
  0x18   :  { %5140 = shalt.err (!%p5137_p9)
}
  0x19   :  { %86 = dma.hbm_to_vmem [thread:$0]  %s6125_s10, 512, %s81_s23, [#allocation11], %s5209_s25, %s5209_s25, %s5210_s26  }
  0x1a   :  { %s5211_s16 = smov [#allocation5]   ;;  %s5212_s18 = smov [#allocation9]  }
  0x1b   :  { %s40_s17 = sshll.u32 %s5211_s16, 4  ;;  %s66_s19 = sshll.u32 %s5212_s18, 4  ;;  %s41_s17 = int_to_ptr.vmem [resolvable:$true] %s40_s17  ;;  %s67_s19 = int_to_ptr.vmem [resolvable:$true] %s66_s19 }
  0x1c   :  { %s5149_s7 = scalar_lea.vmem %s41_s17, 512  ;;  %p5154_p11 = scmp.lt.s32.totalorder %s41_s17, %s41_s17 }
  0x1d   :  { %p5150_p10 = scmp.ne.s32.totalorder %s41_s17, %s5149_s7  ;;  %p5155_p12 = scmp.lt.s32.totalorder %s5149_s7, %s5149_s7 }
  0x1f   :  { %p5156_p13 = por %p5155_p12, %p5154_p11 }
  0x21   :  { %p5157_p0 = pnand %p5156_p13, %p5150_p10 }
  0x23   :  { %5160 = shalt.err (!%p5157_p0)
}
  0x24   :  { %46 = dma.hbm_to_vmem [thread:$0]  %s6120_s5, 512, %s41_s17, [#allocation6], %s5209_s25, %s5209_s25, %s5210_s26  }
  0x25   :  { %s5169_s10 = scalar_lea.vmem %s67_s19, 512  ;;  %p5174_p2 = scmp.lt.s32.totalorder %s67_s19, %s67_s19 }
  0x26   :  { %p5170_p1 = scmp.ne.s32.totalorder %s67_s19, %s5169_s10  ;;  %p5175_p3 = scmp.lt.s32.totalorder %s5169_s10, %s5169_s10 }
  0x28   :  { %p5176_p4 = por %p5175_p3, %p5174_p2 }
  0x2a   :  { %p5177_p5 = pnand %p5176_p4, %p5170_p1 }
  0x2c   :  { %5180 = shalt.err (!%p5177_p5)
}
  0x2d   :  { %72 = dma.hbm_to_vmem [thread:$0]  %s6123_s8, 512, %s67_s19, [#allocation8], %s5209_s25, %s5209_s25, %s5210_s26  }
  0x2e   :  { %s5213_s24 = smov [#allocation12]  }
  0x2f   :  { %s92_s14 = sshll.u32 %s5213_s24, 4  ;;  %s93_s14 = int_to_ptr.vmem [resolvable:$true] %s92_s14 }
  0x30   :  { %s5189_s27 = scalar_lea.vmem %s93_s14, 512  ;;  %p5194_p7 = scmp.lt.s32.totalorder %s93_s14, %s93_s14 }
  0x31   :  { %p5190_p6 = scmp.ne.s32.totalorder %s93_s14, %s5189_s27  ;;  %p5195_p8 = scmp.lt.s32.totalorder %s5189_s27, %s5189_s27 }
  0x33   :  { %p5196_p9 = por %p5195_p8, %p5194_p7 }
  0x35   :  { %p5197_p10 = pnand %p5196_p9, %p5190_p6 }
  0x37   :  { %5200 = shalt.err (!%p5197_p10)
}
  0x38   :  { %98 = dma.hbm_to_vmem [thread:$0]  %s6126_s11, 512, %s93_s14, [#allocation11], %s5209_s25, %s5209_s25, %s5210_s26  }
  0x39   :  { %5201 = dma.done.wait [#allocation6], 512  }
  0x3a   :  { %5202 = vsyncadd [#allocation6], 4294966784 }
  0x3b   :  { %5203 = dma.done.wait [#allocation8], 1024  }
  0x3c   :  { %5204 = vsyncadd [#allocation8], 4294966272 }
  0x3d   :  { %5205 = dma.done.wait [#allocation11], 1024  }
  0x3e   :  { %5206 = vsyncadd [#allocation11], 4294966272  ;;  %v5214_v1 = vmov 0.0   ;;  %vm5215_vm0 = vmmov 0   ;;  %vm136_vm1 = vcmask 64512   ;;  %v124_v2 = vld [vmem:[%s6116_s1] sm:$0xff] }
  0x3f   :  { %4437 = vmatprep.subr.mxu0 %v5214_v1  ;;  %4445 = vmatprep.mubr.msk.f32.mxu0 %vm5215_vm0, %v5214_v1  ;;  %v120_v3 = vld [vmem:[%s6115_s0] sm:$0xff]  ;;  %v121_v4 = vld [vmem:[%s6115_s0 + $0x8] sm:$0xff]  ;;  %v5347_v5 = vld [vmem:[%s6117_s2 + $0x18] sm:$0xff]  ;;  %s5216_s14 = smov 64   ;;  %vm337_vm2 = vcmask 257024   ;;  %vm234_vm3 = vcmask 261120  }
  0x40   :  { %4418 = vmatprep.subr.mxu1 %v124_v2  ;;  %4420 = vmatprep.mubr.msk.f32.mxu1 %vm136_vm1, %v120_v3  ;;  %v122_v6 = vld [vmem:[%s6115_s0 + $0x10] sm:$0xff]  ;;  %v123_v8 = vld [vmem:[%s6115_s0 + $0x18] sm:$0xff]  ;;  %v5369_v9 = vld [vmem:[%s6117_s2 + $0x8] sm:$0xff]  ;;  %vm446_vm4 = vcmask 261124   ;;  %vm4124_vm5 = vcmask 7168  }
  0x41   :  { %4419 = vmatpush3.msra.mxu1 %v124_v2  ;;  %4438 = vmatpush3.msra.mxu0 %v5347_v5  ;;  %v5358_v7 = vld [vmem:[%s6117_s2 + $0x10] sm:$0xff]  ;;  %v5379_v10 = vld [vmem:[%s6117_s2] sm:$0xff] }
  0x42   :  { %4421 = vmatmul.mubr.msk.f32.vlgmr.msra.gmra.mxu1 %vm136_vm1, %v121_v4  ;;  %4426 = vmatprep.subr.mxu1 %v5214_v1  ;;  %v4136_v11 = vld [vmem:[%s6118_s3] ss:$0 sm:$0xff]  ;;  %s5217_s3 = smov 32  }
  0x43   :  { %4427 = vmatpush3.msra.mxu1 %v5347_v5  ;;  %4423 = vmatprep.mubr.msk.f32.mxu1 %vm136_vm1, %v122_v6 }
  0x44   :  { %4428 = vmatprep.subr.mxu1 %v5214_v1  ;;  %4439 = vmatprep.subr.mxu0 %v5214_v1 }
  0x45   :  { %4429 = vmatpush3.msra.mxu1 %v5358_v7  ;;  %4440 = vmatpush3.msra.mxu0 %v5358_v7 }
  0x46   :  { %4424 = vmatmul.mubr.msk.f32.gmra.mxu1 %vm136_vm1, %v123_v8  ;;  %4430 = vmatprep.subr.mxu1 %v5214_v1 }
  0x47   :  { %4431 = vmatpush3.msra.mxu1 %v5369_v9  ;;  %4434 = vmatprep.mubr.msk.f32.mxu1 %vm5215_vm0, %v5214_v1 }
  0x48   :  { %4432 = vmatprep.subr.mxu1 %v5214_v1  ;;  %4441 = vmatprep.subr.mxu0 %v5214_v1 }
  0x49   :  { %4433 = vmatpush3.msra.mxu1 %v5379_v10  ;;  %4442 = vmatpush3.msra.mxu0 %v5369_v9 }
  0x4a   :  { %4435 = vmatmul.mubr.f32.vlgmr.msra.gmra.mxu1 %v5214_v1  ;;  %4443 = vmatprep.subr.mxu0 %v5214_v1 }
  0x4b   :  { %4444 = vmatpush3.msra.mxu0 %v5379_v10  ;;  %4448 = vmatprep.subr.mxu1 %v5214_v1 }
  0x4c   :  { %4449 = vmatpush3.msra.mxu1 %v5347_v5  ;;  %4456 = vmatprep.mubr.msk.f32.mxu1 %vm5215_vm0, %v5214_v1 }
  0x4d   :  { %4450 = vmatprep.subr.mxu1 %v5214_v1  ;;  %4459 = vmatprep.subr.mxu0 %v5214_v1 }
  0x4e   :  { %4451 = vmatpush3.msra.mxu1 %v5358_v7 }
  0x4f   :  { %4452 = vmatprep.subr.mxu1 %v5214_v1 }
  0x50   :  { %4453 = vmatpush3.msra.mxu1 %v5369_v9 }
  0x51   :  { %4454 = vmatprep.subr.mxu1 %v5214_v1 }
  0x52   :  { %4455 = vmatpush3.msra.mxu1 %v5379_v10 }
  0x53   :  { %4470 = vmatprep.subr.mxu1 %v5214_v1 }
 0x102   :  { %v4422_v12 = vpop.f32.mrf.mxu1 }
 0x103   :  { %v5406_v13 = vadd.f32 %v4422_v12, %v4136_v11 }
 0x104   :  { %v215_v14 = vpop.f32.mrf.mxu1 }
 0x105   :  { %v216_v18 = vadd.f32 %v4136_v11, %v215_v14 }
 0x106   :  { %v4425_v15 = vpop.f32.mrf.mxu1 }
 0x107   :  { %v5408_v16 = vadd.f32 %v4425_v15, %v4136_v11 }
 0x108   :  { %v225_v17 = vpop.f32.mrf.mxu1 }
 0x109   :  { %v5410_v19 = vadd.f32 %v4136_v11, %v225_v17 }
 0x10a   :  { %v304_v20 = vpop.f32.mrf.mxu1 }
 0x10b   :  { %v308_v21 = vadd.f32 %v304_v20, %v216_v18 }
 0x10c   :  { %v4436_v22 = vpop.f32.mrf.mxu1 }
 0x10d   :  { %4845 = vtanh.f32 %v308_v21  ;;  %v4141_v24 = vmul.f32 -1.442695, %v308_v21 }
 0x10f   :  { %4847 = vpow2.f32 %v4141_v24 }
 0x11a   :  { %v4846_v23 = vpop.eup %4845 }
 0x11b   :  { %318 = vrot.lane.b32.xlu0 %v4846_v23, %s5216_s14 }
 0x11c   :  { %v4848_v25 = vpop.eup %4847 }
 0x11d   :  { %v312_v26 = vadd.f32 1.0, %v4848_v25 }
 0x11f   :  { %4849 = vrcp.f32 %v312_v26 }
 0x12c   :  { %v4850_v27 = vpop.eup %4849 }
 0x12d   :  { %v316_v30 = vmul.f32 0.0, %v4850_v27 }
 0x18d   :  { %v319_v28 = vpop.permute.xlu0 %318 }
 0x18e   :  { %v321_v29 = vmul.f32 %v4850_v27, %v319_v28 }
 0x190   :  { %323 = vrot.lane.b32.xlu0 %v321_v29, %s5217_s3 }
 0x202   :  { %v324_v31 = vpop.permute.xlu0 %323 }
 0x203   :  { %v326_v32 = vadd.f32 %v324_v31, %v316_v30 }
 0x205   :  { %4851 = vtanh.f32 %v326_v32  ;;  %v423_v48 = vrot.slane %v326_v32, 4 }
 0x212   :  { %v4852_v33 = vpop.eup %4851 }
 0x213   :  { %329 = vrot.lane.b32.xlu1 %v4852_v33, %s5216_s14 }
 0x285   :  { %v330_v34 = vpop.permute.xlu1 %329 }
 0x286   :  { %v332_v35 = vmul.f32 %v4850_v27, %v330_v34 }
 0x288   :  { %334 = vrot.lane.b32.xlu1 %v332_v35, %s5217_s3 }
 0x2fa   :  { %v335_v36 = vpop.permute.xlu1 %334 }
 0x2fb   :  { %338 = vst.msk [vmem:[#allocation2] sm:$0xf] %vm337_vm2, %v335_v36  ;;  %4446 = vmatmul.mubr.msk.f32.vlgmr.msra.gmra.mxu0 %vm234_vm3, %v335_v36 }
 0x2fc   :  { %4460 = vmatpush3.msra.mxu0 %v5347_v5  ;;  %4467 = vmatprep.mubr.msk.f32.mxu0 %vm5215_vm0, %v5214_v1 }
 0x2fd   :  { %4461 = vmatprep.subr.mxu0 %v5214_v1 }
 0x2fe   :  { %4462 = vmatpush3.msra.mxu0 %v5358_v7 }
 0x2ff   :  { %4463 = vmatprep.subr.mxu0 %v5214_v1 }
 0x300   :  { %4464 = vmatpush3.msra.mxu0 %v5369_v9 }
 0x301   :  { %4465 = vmatprep.subr.mxu0 %v5214_v1 }
 0x302   :  { %4466 = vmatpush3.msra.mxu0 %v5379_v10 }
 0x303   :  { %4481 = vmatprep.subr.mxu0 %v5214_v1 }
 0x3bb   :  { %v407_v37 = vpop.f32.mrf.mxu0 }
 0x3bc   :  { %v412_v38 = vrot.slane %v407_v37, 4 }
 0x3bd   :  { %v4447_v39 = vpop.f32.mrf.mxu0 }
 0x3be   :  { %v414_v40 = vadd.f32 %v412_v38, %v216_v18 }
 0x3c0   :  { %4853 = vtanh.f32 %v414_v40  ;;  %v4143_v42 = vmul.f32 -1.442695, %v414_v40 }
 0x3c2   :  { %4855 = vpow2.f32 %v4143_v42 }
 0x3cd   :  { %v4854_v41 = vpop.eup %4853 }
 0x3ce   :  { %427 = vrot.lane.b32.xlu0 %v4854_v41, %s5216_s14 }
 0x3cf   :  { %v4856_v43 = vpop.eup %4855 }
 0x3d0   :  { %v418_v44 = vadd.f32 1.0, %v4856_v43 }
 0x3d2   :  { %4857 = vrcp.f32 %v418_v44 }
 0x3df   :  { %v4858_v45 = vpop.eup %4857 }
 0x3e0   :  { %v425_v49 = vmul.f32 %v4858_v45, %v423_v48 }
 0x440   :  { %v428_v46 = vpop.permute.xlu0 %427 }
 0x441   :  { %v430_v47 = vmul.f32 %v4858_v45, %v428_v46 }
 0x443   :  { %432 = vrot.lane.b32.xlu1 %v430_v47, %s5217_s3 }
 0x4b5   :  { %v433_v50 = vpop.permute.xlu1 %432 }
 0x4b6   :  { %v435_v51 = vadd.f32 %v433_v50, %v425_v49 }
 0x4b8   :  { %4859 = vtanh.f32 %v435_v51  ;;  %v532_v4 = vrot.slane %v435_v51, 4 }
 0x4c5   :  { %v4860_v52 = vpop.eup %4859 }
 0x4c6   :  { %438 = vrot.lane.b32.xlu0 %v4860_v52, %s5216_s14 }
 0x538   :  { %v439_v53 = vpop.permute.xlu0 %438 }
 0x539   :  { %v5431_v54 = vmul.f32 %v4858_v45, %v439_v53 }
 0x53b   :  { %v448_v55 = vrot.slane %v5431_v54, 4 }
 0x53d   :  { %449 = vrot.lane.b32.xlu1 %v448_v55, %s5217_s3 }
 0x5af   :  { %v450_v56 = vpop.permute.xlu1 %449 }
 0x5b0   :  { %4457 = vmatmul.mubr.msk.f32.vlgmr.msra.gmra.mxu1 %vm234_vm3, %v450_v56 }
 0x5b1   :  { %4471 = vmatpush3.msra.mxu1 %v5347_v5  ;;  %4478 = vmatprep.mubr.msk.f32.mxu1 %vm5215_vm0, %v5214_v1 }
 0x5b2   :  { %4472 = vmatprep.subr.mxu1 %v5214_v1 }
 0x5b3   :  { %4473 = vmatpush3.msra.mxu1 %v5358_v7 }
 0x5b4   :  { %4474 = vmatprep.subr.mxu1 %v5214_v1 }
 0x5b5   :  { %4475 = vmatpush3.msra.mxu1 %v5369_v9 }
 0x5b6   :  { %4476 = vmatprep.subr.mxu1 %v5214_v1 }
 0x5b7   :  { %4477 = vmatpush3.msra.mxu1 %v5379_v10 }
 0x5b8   :  { %4492 = vmatprep.subr.mxu1 %v5214_v1 }
 0x670   :  { %v519_v57 = vpop.f32.mrf.mxu1 }
 0x671   :  { %v523_v58 = vadd.f32 %v519_v57, %v5406_v13 }
 0x672   :  { %v4458_v59 = vpop.f32.mrf.mxu1 }
 0x673   :  { %4861 = vtanh.f32 %v523_v58  ;;  %v4145_v61 = vmul.f32 -1.442695, %v523_v58 }
 0x675   :  { %4863 = vpow2.f32 %v4145_v61 }
 0x680   :  { %v4862_v60 = vpop.eup %4861 }
 0x681   :  { %536 = vrot.lane.b32.xlu0 %v4862_v60, %s5216_s14 }
 0x682   :  { %v4864_v62 = vpop.eup %4863 }
 0x683   :  { %v527_v63 = vadd.f32 1.0, %v4864_v62 }
 0x685   :  { %4865 = vrcp.f32 %v527_v63 }
 0x692   :  { %v4866_v0 = vpop.eup %4865 }
 0x693   :  { %v534_v6 = vmul.f32 %v4866_v0, %v532_v4 }
 0x6f3   :  { %v537_v2 = vpop.permute.xlu0 %536 }
 0x6f4   :  { %v539_v3 = vmul.f32 %v4866_v0, %v537_v2 }
 0x6f6   :  { %541 = vrot.lane.b32.xlu1 %v539_v3, %s5217_s3 }
 0x768   :  { %v542_v8 = vpop.permute.xlu1 %541 }
 0x769   :  { %v544_v11 = vadd.f32 %v542_v8, %v534_v6 }
 0x76b   :  { %4867 = vtanh.f32 %v544_v11  ;;  %v640_v30 = vrot.slane %v544_v11, 4 }
 0x778   :  { %v4868_v12 = vpop.eup %4867 }
 0x779   :  { %547 = vrot.lane.b32.xlu0 %v4868_v12, %s5216_s14 }
 0x7eb   :  { %v548_v14 = vpop.permute.xlu0 %547 }
 0x7ec   :  { %v550_v15 = vmul.f32 %v4866_v0, %v548_v14 }
 0x7ee   :  { %552 = vrot.lane.b32.xlu1 %v550_v15, %s5217_s3 }
 0x860   :  { %v553_v17 = vpop.permute.xlu1 %552 }
 0x861   :  { %555 = vst.msk [vmem:[#allocation2 + $0x8] sm:$0xf] %vm337_vm2, %v553_v17  ;;  %4468 = vmatmul.mubr.msk.f32.vlgmr.msra.gmra.mxu0 %vm234_vm3, %v553_v17 }
 0x862   :  { %4482 = vmatpush3.msra.mxu0 %v5347_v5  ;;  %4489 = vmatprep.mubr.msk.f32.mxu0 %vm5215_vm0, %v5214_v1 }
 0x863   :  { %4483 = vmatprep.subr.mxu0 %v5214_v1 }
 0x864   :  { %4484 = vmatpush3.msra.mxu0 %v5358_v7 }
 0x865   :  { %4485 = vmatprep.subr.mxu0 %v5214_v1 }
 0x866   :  { %4486 = vmatpush3.msra.mxu0 %v5369_v9 }
 0x867   :  { %4487 = vmatprep.subr.mxu0 %v5214_v1 }
 0x868   :  { %4488 = vmatpush3.msra.mxu0 %v5379_v10 }
 0x869   :  { %4503 = vmatprep.subr.mxu0 %v5214_v1 }
 0x921   :  { %v624_v18 = vpop.f32.mrf.mxu0 }
 0x922   :  { %v629_v20 = vrot.slane %v624_v18, 4 }
 0x923   :  { %v4469_v21 = vpop.f32.mrf.mxu0 }
 0x924   :  { %v631_v22 = vadd.f32 %v629_v20, %v5406_v13 }
 0x926   :  { %4869 = vtanh.f32 %v631_v22  ;;  %v4147_v24 = vmul.f32 -1.442695, %v631_v22 }
 0x928   :  { %4871 = vpow2.f32 %v4147_v24 }
 0x933   :  { %v4870_v23 = vpop.eup %4869 }
 0x934   :  { %644 = vrot.lane.b32.xlu0 %v4870_v23, %s5216_s14 }
 0x935   :  { %v4872_v25 = vpop.eup %4871 }
 0x936   :  { %v635_v26 = vadd.f32 1.0, %v4872_v25 }
 0x938   :  { %4873 = vrcp.f32 %v635_v26 }
 0x945   :  { %v4874_v27 = vpop.eup %4873 }
 0x946   :  { %v642_v31 = vmul.f32 %v4874_v27, %v640_v30 }
 0x9a6   :  { %v645_v28 = vpop.permute.xlu0 %644 }
 0x9a7   :  { %v647_v29 = vmul.f32 %v4874_v27, %v645_v28 }
 0x9a9   :  { %649 = vrot.lane.b32.xlu1 %v647_v29, %s5217_s3 }
 0xa1b   :  { %v650_v32 = vpop.permute.xlu1 %649 }
 0xa1c   :  { %v652_v33 = vadd.f32 %v650_v32, %v642_v31  ;;  %v1103_v31 = vld [vmem:[%s6119_s4 + $0x18] sm:$0xff]  ;;  %v1102_v32 = vld [vmem:[%s6119_s4 + $0x10] sm:$0xff] }
 0xa1e   :  { %4875 = vtanh.f32 %v652_v33  ;;  %v748_v48 = vrot.slane %v652_v33, 4  ;;  %v1101_v33 = vld [vmem:[%s6119_s4 + $0x8] sm:$0xff] }
 0xa2b   :  { %v4876_v13 = vpop.eup %4875 }
 0xa2c   :  { %655 = vrot.lane.b32.xlu0 %v4876_v13, %s5216_s14 }
 0xa9e   :  { %v656_v34 = vpop.permute.xlu0 %655 }
 0xa9f   :  { %v5467_v35 = vmul.f32 %v4874_v27, %v656_v34 }
 0xaa1   :  { %v664_v36 = vrot.slane %v5467_v35, 4 }
 0xaa3   :  { %665 = vrot.lane.b32.xlu1 %v664_v36, %s5217_s3 }
 0xb15   :  { %v666_v37 = vpop.permute.xlu1 %665 }
 0xb16   :  { %4479 = vmatmul.mubr.msk.f32.vlgmr.msra.gmra.mxu1 %vm234_vm3, %v666_v37 }
 0xb17   :  { %4493 = vmatpush3.msra.mxu1 %v5347_v5  ;;  %4500 = vmatprep.mubr.msk.f32.mxu1 %vm5215_vm0, %v5214_v1 }
 0xb18   :  { %4494 = vmatprep.subr.mxu1 %v5214_v1 }
 0xb19   :  { %4495 = vmatpush3.msra.mxu1 %v5358_v7 }
 0xb1a   :  { %4496 = vmatprep.subr.mxu1 %v5214_v1 }
 0xb1b   :  { %4497 = vmatpush3.msra.mxu1 %v5369_v9 }
 0xb1c   :  { %4498 = vmatprep.subr.mxu1 %v5214_v1 }
 0xb1d   :  { %4499 = vmatpush3.msra.mxu1 %v5379_v10 }
 0xb1e   :  { %4514 = vmatprep.subr.mxu1 %v1103_v31 }
 0xbd6   :  { %v735_v38 = vpop.f32.mrf.mxu1 }
 0xbd7   :  { %v739_v39 = vadd.f32 %v735_v38, %v5410_v19  ;;  %v5534_v38 = vld [vmem:[#allocation5 + $0x18] sm:$0xff] }
 0xbd8   :  { %v4480_v40 = vpop.f32.mrf.mxu1 }
 0xbd9   :  { %4877 = vtanh.f32 %v739_v39  ;;  %v4149_v42 = vmul.f32 -1.442695, %v739_v39  ;;  %v5538_v40 = vld [vmem:[#allocation5 + $0x10] sm:$0xff] }
 0xbdb   :  { %4879 = vpow2.f32 %v4149_v42  ;;  %v5549_v42 = vld [vmem:[#allocation5] sm:$0xff] }
 0xbe6   :  { %v4878_v41 = vpop.eup %4877 }
 0xbe7   :  { %752 = vrot.lane.b32.xlu0 %v4878_v41, %s5216_s14 }
 0xbe8   :  { %v4880_v43 = vpop.eup %4879 }
 0xbe9   :  { %v743_v44 = vadd.f32 1.0, %v4880_v43 }
 0xbeb   :  { %4881 = vrcp.f32 %v743_v44 }
 0xbf8   :  { %v4882_v45 = vpop.eup %4881 }
 0xbf9   :  { %v750_v49 = vmul.f32 %v4882_v45, %v748_v48 }
 0xc59   :  { %v753_v46 = vpop.permute.xlu0 %752 }
 0xc5a   :  { %v755_v47 = vmul.f32 %v4882_v45, %v753_v46 }
 0xc5c   :  { %757 = vrot.lane.b32.xlu1 %v755_v47, %s5217_s3 }
 0xcce   :  { %v758_v50 = vpop.permute.xlu1 %757 }
 0xccf   :  { %v760_v51 = vadd.f32 %v758_v50, %v750_v49 }
 0xcd1   :  { %4883 = vtanh.f32 %v760_v51 }
 0xcde   :  { %v4884_v52 = vpop.eup %4883 }
 0xcdf   :  { %763 = vrot.lane.b32.xlu0 %v4884_v52, %s5216_s14 }
 0xd51   :  { %v764_v53 = vpop.permute.xlu0 %763 }
 0xd52   :  { %v766_v55 = vmul.f32 %v4882_v45, %v764_v53 }
 0xd54   :  { %768 = vrot.lane.b32.xlu1 %v766_v55, %s5217_s3 }
 0xdc6   :  { %v769_v56 = vpop.permute.xlu1 %768 }
 0xdc7   :  { %771 = vst.msk [vmem:[#allocation2 + $0x10] sm:$0xf] %vm337_vm2, %v769_v56  ;;  %4490 = vmatmul.mubr.msk.f32.vlgmr.msra.gmra.mxu0 %vm234_vm3, %v769_v56 }
 0xdc8   :  { %4504 = vmatpush3.msra.mxu0 %v5347_v5  ;;  %4511 = vmatprep.mubr.msk.f32.mxu0 %vm5215_vm0, %v5214_v1 }
 0xdc9   :  { %4505 = vmatprep.subr.mxu0 %v5214_v1 }
 0xdca   :  { %4506 = vmatpush3.msra.mxu0 %v5358_v7 }
 0xdcb   :  { %4507 = vmatprep.subr.mxu0 %v5214_v1 }
 0xdcc   :  { %4508 = vmatpush3.msra.mxu0 %v5369_v9 }
 0xdcd   :  { %4509 = vmatprep.subr.mxu0 %v5214_v1 }
 0xdce   :  { %4510 = vmatpush3.msra.mxu0 %v5379_v10  ;;  %v856_v10 = vrot.slane %v760_v51, 4  ;;  %v5581_v51 = vld [vmem:[%s6121_s6] ss:$0 sm:$0xff] }
 0xdcf   :  { %4528 = vmatprep.subr.mxu0 %v5214_v1 }
 0xe87   :  { %v840_v57 = vpop.f32.mrf.mxu0 }
 0xe88   :  { %v845_v58 = vrot.slane %v840_v57, 4 }
 0xe89   :  { %v4491_v5 = vpop.f32.mrf.mxu0 }
 0xe8a   :  { %v847_v59 = vadd.f32 %v845_v58, %v5410_v19 }
 0xe8c   :  { %4885 = vtanh.f32 %v847_v59  ;;  %v4151_v7 = vmul.f32 -1.442695, %v847_v59 }
 0xe8e   :  { %4887 = vpow2.f32 %v4151_v7 }
 0xe99   :  { %v4886_v60 = vpop.eup %4885 }
 0xe9a   :  { %860 = vrot.lane.b32.xlu0 %v4886_v60, %s5216_s14 }
 0xe9b   :  { %v4888_v61 = vpop.eup %4887 }
 0xe9c   :  { %v851_v62 = vadd.f32 1.0, %v4888_v61 }
 0xe9e   :  { %4889 = vrcp.f32 %v851_v62 }
 0xeab   :  { %v4890_v9 = vpop.eup %4889 }
 0xeac   :  { %v858_v2 = vmul.f32 %v4890_v9, %v856_v10 }
 0xf0c   :  { %v861_v63 = vpop.permute.xlu0 %860 }
 0xf0d   :  { %v863_v0 = vmul.f32 %v4890_v9, %v861_v63 }
 0xf0f   :  { %865 = vrot.lane.b32.xlu1 %v863_v0, %s5217_s3 }
 0xf81   :  { %v866_v3 = vpop.permute.xlu1 %865 }
 0xf82   :  { %v868_v4 = vadd.f32 %v866_v3, %v858_v2 }
 0xf84   :  { %4891 = vtanh.f32 %v868_v4  ;;  %v964_v26 = vrot.slane %v868_v4, 4 }
 0xf91   :  { %v4892_v19 = vpop.eup %4891 }
 0xf92   :  { %871 = vrot.lane.b32.xlu0 %v4892_v19, %s5216_s14 }
0x1004   :  { %v872_v6 = vpop.permute.xlu0 %871 }
0x1005   :  { %v5502_v8 = vmul.f32 %v4890_v9, %v872_v6 }
0x1007   :  { %v880_v11 = vrot.slane %v5502_v8, 4 }
0x1009   :  { %881 = vrot.lane.b32.xlu1 %v880_v11, %s5217_s3 }
0x107b   :  { %v882_v12 = vpop.permute.xlu1 %881 }
0x107c   :  { %4501 = vmatmul.mubr.msk.f32.vlgmr.msra.gmra.mxu1 %vm234_vm3, %v882_v12 }
0x107d   :  { %4515 = vmatpush3.msra.mxu1 %v1103_v31 }
0x107e   :  { %4516 = vmatprep.subr.mxu1 %v1102_v32 }
0x107f   :  { %4517 = vmatpush3.msra.mxu1 %v1102_v32 }
0x1080   :  { %4518 = vmatprep.subr.mxu1 %v1101_v33 }
0x1081   :  { %4519 = vmatpush3.msra.mxu1 %v1101_v33 }
0x113c   :  { %v951_v14 = vpop.f32.mrf.mxu1 }
0x113d   :  { %v955_v15 = vadd.f32 %v951_v14, %v5408_v16 }
0x113e   :  { %v4502_v17 = vpop.f32.mrf.mxu1 }
0x113f   :  { %4893 = vtanh.f32 %v955_v15  ;;  %v4153_v20 = vmul.f32 -1.442695, %v955_v15 }
0x1141   :  { %4895 = vpow2.f32 %v4153_v20 }
0x114c   :  { %v4894_v18 = vpop.eup %4893 }
0x114d   :  { %968 = vrot.lane.b32.xlu0 %v4894_v18, %s5216_s14 }
0x114e   :  { %v4896_v21 = vpop.eup %4895 }
0x114f   :  { %v959_v22 = vadd.f32 1.0, %v4896_v21 }
0x1151   :  { %4897 = vrcp.f32 %v959_v22 }
0x115e   :  { %v4898_v23 = vpop.eup %4897 }
0x115f   :  { %v966_v27 = vmul.f32 %v4898_v23, %v964_v26 }
0x11bf   :  { %v969_v24 = vpop.permute.xlu0 %968 }
0x11c0   :  { %v971_v25 = vmul.f32 %v4898_v23, %v969_v24 }
0x11c2   :  { %973 = vrot.lane.b32.xlu1 %v971_v25, %s5217_s3 }
0x1234   :  { %v974_v28 = vpop.permute.xlu1 %973 }
0x1235   :  { %v5510_v29 = vadd.f32 %v974_v28, %v966_v27 }
0x1237   :  { %4899 = vtanh.f32 %v5510_v29  ;;  %v1072_v2 = vrot.slane %v5510_v29, 4 }
0x1244   :  { %v4900_v30 = vpop.eup %4899 }
0x1245   :  { %979 = vrot.lane.b32.xlu0 %v4900_v30, %s5216_s14 }
0x1249   :  { %443 = vrot.lane.b32.xlu0 %v5431_v54, %s5217_s3  ;;  %v1100_v54 = vld [vmem:[%s6119_s4] sm:$0xff] }
0x124a   :  { %4520 = vmatprep.subr.mxu1 %v1100_v54 }
0x124b   :  { %4521 = vmatpush3.msra.mxu1 %v1100_v54 }
0x124c   :  { %4539 = vmatprep.subr.mxu1 %v5214_v1 }
0x12b7   :  { %v980_v13 = vpop.permute.xlu0 %979 }
0x12b8   :  { %v982_v34 = vmul.f32 %v4898_v23, %v980_v13 }
0x12ba   :  { %984 = vrot.lane.b32.xlu1 %v982_v34, %s5217_s3 }
0x12bb   :  { %v444_v36 = vpop.permute.xlu0 %443 }
0x12bc   :  { %447 = vst.msk [vmem:[#allocation2] sm:$0xf0] %vm446_vm4, %v444_v36 }
0x12be   :  { %660 = vrot.lane.b32.xlu1 %v5467_v35, %s5217_s3  ;;  %v5544_v35 = vld [vmem:[#allocation5 + $0x8] sm:$0xff] }
0x12c3   :  { %v1096_v37 = vld [vmem:[#allocation2] sm:$0xff] }
0x12c4   :  { %4522 = vmatprep.mubr.msk.f32.mxu1 %vm234_vm3, %v1096_v37 }
0x132c   :  { %v985_v39 = vpop.permute.xlu1 %984 }
0x132d   :  { %987 = vst.msk [vmem:[#allocation2 + $0x18] sm:$0xf] %vm337_vm2, %v985_v39  ;;  %4512 = vmatmul.mubr.msk.f32.vlgmr.msra.gmra.mxu0 %vm234_vm3, %v985_v39 }
0x132e   :  { %4529 = vmatpush3.msra.mxu0 %v5534_v38  ;;  %4536 = vmatprep.mubr.msk.f32.mxu0 %vm5215_vm0, %v5214_v1 }
0x132f   :  { %4530 = vmatprep.subr.mxu0 %v5214_v1 }
0x1330   :  { %v661_v41 = vpop.permute.xlu1 %660  ;;  %4531 = vmatpush3.msra.mxu0 %v5538_v40 }
0x1331   :  { %663 = vst.msk [vmem:[#allocation2 + $0x8] sm:$0xf0] %vm446_vm4, %v661_v41  ;;  %4532 = vmatprep.subr.mxu0 %v5214_v1 }
0x1332   :  { %4533 = vmatpush3.msra.mxu0 %v5544_v35 }
0x1333   :  { %4534 = vmatprep.subr.mxu0 %v5214_v1 }
0x1334   :  { %4535 = vmatpush3.msra.mxu0 %v5549_v42 }
0x1335   :  { %4537 = vmatmul.mubr.f32.vlgmr.msra.gmra.mxu0 %v5214_v1  ;;  %4550 = vmatprep.subr.mxu0 %v5214_v1 }
0x1336   :  { %4551 = vmatpush3.msra.mxu0 %v5534_v38  ;;  %4558 = vmatprep.mubr.msk.f32.mxu0 %vm5215_vm0, %v5214_v1 }
0x1337   :  { %4552 = vmatprep.subr.mxu0 %v5214_v1 }
0x1338   :  { %v1097_v43 = vld [vmem:[#allocation2 + $0x8] sm:$0xff]  ;;  %4553 = vmatpush3.msra.mxu0 %v5538_v40 }
0x1339   :  { %4523 = vmatmul.mubr.msk.f32.vlgmr.msra.gmra.mxu1 %vm234_vm3, %v1097_v43  ;;  %4554 = vmatprep.subr.mxu0 %v5214_v1 }
0x133a   :  { %4540 = vmatpush3.msra.mxu1 %v5534_v38  ;;  %4555 = vmatpush3.msra.mxu0 %v5544_v35 }
0x133b   :  { %4541 = vmatprep.subr.mxu1 %v5214_v1  ;;  %4556 = vmatprep.subr.mxu0 %v5214_v1 }
0x133c   :  { %4542 = vmatpush3.msra.mxu1 %v5538_v40  ;;  %4557 = vmatpush3.msra.mxu0 %v5549_v42 }
0x133d   :  { %4543 = vmatprep.subr.mxu1 %v5214_v1  ;;  %4572 = vmatprep.subr.mxu0 %v5214_v1 }
0x133e   :  { %4544 = vmatpush3.msra.mxu1 %v5544_v35 }
0x133f   :  { %4545 = vmatprep.subr.mxu1 %v5214_v1 }
0x1340   :  { %4546 = vmatpush3.msra.mxu1 %v5549_v42 }
0x1341   :  { %4561 = vmatprep.subr.mxu1 %v5214_v1 }
0x13ed   :  { %v1056_v44 = vpop.f32.mrf.mxu0 }
0x13ee   :  { %v1061_v45 = vrot.slane %v1056_v44, 4 }
0x13ef   :  { %v4513_v46 = vpop.f32.mrf.mxu0 }
0x13f0   :  { %v1063_v47 = vadd.f32 %v1061_v45, %v5408_v16 }
0x13f2   :  { %4901 = vtanh.f32 %v1063_v47  ;;  %v4155_v57 = vmul.f32 -1.442695, %v1063_v47 }
0x13f5   :  { %v1278_v48 = vpop.f32.mrf.mxu0 }
0x13f7   :  { %v4538_v49 = vpop.f32.mrf.mxu0 }
0x13f9   :  { %v5576_v50 = vpop.f32.mrf.mxu1 }
0x13fb   :  { %v1193_v52 = vpop.f32.mrf.mxu1 }
0x13fc   :  { %v5584_v53 = vadd.f32 %v5581_v51, %v1193_v52  ;;  %v1199_v52 = vadd.f32 %v5576_v50, %v5581_v51 }
0x13fe   :  { %v1282_v55 = vadd.f32 %v1278_v48, %v5584_v53 }
0x13ff   :  { %v4902_v56 = vpop.eup %4901 }
0x1400   :  { %4903 = vtanh.f32 %v1282_v55  ;;  %1076 = vrot.lane.b32.xlu0 %v4902_v56, %s5216_s14  ;;  %v4161_v58 = vmul.f32 -1.442695, %v1282_v55 }
0x1401   :  { %4905 = vpow2.f32 %v4155_v57 }
0x1402   :  { %4907 = vpow2.f32 %v4161_v58 }
0x140d   :  { %v4904_v16 = vpop.eup %4903 }
0x140e   :  { %1292 = vrot.lane.b32.xlu1 %v4904_v16, %s5216_s14  ;;  %v4906_v5 = vpop.eup %4905 }
0x140f   :  { %v1067_v59 = vadd.f32 1.0, %v4906_v5  ;;  %v4908_v60 = vpop.eup %4907 }
0x1410   :  { %v1286_v7 = vadd.f32 1.0, %v4908_v60 }
0x1411   :  { %4909 = vrcp.f32 %v1067_v59 }
0x1412   :  { %4911 = vrcp.f32 %v1286_v7 }
0x141e   :  { %v4910_v61 = vpop.eup %4909 }
0x141f   :  { %v4912_v63 = vpop.eup %4911  ;;  %v1074_v3 = vmul.f32 %v4910_v61, %v1072_v2 }
0x1420   :  { %v1290_v6 = vmul.f32 0.0, %v4912_v63 }
0x1472   :  { %v1077_v62 = vpop.permute.xlu0 %1076 }
0x1473   :  { %v1079_v9 = vmul.f32 %v4910_v61, %v1077_v62 }
0x1475   :  { %1081 = vrot.lane.b32.xlu0 %v1079_v9, %s5217_s3 }
0x1480   :  { %v1293_v0 = vpop.permute.xlu1 %1292 }
0x1481   :  { %v1295_v10 = vmul.f32 %v4912_v63, %v1293_v0 }
0x1483   :  { %1297 = vrot.lane.b32.xlu1 %v1295_v10, %s5217_s3 }
0x14e7   :  { %v1082_v4 = vpop.permute.xlu0 %1081 }
0x14e8   :  { %v1084_v19 = vadd.f32 %v1082_v4, %v1074_v3 }
0x14ea   :  { %4913 = vtanh.f32 %v1084_v19 }
0x14f5   :  { %v1298_v11 = vpop.permute.xlu1 %1297 }
0x14f6   :  { %v1300_v12 = vadd.f32 %v1298_v11, %v1290_v6 }
0x14f7   :  { %v4914_v14 = vpop.eup %4913 }
0x14f8   :  { %4915 = vtanh.f32 %v1300_v12  ;;  %1087 = vrot.lane.b32.xlu0 %v4914_v14, %s5216_s14  ;;  %v1396_v39 = vrot.slane %v1300_v12, 4 }
0x14fc   :  { %876 = vrot.lane.b32.xlu0 %v5502_v8, %s5217_s3 }
0x1505   :  { %v4916_v15 = vpop.eup %4915 }
0x1506   :  { %1303 = vrot.lane.b32.xlu1 %v4916_v15, %s5216_s14 }
0x156a   :  { %v1088_v17 = vpop.permute.xlu0 %1087 }
0x156b   :  { %v1090_v18 = vmul.f32 %v4910_v61, %v1088_v17 }
0x156d   :  { %1092 = vrot.lane.b32.xlu1 %v1090_v18, %s5217_s3 }
0x156e   :  { %v877_v20 = vpop.permute.xlu0 %876 }
0x156f   :  { %879 = vst.msk [vmem:[#allocation2 + $0x10] sm:$0xf0] %vm446_vm4, %v877_v20 }
0x1576   :  { %v1098_v21 = vld [vmem:[#allocation2 + $0x10] sm:$0xff] }
0x1577   :  { %4525 = vmatprep.mubr.msk.f32.mxu1 %vm234_vm3, %v1098_v21 }
0x1578   :  { %v1304_v22 = vpop.permute.xlu1 %1303 }
0x1579   :  { %v1306_v23 = vmul.f32 %v4912_v63, %v1304_v22 }
0x157b   :  { %1308 = vrot.lane.b32.xlu0 %v1306_v23, %s5217_s3 }
0x15df   :  { %v1093_v24 = vpop.permute.xlu1 %1092 }
0x15e0   :  { %1095 = vst.msk [vmem:[#allocation2 + $0x18] sm:$0xf0] %vm446_vm4, %v1093_v24 }
0x15e7   :  { %v1099_v8 = vld [vmem:[#allocation2 + $0x18] sm:$0xff] }
0x15e8   :  { %4526 = vmatmul.mubr.msk.f32.gmra.mxu1 %vm234_vm3, %v1099_v8 }
0x15e9   :  { %4547 = vmatprep.mubr.msk.f32.mxu1 %vm5215_vm0, %v5214_v1 }
0x15ed   :  { %v1309_v25 = vpop.permute.xlu0 %1308 }
0x15ee   :  { %1311 = vst.msk [vmem:[#allocation3] sm:$0xf] %vm337_vm2, %v1309_v25  ;;  %4548 = vmatmul.mubr.msk.f32.vlgmr.msra.gmra.mxu1 %vm234_vm3, %v1309_v25 }
0x15ef   :  { %4562 = vmatpush3.msra.mxu1 %v5534_v38  ;;  %4569 = vmatprep.mubr.msk.f32.mxu1 %vm5215_vm0, %v5214_v1 }
0x15f0   :  { %4563 = vmatprep.subr.mxu1 %v5214_v1 }
0x15f1   :  { %4564 = vmatpush3.msra.mxu1 %v5538_v40 }
0x15f2   :  { %4565 = vmatprep.subr.mxu1 %v5214_v1 }
0x15f3   :  { %4566 = vmatpush3.msra.mxu1 %v5544_v35 }
0x15f4   :  { %4567 = vmatprep.subr.mxu1 %v5214_v1 }
0x15f5   :  { %4568 = vmatpush3.msra.mxu1 %v5549_v42 }
0x15f6   :  { %4583 = vmatprep.subr.mxu1 %v5214_v1 }
0x16a8   :  { %v5616_v26 = vpop.f32.mrf.mxu1 }
0x16aa   :  { %v5618_v27 = vpop.f32.mrf.mxu1 }
0x16ae   :  { %v1380_v28 = vpop.f32.mrf.mxu1 }
0x16af   :  { %v1385_v29 = vrot.slane %v1380_v28, 4 }
0x16b0   :  { %v4549_v30 = vpop.f32.mrf.mxu1 }
0x16b1   :  { %v1387_v31 = vadd.f32 %v1385_v29, %v5584_v53 }
0x16b3   :  { %4917 = vtanh.f32 %v1387_v31  ;;  %v4163_v33 = vmul.f32 -1.442695, %v1387_v31  ;;  %v1204_v31 = vadd.f32 %v5581_v51, %v5618_v27 }
0x16b5   :  { %4919 = vpow2.f32 %v4163_v33 }
0x16c0   :  { %v4918_v32 = vpop.eup %4917 }
0x16c1   :  { %1400 = vrot.lane.b32.xlu1 %v4918_v32, %s5216_s14 }
0x16c2   :  { %v4920_v54 = vpop.eup %4919 }
0x16c3   :  { %v1391_v13 = vadd.f32 1.0, %v4920_v54 }
0x16c5   :  { %4921 = vrcp.f32 %v1391_v13 }
0x16d2   :  { %v4922_v34 = vpop.eup %4921 }
0x16d3   :  { %v1398_v41 = vmul.f32 %v4922_v34, %v1396_v39 }
0x1733   :  { %v1401_v36 = vpop.permute.xlu1 %1400 }
0x1734   :  { %v1403_v37 = vmul.f32 %v4922_v34, %v1401_v36 }
0x1736   :  { %1405 = vrot.lane.b32.xlu0 %v1403_v37, %s5217_s3 }
0x17a8   :  { %v1406_v43 = vpop.permute.xlu0 %1405 }
0x17a9   :  { %v1408_v44 = vadd.f32 %v1406_v43, %v1398_v41 }
0x17ab   :  { %4923 = vtanh.f32 %v1408_v44  ;;  %v1504_v61 = vrot.slane %v1408_v44, 4 }
0x17b8   :  { %v4924_v45 = vpop.eup %4923 }
0x17b9   :  { %1411 = vrot.lane.b32.xlu1 %v4924_v45, %s5216_s14 }
0x182b   :  { %v1412_v46 = vpop.permute.xlu1 %1411 }
0x182c   :  { %v5624_v47 = vmul.f32 %v4922_v34, %v1412_v46 }
0x182e   :  { %v1420_v48 = vrot.slane %v5624_v47, 4 }
0x1830   :  { %1421 = vrot.lane.b32.xlu0 %v1420_v48, %s5217_s3 }
0x18a2   :  { %v1422_v49 = vpop.permute.xlu0 %1421 }
0x18a3   :  { %4559 = vmatmul.mubr.msk.f32.vlgmr.msra.gmra.mxu0 %vm234_vm3, %v1422_v49 }
0x18a4   :  { %4573 = vmatpush3.msra.mxu0 %v5534_v38  ;;  %4580 = vmatprep.mubr.msk.f32.mxu0 %vm5215_vm0, %v5214_v1 }
0x18a5   :  { %4574 = vmatprep.subr.mxu0 %v5214_v1 }
0x18a6   :  { %4575 = vmatpush3.msra.mxu0 %v5538_v40 }
0x18a7   :  { %4576 = vmatprep.subr.mxu0 %v5214_v1 }
0x18a8   :  { %4577 = vmatpush3.msra.mxu0 %v5544_v35 }
0x18a9   :  { %4578 = vmatprep.subr.mxu0 %v5214_v1 }
0x18aa   :  { %4579 = vmatpush3.msra.mxu0 %v5549_v42 }
0x18ab   :  { %4594 = vmatprep.subr.mxu0 %v5214_v1 }
0x1963   :  { %v1491_v53 = vpop.f32.mrf.mxu0 }
0x1964   :  { %v1495_v55 = vadd.f32 %v1491_v53, %v1199_v52 }
0x1965   :  { %v4560_v56 = vpop.f32.mrf.mxu0 }
0x1966   :  { %4925 = vtanh.f32 %v1495_v55  ;;  %v4165_v57 = vmul.f32 -1.442695, %v1495_v55 }
0x1968   :  { %4927 = vpow2.f32 %v4165_v57 }
0x1973   :  { %v4926_v16 = vpop.eup %4925 }
0x1974   :  { %1508 = vrot.lane.b32.xlu1 %v4926_v16, %s5216_s14 }
0x1975   :  { %v4928_v58 = vpop.eup %4927 }
0x1976   :  { %v1499_v5 = vadd.f32 1.0, %v4928_v58 }
0x1978   :  { %4929 = vrcp.f32 %v1499_v5 }
0x1985   :  { %v4930_v59 = vpop.eup %4929 }
0x1986   :  { %v1506_v62 = vmul.f32 %v4930_v59, %v1504_v61 }
0x19e6   :  { %v1509_v60 = vpop.permute.xlu1 %1508 }
0x19e7   :  { %v1511_v7 = vmul.f32 %v4930_v59, %v1509_v60 }
0x19e9   :  { %1513 = vrot.lane.b32.xlu0 %v1511_v7, %s5217_s3 }
0x1a5b   :  { %v1514_v50 = vpop.permute.xlu0 %1513 }
0x1a5c   :  { %v1516_v9 = vadd.f32 %v1514_v50, %v1506_v62 }
0x1a5e   :  { %4931 = vtanh.f32 %v1516_v9  ;;  %v1612_v21 = vrot.slane %v1516_v9, 4 }
0x1a6b   :  { %v4932_v63 = vpop.eup %4931 }
0x1a6c   :  { %1519 = vrot.lane.b32.xlu1 %v4932_v63, %s5216_s14 }
0x1ade   :  { %v1520_v0 = vpop.permute.xlu1 %1519 }
0x1adf   :  { %v1522_v10 = vmul.f32 %v4930_v59, %v1520_v0 }
0x1ae1   :  { %1524 = vrot.lane.b32.xlu0 %v1522_v10, %s5217_s3 }
0x1b53   :  { %v1525_v2 = vpop.permute.xlu0 %1524 }
0x1b54   :  { %1527 = vst.msk [vmem:[#allocation3 + $0x8] sm:$0xf] %vm337_vm2, %v1525_v2  ;;  %4570 = vmatmul.mubr.msk.f32.vlgmr.msra.gmra.mxu1 %vm234_vm3, %v1525_v2  ;;  %v5702_v2 = vadd.f32 %v5616_v26, %v5581_v51 }
0x1b55   :  { %4584 = vmatpush3.msra.mxu1 %v5534_v38  ;;  %4591 = vmatprep.mubr.msk.f32.mxu1 %vm5215_vm0, %v5214_v1 }
0x1b56   :  { %4585 = vmatprep.subr.mxu1 %v5214_v1 }
0x1b57   :  { %4586 = vmatpush3.msra.mxu1 %v5538_v40 }
0x1b58   :  { %4587 = vmatprep.subr.mxu1 %v5214_v1 }
0x1b59   :  { %4588 = vmatpush3.msra.mxu1 %v5544_v35 }
0x1b5a   :  { %4589 = vmatprep.subr.mxu1 %v5214_v1 }
0x1b5b   :  { %4590 = vmatpush3.msra.mxu1 %v5549_v42 }
0x1b5c   :  { %4605 = vmatprep.subr.mxu1 %v5214_v1 }
0x1c14   :  { %v1596_v3 = vpop.f32.mrf.mxu1 }
0x1c15   :  { %v1601_v4 = vrot.slane %v1596_v3, 4 }
0x1c16   :  { %v4571_v19 = vpop.f32.mrf.mxu1 }
0x1c17   :  { %v1603_v6 = vadd.f32 %v1601_v4, %v1199_v52 }
0x1c19   :  { %4933 = vtanh.f32 %v1603_v6  ;;  %v4167_v12 = vmul.f32 -1.442695, %v1603_v6 }
0x1c1b   :  { %4935 = vpow2.f32 %v4167_v12 }
0x1c26   :  { %v4934_v11 = vpop.eup %4933 }
0x1c27   :  { %1616 = vrot.lane.b32.xlu1 %v4934_v11, %s5216_s14 }
0x1c28   :  { %v4936_v14 = vpop.eup %4935 }
0x1c29   :  { %v1607_v15 = vadd.f32 1.0, %v4936_v14 }
0x1c2b   :  { %4937 = vrcp.f32 %v1607_v15 }
0x1c38   :  { %v4938_v17 = vpop.eup %4937 }
0x1c39   :  { %v1614_v22 = vmul.f32 %v4938_v17, %v1612_v21 }
0x1c99   :  { %v1617_v18 = vpop.permute.xlu1 %1616 }
0x1c9a   :  { %v1619_v20 = vmul.f32 %v4938_v17, %v1617_v18 }
0x1c9c   :  { %1621 = vrot.lane.b32.xlu0 %v1619_v20, %s5217_s3 }
0x1d0e   :  { %v1622_v23 = vpop.permute.xlu0 %1621 }
0x1d0f   :  { %v1624_v24 = vadd.f32 %v1622_v23, %v1614_v22  ;;  %v2075_v23 = vld [vmem:[#allocation7 + $0x18] sm:$0xff] }
0x1d11   :  { %4939 = vtanh.f32 %v1624_v24  ;;  %v1720_v44 = vrot.slane %v1624_v24, 4  ;;  %v2074_v24 = vld [vmem:[#allocation7 + $0x10] sm:$0xff] }
0x1d1e   :  { %v4940_v8 = vpop.eup %4939 }
0x1d1f   :  { %1627 = vrot.lane.b32.xlu1 %v4940_v8, %s5216_s14  ;;  %v2073_v8 = vld [vmem:[#allocation7 + $0x8] sm:$0xff] }
0x1d91   :  { %v1628_v25 = vpop.permute.xlu1 %1627 }
0x1d92   :  { %v5660_v28 = vmul.f32 %v4938_v17, %v1628_v25  ;;  %v2072_v25 = vld [vmem:[#allocation7] sm:$0xff] }
0x1d94   :  { %v1636_v29 = vrot.slane %v5660_v28, 4 }
0x1d96   :  { %1637 = vrot.lane.b32.xlu0 %v1636_v29, %s5217_s3 }
0x1e08   :  { %v1638_v30 = vpop.permute.xlu0 %1637 }
0x1e09   :  { %4581 = vmatmul.mubr.msk.f32.vlgmr.msra.gmra.mxu0 %vm234_vm3, %v1638_v30 }
0x1e0a   :  { %4595 = vmatpush3.msra.mxu0 %v5534_v38  ;;  %4602 = vmatprep.mubr.msk.f32.mxu0 %vm5215_vm0, %v5214_v1 }
0x1e0b   :  { %4596 = vmatprep.subr.mxu0 %v5214_v1 }
0x1e0c   :  { %4597 = vmatpush3.msra.mxu0 %v5538_v40 }
0x1e0d   :  { %4598 = vmatprep.subr.mxu0 %v5214_v1 }
0x1e0e   :  { %4599 = vmatpush3.msra.mxu0 %v5544_v35 }
0x1e0f   :  { %4600 = vmatprep.subr.mxu0 %v5214_v1 }
0x1e10   :  { %4601 = vmatpush3.msra.mxu0 %v5549_v42 }
0x1e11   :  { %4616 = vmatprep.subr.mxu0 %v2075_v23 }
0x1ec9   :  { %v1707_v32 = vpop.f32.mrf.mxu0 }
0x1eca   :  { %v1711_v33 = vadd.f32 %v1707_v32, %v1204_v31  ;;  %v5719_v32 = vld [vmem:[#allocation9 + $0x18] sm:$0xff] }
0x1ecb   :  { %v4582_v54 = vpop.f32.mrf.mxu0 }
0x1ecc   :  { %4941 = vtanh.f32 %v1711_v33  ;;  %v4169_v34 = vmul.f32 -1.442695, %v1711_v33  ;;  %v5723_v54 = vld [vmem:[#allocation9 + $0x10] sm:$0xff] }
0x1ece   :  { %4943 = vpow2.f32 %v4169_v34  ;;  %v5734_v34 = vld [vmem:[#allocation9] sm:$0xff] }
0x1ed9   :  { %v4942_v13 = vpop.eup %4941 }
0x1eda   :  { %1724 = vrot.lane.b32.xlu1 %v4942_v13, %s5216_s14 }
0x1edb   :  { %v4944_v36 = vpop.eup %4943 }
0x1edc   :  { %v1715_v37 = vadd.f32 1.0, %v4944_v36 }
0x1ede   :  { %4945 = vrcp.f32 %v1715_v37 }
0x1eeb   :  { %v4946_v39 = vpop.eup %4945 }
0x1eec   :  { %v1722_v45 = vmul.f32 %v4946_v39, %v1720_v44 }
0x1f4c   :  { %v1725_v41 = vpop.permute.xlu1 %1724 }
0x1f4d   :  { %v1727_v43 = vmul.f32 %v4946_v39, %v1725_v41 }
0x1f4f   :  { %1729 = vrot.lane.b32.xlu0 %v1727_v43, %s5217_s3 }
0x1fc1   :  { %v1730_v27 = vpop.permute.xlu0 %1729 }
0x1fc2   :  { %v1732_v46 = vadd.f32 %v1730_v27, %v1722_v45 }
0x1fc4   :  { %4947 = vtanh.f32 %v1732_v46 }
0x1fd1   :  { %v4948_v48 = vpop.eup %4947 }
0x1fd2   :  { %1735 = vrot.lane.b32.xlu1 %v4948_v48, %s5216_s14 }
0x2044   :  { %v1736_v49 = vpop.permute.xlu1 %1735 }
0x2045   :  { %v1738_v52 = vmul.f32 %v4946_v39, %v1736_v49 }
0x2047   :  { %1740 = vrot.lane.b32.xlu0 %v1738_v52, %s5217_s3 }
0x20b9   :  { %v1741_v53 = vpop.permute.xlu0 %1740 }
0x20ba   :  { %1743 = vst.msk [vmem:[#allocation3 + $0x10] sm:$0xf] %vm337_vm2, %v1741_v53  ;;  %4592 = vmatmul.mubr.msk.f32.vlgmr.msra.gmra.mxu1 %vm234_vm3, %v1741_v53 }
0x20bb   :  { %4606 = vmatpush3.msra.mxu1 %v5534_v38  ;;  %4613 = vmatprep.mubr.msk.f32.mxu1 %vm5215_vm0, %v5214_v1 }
0x20bc   :  { %4607 = vmatprep.subr.mxu1 %v5214_v1 }
0x20bd   :  { %4608 = vmatpush3.msra.mxu1 %v5538_v40 }
0x20be   :  { %4609 = vmatprep.subr.mxu1 %v5214_v1 }
0x20bf   :  { %4610 = vmatpush3.msra.mxu1 %v5544_v35 }
0x20c0   :  { %4611 = vmatprep.subr.mxu1 %v5214_v1 }
0x20c1   :  { %4612 = vmatpush3.msra.mxu1 %v5549_v42  ;;  %v1828_v42 = vrot.slane %v1732_v46, 4  ;;  %v5766_v46 = vld [vmem:[%s6124_s9] ss:$0 sm:$0xff] }
0x20c2   :  { %4630 = vmatprep.subr.mxu1 %v5214_v1 }
0x217a   :  { %v1812_v55 = vpop.f32.mrf.mxu1 }
0x217b   :  { %v1817_v56 = vrot.slane %v1812_v55, 4 }
0x217c   :  { %v4593_v38 = vpop.f32.mrf.mxu1 }
0x217d   :  { %v1819_v16 = vadd.f32 %v1817_v56, %v1204_v31 }
0x217f   :  { %4949 = vtanh.f32 %v1819_v16  ;;  %v4171_v58 = vmul.f32 -1.442695, %v1819_v16 }
0x2181   :  { %4951 = vpow2.f32 %v4171_v58 }
0x218c   :  { %v4950_v57 = vpop.eup %4949 }
0x218d   :  { %1832 = vrot.lane.b32.xlu1 %v4950_v57, %s5216_s14 }
0x218e   :  { %v4952_v40 = vpop.eup %4951 }
0x218f   :  { %v1823_v5 = vadd.f32 1.0, %v4952_v40 }
0x2191   :  { %4953 = vrcp.f32 %v1823_v5 }
0x219e   :  { %v4954_v35 = vpop.eup %4953 }
0x219f   :  { %v1830_v7 = vmul.f32 %v4954_v35, %v1828_v42 }
0x21ff   :  { %v1833_v59 = vpop.permute.xlu1 %1832 }
0x2200   :  { %v1835_v60 = vmul.f32 %v4954_v35, %v1833_v59 }
0x2202   :  { %1837 = vrot.lane.b32.xlu0 %v1835_v60, %s5217_s3 }
0x2274   :  { %v1838_v61 = vpop.permute.xlu0 %1837 }
0x2275   :  { %v1840_v62 = vadd.f32 %v1838_v61, %v1830_v7 }
0x2277   :  { %4955 = vtanh.f32 %v1840_v62  ;;  %v1936_v51 = vrot.slane %v1840_v62, 4 }
0x2284   :  { %v4956_v50 = vpop.eup %4955 }
0x2285   :  { %1843 = vrot.lane.b32.xlu1 %v4956_v50, %s5216_s14 }
0x22f7   :  { %v1844_v9 = vpop.permute.xlu1 %1843 }
0x22f8   :  { %v5695_v63 = vmul.f32 %v4954_v35, %v1844_v9 }
0x22fa   :  { %v1852_v0 = vrot.slane %v5695_v63, 4 }
0x22fc   :  { %1853 = vrot.lane.b32.xlu0 %v1852_v0, %s5217_s3 }
0x236e   :  { %v1854_v10 = vpop.permute.xlu0 %1853 }
0x236f   :  { %4603 = vmatmul.mubr.msk.f32.vlgmr.msra.gmra.mxu0 %vm234_vm3, %v1854_v10 }
0x2370   :  { %4617 = vmatpush3.msra.mxu0 %v2075_v23 }
0x2371   :  { %4618 = vmatprep.subr.mxu0 %v2074_v24 }
0x2372   :  { %4619 = vmatpush3.msra.mxu0 %v2074_v24 }
0x2373   :  { %4620 = vmatprep.subr.mxu0 %v2073_v8 }
0x2374   :  { %4621 = vmatpush3.msra.mxu0 %v2073_v8 }
0x2375   :  { %4622 = vmatprep.subr.mxu0 %v2072_v25 }
0x2376   :  { %4623 = vmatpush3.msra.mxu0 %v2072_v25 }
0x2377   :  { %4641 = vmatprep.subr.mxu0 %v5214_v1 }
0x242f   :  { %v1923_v3 = vpop.f32.mrf.mxu0 }
0x2430   :  { %v1927_v4 = vadd.f32 %v1923_v3, %v5702_v2 }
0x2431   :  { %v4604_v19 = vpop.f32.mrf.mxu0 }
0x2432   :  { %4957 = vtanh.f32 %v1927_v4  ;;  %v4173_v11 = vmul.f32 -1.442695, %v1927_v4 }
0x2434   :  { %4959 = vpow2.f32 %v4173_v11 }
0x243f   :  { %v4958_v6 = vpop.eup %4957 }
0x2440   :  { %1940 = vrot.lane.b32.xlu1 %v4958_v6, %s5216_s14 }
0x2441   :  { %v4960_v12 = vpop.eup %4959 }
0x2442   :  { %v1931_v14 = vadd.f32 1.0, %v4960_v12 }
0x2444   :  { %4961 = vrcp.f32 %v1931_v14 }
0x2451   :  { %v4962_v15 = vpop.eup %4961 }
0x2452   :  { %v1938_v26 = vmul.f32 %v4962_v15, %v1936_v51 }
0x24b2   :  { %v1941_v17 = vpop.permute.xlu1 %1940 }
0x24b3   :  { %v1943_v18 = vmul.f32 %v4962_v15, %v1941_v17 }
0x24b5   :  { %1945 = vrot.lane.b32.xlu0 %v1943_v18, %s5217_s3 }
0x2527   :  { %v1946_v20 = vpop.permute.xlu0 %1945 }
0x2528   :  { %v5707_v21 = vadd.f32 %v1946_v20, %v1938_v26 }
0x252a   :  { %4963 = vtanh.f32 %v5707_v21  ;;  %v2044_v61 = vrot.slane %v5707_v21, 4 }
0x2537   :  { %v4964_v22 = vpop.eup %4963 }
0x2538   :  { %1951 = vrot.lane.b32.xlu1 %v4964_v22, %s5216_s14 }
0x253c   :  { %1416 = vrot.lane.b32.xlu1 %v5624_v47, %s5217_s3 }
0x25aa   :  { %v1952_v29 = vpop.permute.xlu1 %1951 }
0x25ab   :  { %v1954_v30 = vmul.f32 %v4962_v15, %v1952_v29 }
0x25ad   :  { %1956 = vrot.lane.b32.xlu0 %v1954_v30, %s5217_s3 }
0x25ae   :  { %v1417_v31 = vpop.permute.xlu1 %1416 }
0x25af   :  { %1419 = vst.msk [vmem:[#allocation3] sm:$0xf0] %vm446_vm4, %v1417_v31 }
0x25b1   :  { %1632 = vrot.lane.b32.xlu0 %v5660_v28, %s5217_s3  ;;  %v5729_v28 = vld [vmem:[#allocation9 + $0x8] sm:$0xff] }
0x25b6   :  { %v2068_v47 = vld [vmem:[#allocation3] sm:$0xff] }
0x25b7   :  { %4624 = vmatprep.mubr.msk.f32.mxu0 %vm234_vm3, %v2068_v47 }
0x261f   :  { %v1957_v33 = vpop.permute.xlu0 %1956 }
0x2620   :  { %1959 = vst.msk [vmem:[#allocation3 + $0x18] sm:$0xf] %vm337_vm2, %v1957_v33  ;;  %4614 = vmatmul.mubr.msk.f32.vlgmr.msra.gmra.mxu1 %vm234_vm3, %v1957_v33 }
0x2621   :  { %4631 = vmatpush3.msra.mxu1 %v5719_v32  ;;  %4638 = vmatprep.mubr.msk.f32.mxu1 %vm5215_vm0, %v5214_v1 }
0x2622   :  { %4632 = vmatprep.subr.mxu1 %v5214_v1 }
0x2623   :  { %v1633_v13 = vpop.permute.xlu0 %1632  ;;  %4633 = vmatpush3.msra.mxu1 %v5723_v54 }
0x2624   :  { %1635 = vst.msk [vmem:[#allocation3 + $0x8] sm:$0xf0] %vm446_vm4, %v1633_v13  ;;  %4634 = vmatprep.subr.mxu1 %v5214_v1 }
0x2625   :  { %4635 = vmatpush3.msra.mxu1 %v5729_v28 }
0x2626   :  { %4636 = vmatprep.subr.mxu1 %v5214_v1 }
0x2627   :  { %4637 = vmatpush3.msra.mxu1 %v5734_v34 }
0x2628   :  { %4639 = vmatmul.mubr.f32.vlgmr.msra.gmra.mxu1 %v5214_v1  ;;  %4652 = vmatprep.subr.mxu1 %v5214_v1 }
0x2629   :  { %4653 = vmatpush3.msra.mxu1 %v5719_v32  ;;  %4660 = vmatprep.mubr.msk.f32.mxu1 %vm5215_vm0, %v5214_v1 }
0x262a   :  { %4654 = vmatprep.subr.mxu1 %v5214_v1 }
0x262b   :  { %v2069_v36 = vld [vmem:[#allocation3 + $0x8] sm:$0xff]  ;;  %4655 = vmatpush3.msra.mxu1 %v5723_v54 }
0x262c   :  { %4625 = vmatmul.mubr.msk.f32.vlgmr.msra.gmra.mxu0 %vm234_vm3, %v2069_v36  ;;  %4656 = vmatprep.subr.mxu1 %v5214_v1 }
0x262d   :  { %4642 = vmatpush3.msra.mxu0 %v5719_v32  ;;  %4657 = vmatpush3.msra.mxu1 %v5729_v28 }
0x262e   :  { %4643 = vmatprep.subr.mxu0 %v5214_v1  ;;  %4658 = vmatprep.subr.mxu1 %v5214_v1 }
0x262f   :  { %4644 = vmatpush3.msra.mxu0 %v5723_v54  ;;  %4659 = vmatpush3.msra.mxu1 %v5734_v34 }
0x2630   :  { %4645 = vmatprep.subr.mxu0 %v5214_v1  ;;  %4674 = vmatprep.subr.mxu1 %v5214_v1 }
0x2631   :  { %4646 = vmatpush3.msra.mxu0 %v5729_v28 }
0x2632   :  { %4647 = vmatprep.subr.mxu0 %v5214_v1 }
0x2633   :  { %4648 = vmatpush3.msra.mxu0 %v5734_v34 }
0x2634   :  { %4663 = vmatprep.subr.mxu0 %v5214_v1 }
0x26e0   :  { %v2028_v37 = vpop.f32.mrf.mxu1 }
0x26e1   :  { %v2033_v39 = vrot.slane %v2028_v37, 4 }
0x26e2   :  { %v4615_v41 = vpop.f32.mrf.mxu1 }
0x26e3   :  { %v2035_v43 = vadd.f32 %v2033_v39, %v5702_v2 }
0x26e5   :  { %4965 = vtanh.f32 %v2035_v43  ;;  %v4175_v56 = vmul.f32 -1.442695, %v2035_v43 }
0x26e8   :  { %v2250_v44 = vpop.f32.mrf.mxu1 }
0x26ea   :  { %v4640_v45 = vpop.f32.mrf.mxu1 }
0x26ec   :  { %v5761_v27 = vpop.f32.mrf.mxu0 }
0x26ee   :  { %v2165_v48 = vpop.f32.mrf.mxu0 }
0x26ef   :  { %v5769_v49 = vadd.f32 %v5766_v46, %v2165_v48  ;;  %v2171_v48 = vadd.f32 %v5761_v27, %v5766_v46 }
0x26f1   :  { %v2254_v52 = vadd.f32 %v2250_v44, %v5769_v49 }
0x26f2   :  { %v4966_v53 = vpop.eup %4965 }
0x26f3   :  { %4967 = vtanh.f32 %v2254_v52  ;;  %2048 = vrot.lane.b32.xlu1 %v4966_v53, %s5216_s14  ;;  %v4181_v38 = vmul.f32 -1.442695, %v2254_v52 }
0x26f4   :  { %4969 = vpow2.f32 %v4175_v56 }
0x26f5   :  { %4971 = vpow2.f32 %v4181_v38 }
0x2700   :  { %v4968_v55 = vpop.eup %4967 }
0x2701   :  { %2264 = vrot.lane.b32.xlu0 %v4968_v55, %s5216_s14  ;;  %v4970_v16 = vpop.eup %4969 }
0x2702   :  { %v2039_v57 = vadd.f32 1.0, %v4970_v16  ;;  %v4972_v58 = vpop.eup %4971 }
0x2703   :  { %v2258_v40 = vadd.f32 1.0, %v4972_v58 }
0x2704   :  { %4973 = vrcp.f32 %v2039_v57 }
0x2705   :  { %4975 = vrcp.f32 %v2258_v40 }
0x2711   :  { %v4974_v5 = vpop.eup %4973 }
0x2712   :  { %v4976_v60 = vpop.eup %4975  ;;  %v2046_v62 = vmul.f32 %v4974_v5, %v2044_v61 }
0x2713   :  { %v2262_v0 = vmul.f32 0.0, %v4976_v60 }
0x2765   :  { %v2049_v35 = vpop.permute.xlu1 %2048 }
0x2766   :  { %v2051_v59 = vmul.f32 %v4974_v5, %v2049_v35 }
0x2768   :  { %2053 = vrot.lane.b32.xlu1 %v2051_v59, %s5217_s3 }
0x2773   :  { %v2265_v42 = vpop.permute.xlu0 %2264 }
0x2774   :  { %v2267_v7 = vmul.f32 %v4976_v60, %v2265_v42 }
0x2776   :  { %2269 = vrot.lane.b32.xlu0 %v2267_v7, %s5217_s3 }
0x27da   :  { %v2054_v50 = vpop.permute.xlu1 %2053 }
0x27db   :  { %v2056_v9 = vadd.f32 %v2054_v50, %v2046_v62 }
0x27dd   :  { %4977 = vtanh.f32 %v2056_v9 }
0x27e8   :  { %v2270_v10 = vpop.permute.xlu0 %2269 }
0x27e9   :  { %v2272_v2 = vadd.f32 %v2270_v10, %v2262_v0 }
0x27ea   :  { %v4978_v3 = vpop.eup %4977 }
0x27eb   :  { %4979 = vtanh.f32 %v2272_v2  ;;  %2059 = vrot.lane.b32.xlu1 %v4978_v3, %s5216_s14  ;;  %v2368_v33 = vrot.slane %v2272_v2, 4 }
0x27ef   :  { %1848 = vrot.lane.b32.xlu1 %v5695_v63, %s5217_s3 }
0x27f8   :  { %v4980_v4 = vpop.eup %4979 }
0x27f9   :  { %2275 = vrot.lane.b32.xlu0 %v4980_v4, %s5216_s14 }
0x285d   :  { %v2060_v19 = vpop.permute.xlu1 %2059 }
0x285e   :  { %v2062_v6 = vmul.f32 %v4974_v5, %v2060_v19 }
0x2860   :  { %2064 = vrot.lane.b32.xlu0 %v2062_v6, %s5217_s3 }
0x2861   :  { %v1849_v11 = vpop.permute.xlu1 %1848 }
0x2862   :  { %1851 = vst.msk [vmem:[#allocation3 + $0x10] sm:$0xf0] %vm446_vm4, %v1849_v11 }
0x2869   :  { %v2070_v12 = vld [vmem:[#allocation3 + $0x10] sm:$0xff] }
0x286a   :  { %4627 = vmatprep.mubr.msk.f32.mxu0 %vm234_vm3, %v2070_v12 }
0x286b   :  { %v2276_v14 = vpop.permute.xlu0 %2275 }
0x286c   :  { %v2278_v15 = vmul.f32 %v4976_v60, %v2276_v14 }
0x286e   :  { %2280 = vrot.lane.b32.xlu1 %v2278_v15, %s5217_s3 }
0x28d2   :  { %v2065_v17 = vpop.permute.xlu0 %2064 }
0x28d3   :  { %2067 = vst.msk [vmem:[#allocation3 + $0x18] sm:$0xf0] %vm446_vm4, %v2065_v17 }
0x28da   :  { %v2071_v63 = vld [vmem:[#allocation3 + $0x18] sm:$0xff] }
0x28db   :  { %4628 = vmatmul.mubr.msk.f32.gmra.mxu0 %vm234_vm3, %v2071_v63 }
0x28dc   :  { %4649 = vmatprep.mubr.msk.f32.mxu0 %vm5215_vm0, %v5214_v1 }
0x28e0   :  { %v2281_v18 = vpop.permute.xlu1 %2280 }
0x28e1   :  { %2283 = vst.msk [vmem:[#allocation2] sm:$0xf] %vm337_vm2, %v2281_v18  ;;  %4650 = vmatmul.mubr.msk.f32.vlgmr.msra.gmra.mxu0 %vm234_vm3, %v2281_v18 }
0x28e2   :  { %4664 = vmatpush3.msra.mxu0 %v5719_v32  ;;  %4671 = vmatprep.mubr.msk.f32.mxu0 %vm5215_vm0, %v5214_v1 }
0x28e3   :  { %4665 = vmatprep.subr.mxu0 %v5214_v1 }
0x28e4   :  { %4666 = vmatpush3.msra.mxu0 %v5723_v54 }
0x28e5   :  { %4667 = vmatprep.subr.mxu0 %v5214_v1 }
0x28e6   :  { %4668 = vmatpush3.msra.mxu0 %v5729_v28 }
0x28e7   :  { %4669 = vmatprep.subr.mxu0 %v5214_v1 }
0x28e8   :  { %4670 = vmatpush3.msra.mxu0 %v5734_v34 }
0x28e9   :  { %4685 = vmatprep.subr.mxu0 %v5214_v1 }
0x299b   :  { %v5801_v51 = vpop.f32.mrf.mxu0 }
0x299d   :  { %v5803_v26 = vpop.f32.mrf.mxu0 }
0x29a1   :  { %v2352_v20 = vpop.f32.mrf.mxu0 }
0x29a2   :  { %v2357_v21 = vrot.slane %v2352_v20, 4 }
0x29a3   :  { %v4651_v22 = vpop.f32.mrf.mxu0 }
0x29a4   :  { %v2359_v23 = vadd.f32 %v2357_v21, %v5769_v49 }
0x29a6   :  { %4981 = vtanh.f32 %v2359_v23  ;;  %v4183_v8 = vmul.f32 -1.442695, %v2359_v23  ;;  %v2176_v23 = vadd.f32 %v5766_v46, %v5803_v26 }
0x29a8   :  { %4983 = vpow2.f32 %v4183_v8 }
0x29b3   :  { %v4982_v24 = vpop.eup %4981 }
0x29b4   :  { %2372 = vrot.lane.b32.xlu0 %v4982_v24, %s5216_s14 }
0x29b5   :  { %v4984_v25 = vpop.eup %4983 }
0x29b6   :  { %v2363_v29 = vadd.f32 1.0, %v4984_v25 }
0x29b8   :  { %4985 = vrcp.f32 %v2363_v29 }
0x29c5   :  { %v4986_v30 = vpop.eup %4985 }
0x29c6   :  { %v2370_v13 = vmul.f32 %v4986_v30, %v2368_v33 }
0x2a26   :  { %v2373_v31 = vpop.permute.xlu0 %2372 }
0x2a27   :  { %v2375_v47 = vmul.f32 %v4986_v30, %v2373_v31 }
0x2a29   :  { %2377 = vrot.lane.b32.xlu1 %v2375_v47, %s5217_s3 }
0x2a9b   :  { %v2378_v36 = vpop.permute.xlu1 %2377 }
0x2a9c   :  { %v2380_v37 = vadd.f32 %v2378_v36, %v2370_v13 }
0x2a9e   :  { %4987 = vtanh.f32 %v2380_v37  ;;  %v2476_v5 = vrot.slane %v2380_v37, 4 }
0x2aab   :  { %v4988_v39 = vpop.eup %4987 }
0x2aac   :  { %2383 = vrot.lane.b32.xlu0 %v4988_v39, %s5216_s14 }
0x2b1e   :  { %v2384_v41 = vpop.permute.xlu0 %2383 }
0x2b1f   :  { %v5809_v43 = vmul.f32 %v4986_v30, %v2384_v41 }
0x2b21   :  { %v2392_v44 = vrot.slane %v5809_v43, 4 }
0x2b23   :  { %2393 = vrot.lane.b32.xlu1 %v2392_v44, %s5217_s3 }
0x2b95   :  { %v2394_v45 = vpop.permute.xlu1 %2393 }
0x2b96   :  { %4661 = vmatmul.mubr.msk.f32.vlgmr.msra.gmra.mxu1 %vm234_vm3, %v2394_v45 }
0x2b97   :  { %4675 = vmatpush3.msra.mxu1 %v5719_v32  ;;  %4682 = vmatprep.mubr.msk.f32.mxu1 %vm5215_vm0, %v5214_v1 }
0x2b98   :  { %4676 = vmatprep.subr.mxu1 %v5214_v1 }
0x2b99   :  { %4677 = vmatpush3.msra.mxu1 %v5723_v54 }
0x2b9a   :  { %4678 = vmatprep.subr.mxu1 %v5214_v1 }
0x2b9b   :  { %4679 = vmatpush3.msra.mxu1 %v5729_v28 }
0x2b9c   :  { %4680 = vmatprep.subr.mxu1 %v5214_v1 }
0x2b9d   :  { %4681 = vmatpush3.msra.mxu1 %v5734_v34 }
0x2b9e   :  { %4696 = vmatprep.subr.mxu1 %v5214_v1 }
0x2c56   :  { %v2463_v49 = vpop.f32.mrf.mxu1 }
0x2c57   :  { %v2467_v52 = vadd.f32 %v2463_v49, %v2171_v48 }
0x2c58   :  { %v4662_v53 = vpop.f32.mrf.mxu1 }
0x2c59   :  { %4989 = vtanh.f32 %v2467_v52  ;;  %v4185_v56 = vmul.f32 -1.442695, %v2467_v52 }
0x2c5b   :  { %4991 = vpow2.f32 %v4185_v56 }
0x2c66   :  { %v4990_v55 = vpop.eup %4989 }
0x2c67   :  { %2480 = vrot.lane.b32.xlu0 %v4990_v55, %s5216_s14 }
0x2c68   :  { %v4992_v38 = vpop.eup %4991 }
0x2c69   :  { %v2471_v16 = vadd.f32 1.0, %v4992_v38 }
0x2c6b   :  { %4993 = vrcp.f32 %v2471_v16 }
0x2c78   :  { %v4994_v57 = vpop.eup %4993 }
0x2c79   :  { %v2478_v35 = vmul.f32 %v4994_v57, %v2476_v5 }
0x2cd9   :  { %v2481_v58 = vpop.permute.xlu0 %2480 }
0x2cda   :  { %v2483_v40 = vmul.f32 %v4994_v57, %v2481_v58 }
0x2cdc   :  { %2485 = vrot.lane.b32.xlu1 %v2483_v40, %s5217_s3 }
0x2d4e   :  { %v2486_v27 = vpop.permute.xlu1 %2485 }
0x2d4f   :  { %v2488_v59 = vadd.f32 %v2486_v27, %v2478_v35 }
0x2d51   :  { %4995 = vtanh.f32 %v2488_v59  ;;  %v2584_v12 = vrot.slane %v2488_v59, 4 }
0x2d5e   :  { %v4996_v60 = vpop.eup %4995 }
0x2d5f   :  { %2491 = vrot.lane.b32.xlu0 %v4996_v60, %s5216_s14 }
0x2dd1   :  { %v2492_v42 = vpop.permute.xlu0 %2491 }
0x2dd2   :  { %v2494_v7 = vmul.f32 %v4994_v57, %v2492_v42 }
0x2dd4   :  { %2496 = vrot.lane.b32.xlu1 %v2494_v7, %s5217_s3 }
0x2e46   :  { %v2497_v61 = vpop.permute.xlu1 %2496 }
0x2e47   :  { %2499 = vst.msk [vmem:[#allocation2 + $0x8] sm:$0xf] %vm337_vm2, %v2497_v61  ;;  %4672 = vmatmul.mubr.msk.f32.vlgmr.msra.gmra.mxu0 %vm234_vm3, %v2497_v61  ;;  %v5887_v61 = vadd.f32 %v5801_v51, %v5766_v46 }
0x2e48   :  { %4686 = vmatpush3.msra.mxu0 %v5719_v32  ;;  %4693 = vmatprep.mubr.msk.f32.mxu0 %vm5215_vm0, %v5214_v1 }
0x2e49   :  { %4687 = vmatprep.subr.mxu0 %v5214_v1 }
0x2e4a   :  { %4688 = vmatpush3.msra.mxu0 %v5723_v54 }
0x2e4b   :  { %4689 = vmatprep.subr.mxu0 %v5214_v1 }
0x2e4c   :  { %4690 = vmatpush3.msra.mxu0 %v5729_v28 }
0x2e4d   :  { %4691 = vmatprep.subr.mxu0 %v5214_v1 }
0x2e4e   :  { %4692 = vmatpush3.msra.mxu0 %v5734_v34 }
0x2e4f   :  { %4707 = vmatprep.subr.mxu0 %v5214_v1 }
0x2f07   :  { %v2568_v62 = vpop.f32.mrf.mxu0 }
0x2f08   :  { %v2573_v50 = vrot.slane %v2568_v62, 4 }
0x2f09   :  { %v4673_v9 = vpop.f32.mrf.mxu0 }
0x2f0a   :  { %v2575_v0 = vadd.f32 %v2573_v50, %v2171_v48 }
0x2f0c   :  { %4997 = vtanh.f32 %v2575_v0  ;;  %v4187_v2 = vmul.f32 -1.442695, %v2575_v0 }
0x2f0e   :  { %4999 = vpow2.f32 %v4187_v2 }
0x2f19   :  { %v4998_v10 = vpop.eup %4997 }
0x2f1a   :  { %2588 = vrot.lane.b32.xlu0 %v4998_v10, %s5216_s14 }
0x2f1b   :  { %v5000_v3 = vpop.eup %4999 }
0x2f1c   :  { %v2579_v4 = vadd.f32 1.0, %v5000_v3 }
0x2f1e   :  { %5001 = vrcp.f32 %v2579_v4 }
0x2f2b   :  { %v5002_v19 = vpop.eup %5001 }
0x2f2c   :  { %v2586_v14 = vmul.f32 %v5002_v19, %v2584_v12 }
0x2f8c   :  { %v2589_v6 = vpop.permute.xlu0 %2588 }
0x2f8d   :  { %v2591_v11 = vmul.f32 %v5002_v19, %v2589_v6 }
0x2f8f   :  { %2593 = vrot.lane.b32.xlu1 %v2591_v11, %s5217_s3 }
0x3001   :  { %v2594_v15 = vpop.permute.xlu1 %2593 }
0x3002   :  { %v2596_v17 = vadd.f32 %v2594_v15, %v2586_v14  ;;  %v3047_v15 = vld [vmem:[#allocation10 + $0x18] sm:$0xff] }
0x3004   :  { %5003 = vtanh.f32 %v2596_v17  ;;  %v2692_v37 = vrot.slane %v2596_v17, 4  ;;  %v3046_v17 = vld [vmem:[#allocation10 + $0x10] sm:$0xff] }
0x3011   :  { %v5004_v63 = vpop.eup %5003 }
0x3012   :  { %2599 = vrot.lane.b32.xlu0 %v5004_v63, %s5216_s14  ;;  %v3045_v63 = vld [vmem:[#allocation10 + $0x8] sm:$0xff] }
0x3084   :  { %v2600_v18 = vpop.permute.xlu0 %2599 }
0x3085   :  { %v5845_v20 = vmul.f32 %v5002_v19, %v2600_v18  ;;  %v3044_v18 = vld [vmem:[#allocation10] sm:$0xff] }
0x3087   :  { %v2608_v21 = vrot.slane %v5845_v20, 4 }
0x3089   :  { %2609 = vrot.lane.b32.xlu1 %v2608_v21, %s5217_s3 }
0x30fb   :  { %v2610_v22 = vpop.permute.xlu1 %2609 }
0x30fc   :  { %4683 = vmatmul.mubr.msk.f32.vlgmr.msra.gmra.mxu1 %vm234_vm3, %v2610_v22 }
0x30fd   :  { %4697 = vmatpush3.msra.mxu1 %v5719_v32  ;;  %4704 = vmatprep.mubr.msk.f32.mxu1 %vm5215_vm0, %v5214_v1 }
0x30fe   :  { %4698 = vmatprep.subr.mxu1 %v5214_v1 }
0x30ff   :  { %4699 = vmatpush3.msra.mxu1 %v5723_v54 }
0x3100   :  { %4700 = vmatprep.subr.mxu1 %v5214_v1 }
0x3101   :  { %4701 = vmatpush3.msra.mxu1 %v5729_v28 }
0x3102   :  { %4702 = vmatprep.subr.mxu1 %v5214_v1 }
0x3103   :  { %4703 = vmatpush3.msra.mxu1 %v5734_v34 }
0x3104   :  { %4718 = vmatprep.subr.mxu1 %v3047_v15 }
0x31bc   :  { %v2679_v24 = vpop.f32.mrf.mxu1 }
0x31bd   :  { %v2683_v8 = vadd.f32 %v2679_v24, %v2176_v23  ;;  %v5904_v24 = vld [vmem:[#allocation12 + $0x18] sm:$0xff] }
0x31be   :  { %v4684_v25 = vpop.f32.mrf.mxu1 }
0x31bf   :  { %5005 = vtanh.f32 %v2683_v8  ;;  %v4189_v30 = vmul.f32 -1.442695, %v2683_v8  ;;  %v5908_v25 = vld [vmem:[#allocation12 + $0x10] sm:$0xff] }
0x31c1   :  { %5007 = vpow2.f32 %v4189_v30  ;;  %v5919_v30 = vld [vmem:[#allocation12] sm:$0xff] }
0x31cc   :  { %v5006_v29 = vpop.eup %5005 }
0x31cd   :  { %2696 = vrot.lane.b32.xlu0 %v5006_v29, %s5216_s14 }
0x31ce   :  { %v5008_v31 = vpop.eup %5007 }
0x31cf   :  { %v2687_v47 = vadd.f32 1.0, %v5008_v31 }
0x31d1   :  { %5009 = vrcp.f32 %v2687_v47 }
0x31de   :  { %v5010_v33 = vpop.eup %5009 }
0x31df   :  { %v2694_v39 = vmul.f32 %v5010_v33, %v2692_v37 }
0x323f   :  { %v2697_v13 = vpop.permute.xlu0 %2696 }
0x3240   :  { %v2699_v36 = vmul.f32 %v5010_v33, %v2697_v13 }
0x3242   :  { %2701 = vrot.lane.b32.xlu1 %v2699_v36, %s5217_s3 }
0x32b4   :  { %v2702_v26 = vpop.permute.xlu1 %2701 }
0x32b5   :  { %v2704_v41 = vadd.f32 %v2702_v26, %v2694_v39 }
0x32b7   :  { %5011 = vtanh.f32 %v2704_v41 }
0x32c4   :  { %v5012_v44 = vpop.eup %5011 }
0x32c5   :  { %2707 = vrot.lane.b32.xlu0 %v5012_v44, %s5216_s14 }
0x3337   :  { %v2708_v45 = vpop.permute.xlu0 %2707 }
0x3338   :  { %v2710_v48 = vmul.f32 %v5010_v33, %v2708_v45 }
0x333a   :  { %2712 = vrot.lane.b32.xlu1 %v2710_v48, %s5217_s3 }
0x33ac   :  { %v2713_v49 = vpop.permute.xlu1 %2712 }
0x33ad   :  { %2715 = vst.msk [vmem:[#allocation2 + $0x10] sm:$0xf] %vm337_vm2, %v2713_v49  ;;  %4694 = vmatmul.mubr.msk.f32.vlgmr.msra.gmra.mxu0 %vm234_vm3, %v2713_v49 }
0x33ae   :  { %4708 = vmatpush3.msra.mxu0 %v5719_v32  ;;  %4715 = vmatprep.mubr.msk.f32.mxu0 %vm5215_vm0, %v5214_v1 }
0x33af   :  { %4709 = vmatprep.subr.mxu0 %v5214_v1 }
0x33b0   :  { %4710 = vmatpush3.msra.mxu0 %v5723_v54 }
0x33b1   :  { %4711 = vmatprep.subr.mxu0 %v5214_v1 }
0x33b2   :  { %4712 = vmatpush3.msra.mxu0 %v5729_v28 }
0x33b3   :  { %4713 = vmatprep.subr.mxu0 %v5214_v1 }
0x33b4   :  { %4714 = vmatpush3.msra.mxu0 %v5734_v34  ;;  %v2800_v34 = vrot.slane %v2704_v41, 4  ;;  %v5951_v41 = vld [vmem:[%s6127_s12] ss:$0 sm:$0xff] }
0x33b5   :  { %4732 = vmatprep.subr.mxu0 %v5214_v1 }
0x346d   :  { %v2784_v52 = vpop.f32.mrf.mxu0 }
0x346e   :  { %v2789_v53 = vrot.slane %v2784_v52, 4 }
0x346f   :  { %v4695_v32 = vpop.f32.mrf.mxu0 }
0x3470   :  { %v2791_v55 = vadd.f32 %v2789_v53, %v2176_v23 }
0x3472   :  { %5013 = vtanh.f32 %v2791_v55  ;;  %v4191_v38 = vmul.f32 -1.442695, %v2791_v55 }
0x3474   :  { %5015 = vpow2.f32 %v4191_v38 }
0x347f   :  { %v5014_v56 = vpop.eup %5013 }
0x3480   :  { %2804 = vrot.lane.b32.xlu0 %v5014_v56, %s5216_s14 }
0x3481   :  { %v5016_v54 = vpop.eup %5015 }
0x3482   :  { %v2795_v16 = vadd.f32 1.0, %v5016_v54 }
0x3484   :  { %5017 = vrcp.f32 %v2795_v16 }
0x3491   :  { %v5018_v28 = vpop.eup %5017 }
0x3492   :  { %v2802_v40 = vmul.f32 %v5018_v28, %v2800_v34 }
0x34f2   :  { %v2805_v57 = vpop.permute.xlu0 %2804 }
0x34f3   :  { %v2807_v58 = vmul.f32 %v5018_v28, %v2805_v57 }
0x34f5   :  { %2809 = vrot.lane.b32.xlu1 %v2807_v58, %s5217_s3 }
0x3567   :  { %v2810_v5 = vpop.permute.xlu1 %2809 }
0x3568   :  { %v2812_v35 = vadd.f32 %v2810_v5, %v2802_v40 }
0x356a   :  { %5019 = vtanh.f32 %v2812_v35  ;;  %v2908_v46 = vrot.slane %v2812_v35, 4 }
0x3577   :  { %v5020_v27 = vpop.eup %5019 }
0x3578   :  { %2815 = vrot.lane.b32.xlu0 %v5020_v27, %s5216_s14 }
0x35ea   :  { %v2816_v59 = vpop.permute.xlu0 %2815 }
0x35eb   :  { %v5880_v60 = vmul.f32 %v5018_v28, %v2816_v59 }
0x35ed   :  { %v2824_v42 = vrot.slane %v5880_v60, 4 }
0x35ef   :  { %2825 = vrot.lane.b32.xlu1 %v2824_v42, %s5217_s3 }
0x3661   :  { %v2826_v7 = vpop.permute.xlu1 %2825 }
0x3662   :  { %4705 = vmatmul.mubr.msk.f32.vlgmr.msra.gmra.mxu1 %vm234_vm3, %v2826_v7 }
0x3663   :  { %4719 = vmatpush3.msra.mxu1 %v3047_v15 }
0x3664   :  { %4720 = vmatprep.subr.mxu1 %v3046_v17 }
0x3665   :  { %4721 = vmatpush3.msra.mxu1 %v3046_v17 }
0x3666   :  { %4722 = vmatprep.subr.mxu1 %v3045_v63 }
0x3667   :  { %4723 = vmatpush3.msra.mxu1 %v3045_v63 }
0x3668   :  { %4724 = vmatprep.subr.mxu1 %v3044_v18 }
0x3669   :  { %4725 = vmatpush3.msra.mxu1 %v3044_v18 }
0x366a   :  { %4743 = vmatprep.subr.mxu1 %v5214_v1 }
0x3722   :  { %v2895_v62 = vpop.f32.mrf.mxu1 }
0x3723   :  { %v2899_v50 = vadd.f32 %v2895_v62, %v5887_v61 }
0x3724   :  { %v4706_v9 = vpop.f32.mrf.mxu1 }
0x3725   :  { %5021 = vtanh.f32 %v2899_v50  ;;  %v4193_v10 = vmul.f32 -1.442695, %v2899_v50 }
0x3727   :  { %5023 = vpow2.f32 %v4193_v10 }
0x3732   :  { %v5022_v0 = vpop.eup %5021 }
0x3733   :  { %2912 = vrot.lane.b32.xlu0 %v5022_v0, %s5216_s14 }
0x3734   :  { %v5024_v2 = vpop.eup %5023 }
0x3735   :  { %v2903_v3 = vadd.f32 1.0, %v5024_v2 }
0x3737   :  { %5025 = vrcp.f32 %v2903_v3 }
0x3744   :  { %v5026_v4 = vpop.eup %5025 }
0x3745   :  { %v2910_v51 = vmul.f32 %v5026_v4, %v2908_v46 }
0x37a5   :  { %v2913_v19 = vpop.permute.xlu0 %2912 }
0x37a6   :  { %v2915_v6 = vmul.f32 %v5026_v4, %v2913_v19 }
0x37a8   :  { %2917 = vrot.lane.b32.xlu1 %v2915_v6, %s5217_s3 }
0x381a   :  { %v2918_v11 = vpop.permute.xlu1 %2917 }
0x381b   :  { %v5892_v12 = vadd.f32 %v2918_v11, %v2910_v51 }
0x381d   :  { %5027 = vtanh.f32 %v5892_v12  ;;  %v3016_v5 = vrot.slane %v5892_v12, 4 }
0x382a   :  { %v5028_v14 = vpop.eup %5027 }
0x382b   :  { %2923 = vrot.lane.b32.xlu0 %v5028_v14, %s5216_s14 }
0x382f   :  { %2388 = vrot.lane.b32.xlu0 %v5809_v43, %s5217_s3 }
0x389d   :  { %v2924_v21 = vpop.permute.xlu0 %2923 }
0x389e   :  { %v2926_v22 = vmul.f32 %v5026_v4, %v2924_v21 }
0x38a0   :  { %2928 = vrot.lane.b32.xlu1 %v2926_v22, %s5217_s3 }
0x38a1   :  { %v2389_v23 = vpop.permute.xlu0 %2388 }
0x38a2   :  { %2391 = vst.msk [vmem:[#allocation2] sm:$0xf0] %vm446_vm4, %v2389_v23 }
0x38a4   :  { %2604 = vrot.lane.b32.xlu1 %v5845_v20, %s5217_s3  ;;  %v5914_v20 = vld [vmem:[#allocation12 + $0x8] sm:$0xff] }
0x38a9   :  { %v3040_v43 = vld [vmem:[#allocation2] sm:$0xff] }
0x38aa   :  { %4726 = vmatprep.mubr.msk.f32.mxu1 %vm234_vm3, %v3040_v43 }
0x3912   :  { %v2929_v8 = vpop.permute.xlu1 %2928 }
0x3913   :  { %2931 = vst.msk [vmem:[#allocation2 + $0x18] sm:$0xf] %vm337_vm2, %v2929_v8  ;;  %4716 = vmatmul.mubr.msk.f32.vlgmr.msra.gmra.mxu0 %vm234_vm3, %v2929_v8 }
0x3914   :  { %4733 = vmatpush3.msra.mxu0 %v5904_v24  ;;  %4740 = vmatprep.mubr.msk.f32.mxu0 %vm5215_vm0, %v5214_v1 }
0x3915   :  { %4734 = vmatprep.subr.mxu0 %v5214_v1 }
0x3916   :  { %v2605_v29 = vpop.permute.xlu1 %2604  ;;  %4735 = vmatpush3.msra.mxu0 %v5908_v25 }
0x3917   :  { %2607 = vst.msk [vmem:[#allocation2 + $0x8] sm:$0xf0] %vm446_vm4, %v2605_v29  ;;  %4736 = vmatprep.subr.mxu0 %v5214_v1 }
0x3918   :  { %4737 = vmatpush3.msra.mxu0 %v5914_v20 }
0x3919   :  { %4738 = vmatprep.subr.mxu0 %v5214_v1 }
0x391a   :  { %4739 = vmatpush3.msra.mxu0 %v5919_v30 }
0x391b   :  { %4741 = vmatmul.mubr.f32.vlgmr.msra.gmra.mxu0 %v5214_v1  ;;  %4754 = vmatprep.subr.mxu0 %v5214_v1 }
0x391c   :  { %4755 = vmatpush3.msra.mxu0 %v5904_v24  ;;  %4762 = vmatprep.mubr.msk.f32.mxu0 %vm5215_vm0, %v5214_v1 }
0x391d   :  { %4756 = vmatprep.subr.mxu0 %v5214_v1 }
0x391e   :  { %v3041_v31 = vld [vmem:[#allocation2 + $0x8] sm:$0xff]  ;;  %4757 = vmatpush3.msra.mxu0 %v5908_v25 }
0x391f   :  { %4727 = vmatmul.mubr.msk.f32.vlgmr.msra.gmra.mxu1 %vm234_vm3, %v3041_v31  ;;  %4758 = vmatprep.subr.mxu0 %v5214_v1 }
0x3920   :  { %4744 = vmatpush3.msra.mxu1 %v5904_v24  ;;  %4759 = vmatpush3.msra.mxu0 %v5914_v20 }
0x3921   :  { %4745 = vmatprep.subr.mxu1 %v5214_v1  ;;  %4760 = vmatprep.subr.mxu0 %v5214_v1 }
0x3922   :  { %4746 = vmatpush3.msra.mxu1 %v5908_v25  ;;  %4761 = vmatpush3.msra.mxu0 %v5919_v30 }
0x3923   :  { %4747 = vmatprep.subr.mxu1 %v5214_v1  ;;  %4776 = vmatprep.subr.mxu0 %v5214_v1 }
0x3924   :  { %4748 = vmatpush3.msra.mxu1 %v5914_v20 }
0x3925   :  { %4749 = vmatprep.subr.mxu1 %v5214_v1 }
0x3926   :  { %4750 = vmatpush3.msra.mxu1 %v5919_v30 }
0x3927   :  { %4765 = vmatprep.subr.mxu1 %v5214_v1 }
0x39d3   :  { %v3000_v47 = vpop.f32.mrf.mxu0 }
0x39d4   :  { %v3005_v33 = vrot.slane %v3000_v47, 4 }
0x39d5   :  { %v4717_v13 = vpop.f32.mrf.mxu0 }
0x39d6   :  { %v3007_v36 = vadd.f32 %v3005_v33, %v5887_v61 }
0x39d8   :  { %5029 = vtanh.f32 %v3007_v36  ;;  %v4195_v53 = vmul.f32 -1.442695, %v3007_v36 }
0x39db   :  { %v3222_v37 = vpop.f32.mrf.mxu0 }
0x39dd   :  { %v4742_v39 = vpop.f32.mrf.mxu0 }
0x39df   :  { %v5946_v26 = vpop.f32.mrf.mxu1 }
0x39e1   :  { %v3137_v44 = vpop.f32.mrf.mxu1 }
0x39e2   :  { %v5954_v45 = vadd.f32 %v5951_v41, %v3137_v44  ;;  %v3143_v44 = vadd.f32 %v5946_v26, %v5951_v41 }
0x39e4   :  { %v3226_v48 = vadd.f32 %v3222_v37, %v5954_v45 }
0x39e5   :  { %v5030_v49 = vpop.eup %5029 }
0x39e6   :  { %5031 = vtanh.f32 %v3226_v48  ;;  %3020 = vrot.lane.b32.xlu0 %v5030_v49, %s5216_s14  ;;  %v4201_v32 = vmul.f32 -1.442695, %v3226_v48 }
0x39e7   :  { %5033 = vpow2.f32 %v4195_v53 }
0x39e8   :  { %5035 = vpow2.f32 %v4201_v32 }
0x39f3   :  { %v5032_v52 = vpop.eup %5031 }
0x39f4   :  { %3236 = vrot.lane.b32.xlu1 %v5032_v52, %s5216_s14  ;;  %v5034_v55 = vpop.eup %5033 }
0x39f5   :  { %v3011_v56 = vadd.f32 1.0, %v5034_v55  ;;  %v5036_v38 = vpop.eup %5035 }
0x39f6   :  { %v3230_v54 = vadd.f32 1.0, %v5036_v38 }
0x39f7   :  { %5037 = vrcp.f32 %v3011_v56 }
0x39f8   :  { %5039 = vrcp.f32 %v3230_v54 }
0x3a04   :  { %v5038_v16 = vpop.eup %5037 }
0x3a05   :  { %v5040_v58 = vpop.eup %5039  ;;  %v3018_v35 = vmul.f32 %v5038_v16, %v3016_v5 }
0x3a06   :  { %v3234_v42 = vmul.f32 0.0, %v5040_v58 }
0x3a58   :  { %v3021_v28 = vpop.permute.xlu0 %3020 }
0x3a59   :  { %v3023_v57 = vmul.f32 %v5038_v16, %v3021_v28 }
0x3a5b   :  { %3025 = vrot.lane.b32.xlu0 %v3023_v57, %s5217_s3 }
0x3a66   :  { %v3237_v34 = vpop.permute.xlu1 %3236 }
0x3a67   :  { %v3239_v40 = vmul.f32 %v5040_v58, %v3237_v34 }
0x3a69   :  { %3241 = vrot.lane.b32.xlu1 %v3239_v40, %s5217_s3 }
0x3acd   :  { %v3026_v27 = vpop.permute.xlu0 %3025 }
0x3ace   :  { %v3028_v59 = vadd.f32 %v3026_v27, %v3018_v35 }
0x3ad0   :  { %5041 = vtanh.f32 %v3028_v59 }
0x3adb   :  { %v3242_v7 = vpop.permute.xlu1 %3241 }
0x3adc   :  { %v3244_v61 = vadd.f32 %v3242_v7, %v3234_v42 }
0x3add   :  { %v5042_v62 = vpop.eup %5041 }
0x3ade   :  { %5043 = vtanh.f32 %v3244_v61  ;;  %3031 = vrot.lane.b32.xlu0 %v5042_v62, %s5216_s14  ;;  %v3340_v8 = vrot.slane %v3244_v61, 4 }
0x3ae2   :  { %2820 = vrot.lane.b32.xlu0 %v5880_v60, %s5217_s3 }
0x3aeb   :  { %v5044_v50 = vpop.eup %5043 }
0x3aec   :  { %3247 = vrot.lane.b32.xlu1 %v5044_v50, %s5216_s14 }
0x3b50   :  { %v3032_v9 = vpop.permute.xlu0 %3031 }
0x3b51   :  { %v3034_v0 = vmul.f32 %v5038_v16, %v3032_v9 }
0x3b53   :  { %3036 = vrot.lane.b32.xlu1 %v3034_v0, %s5217_s3 }
0x3b54   :  { %v2821_v10 = vpop.permute.xlu0 %2820 }
0x3b55   :  { %2823 = vst.msk [vmem:[#allocation2 + $0x10] sm:$0xf0] %vm446_vm4, %v2821_v10 }
0x3b5c   :  { %v3042_v2 = vld [vmem:[#allocation2 + $0x10] sm:$0xff] }
0x3b5d   :  { %4729 = vmatprep.mubr.msk.f32.mxu1 %vm234_vm3, %v3042_v2 }
0x3b5e   :  { %v3248_v3 = vpop.permute.xlu1 %3247 }
0x3b5f   :  { %v3250_v4 = vmul.f32 %v5040_v58, %v3248_v3 }
0x3b61   :  { %3252 = vrot.lane.b32.xlu0 %v3250_v4, %s5217_s3 }
0x3bc5   :  { %v3037_v19 = vpop.permute.xlu1 %3036 }
0x3bc6   :  { %3039 = vst.msk [vmem:[#allocation2 + $0x18] sm:$0xf0] %vm446_vm4, %v3037_v19 }
0x3bcd   :  { %v3043_v60 = vld [vmem:[#allocation2 + $0x18] sm:$0xff] }
0x3bce   :  { %4730 = vmatmul.mubr.msk.f32.gmra.mxu1 %vm234_vm3, %v3043_v60 }
0x3bcf   :  { %4751 = vmatprep.mubr.msk.f32.mxu1 %vm5215_vm0, %v5214_v1 }
0x3bd3   :  { %v3253_v6 = vpop.permute.xlu0 %3252 }
0x3bd4   :  { %3255 = vst.msk [vmem:[#allocation3] sm:$0xf] %vm337_vm2, %v3253_v6  ;;  %4752 = vmatmul.mubr.msk.f32.vlgmr.msra.gmra.mxu1 %vm234_vm3, %v3253_v6 }
0x3bd5   :  { %4766 = vmatpush3.msra.mxu1 %v5904_v24  ;;  %4773 = vmatprep.mubr.msk.f32.mxu1 %vm5215_vm0, %v5214_v1 }
0x3bd6   :  { %4767 = vmatprep.subr.mxu1 %v5214_v1 }
0x3bd7   :  { %4768 = vmatpush3.msra.mxu1 %v5908_v25 }
0x3bd8   :  { %4769 = vmatprep.subr.mxu1 %v5214_v1 }
0x3bd9   :  { %4770 = vmatpush3.msra.mxu1 %v5914_v20 }
0x3bda   :  { %4771 = vmatprep.subr.mxu1 %v5214_v1 }
0x3bdb   :  { %4772 = vmatpush3.msra.mxu1 %v5919_v30 }
0x3bdc   :  { %4787 = vmatprep.subr.mxu1 %v5214_v1 }
0x3c8e   :  { %v5986_v46 = vpop.f32.mrf.mxu1 }
0x3c90   :  { %v5988_v51 = vpop.f32.mrf.mxu1 }
0x3c94   :  { %v3324_v11 = vpop.f32.mrf.mxu1 }
0x3c95   :  { %v3329_v12 = vrot.slane %v3324_v11, 4 }
0x3c96   :  { %v4753_v14 = vpop.f32.mrf.mxu1 }
0x3c97   :  { %v3331_v15 = vadd.f32 %v3329_v12, %v5954_v45 }
0x3c99   :  { %5045 = vtanh.f32 %v3331_v15  ;;  %v4203_v63 = vmul.f32 -1.442695, %v3331_v15  ;;  %v3148_v15 = vadd.f32 %v5951_v41, %v5988_v51 }
0x3c9b   :  { %5047 = vpow2.f32 %v4203_v63 }
0x3ca6   :  { %v5046_v17 = vpop.eup %5045 }
0x3ca7   :  { %3344 = vrot.lane.b32.xlu1 %v5046_v17, %s5216_s14 }
0x3ca8   :  { %v5048_v18 = vpop.eup %5047 }
0x3ca9   :  { %v3335_v21 = vadd.f32 1.0, %v5048_v18 }
0x3cab   :  { %5049 = vrcp.f32 %v3335_v21 }
0x3cb8   :  { %v5050_v22 = vpop.eup %5049 }
0x3cb9   :  { %v3342_v29 = vmul.f32 %v5050_v22, %v3340_v8 }
0x3d19   :  { %v3345_v23 = vpop.permute.xlu1 %3344 }
0x3d1a   :  { %v3347_v43 = vmul.f32 %v5050_v22, %v3345_v23 }
0x3d1c   :  { %3349 = vrot.lane.b32.xlu0 %v3347_v43, %s5217_s3 }
0x3d8e   :  { %v3350_v31 = vpop.permute.xlu0 %3349 }
0x3d8f   :  { %v3352_v47 = vadd.f32 %v3350_v31, %v3342_v29 }
0x3d91   :  { %5051 = vtanh.f32 %v3352_v47  ;;  %v3448_v16 = vrot.slane %v3352_v47, 4 }
0x3d9e   :  { %v5052_v33 = vpop.eup %5051 }
0x3d9f   :  { %3355 = vrot.lane.b32.xlu1 %v5052_v33, %s5216_s14 }
0x3e11   :  { %v3356_v13 = vpop.permute.xlu1 %3355 }
0x3e12   :  { %v5994_v36 = vmul.f32 %v5050_v22, %v3356_v13 }
0x3e14   :  { %v3364_v37 = vrot.slane %v5994_v36, 4 }
0x3e16   :  { %3365 = vrot.lane.b32.xlu0 %v3364_v37, %s5217_s3 }
0x3e88   :  { %v3366_v39 = vpop.permute.xlu0 %3365 }
0x3e89   :  { %4763 = vmatmul.mubr.msk.f32.vlgmr.msra.gmra.mxu0 %vm234_vm3, %v3366_v39 }
0x3e8a   :  { %4777 = vmatpush3.msra.mxu0 %v5904_v24  ;;  %4784 = vmatprep.mubr.msk.f32.mxu0 %vm5215_vm0, %v5214_v1 }
0x3e8b   :  { %4778 = vmatprep.subr.mxu0 %v5214_v1 }
0x3e8c   :  { %4779 = vmatpush3.msra.mxu0 %v5908_v25 }
0x3e8d   :  { %4780 = vmatprep.subr.mxu0 %v5214_v1 }
0x3e8e   :  { %4781 = vmatpush3.msra.mxu0 %v5914_v20 }
0x3e8f   :  { %4782 = vmatprep.subr.mxu0 %v5214_v1 }
0x3e90   :  { %4783 = vmatpush3.msra.mxu0 %v5919_v30 }
0x3e91   :  { %4798 = vmatprep.subr.mxu0 %v5214_v1 }
0x3f49   :  { %v3435_v45 = vpop.f32.mrf.mxu0 }
0x3f4a   :  { %v3439_v48 = vadd.f32 %v3435_v45, %v3143_v44 }
0x3f4b   :  { %v4764_v49 = vpop.f32.mrf.mxu0 }
0x3f4c   :  { %5053 = vtanh.f32 %v3439_v48  ;;  %v4205_v53 = vmul.f32 -1.442695, %v3439_v48 }
0x3f4e   :  { %5055 = vpow2.f32 %v4205_v53 }
0x3f59   :  { %v5054_v52 = vpop.eup %5053 }
0x3f5a   :  { %3452 = vrot.lane.b32.xlu1 %v5054_v52, %s5216_s14 }
0x3f5b   :  { %v5056_v32 = vpop.eup %5055 }
0x3f5c   :  { %v3443_v55 = vadd.f32 1.0, %v5056_v32 }
0x3f5e   :  { %5057 = vrcp.f32 %v3443_v55 }
0x3f6b   :  { %v5058_v56 = vpop.eup %5057 }
0x3f6c   :  { %v3450_v28 = vmul.f32 %v5058_v56, %v3448_v16 }
0x3fcc   :  { %v3453_v38 = vpop.permute.xlu1 %3452 }
0x3fcd   :  { %v3455_v54 = vmul.f32 %v5058_v56, %v3453_v38 }
0x3fcf   :  { %3457 = vrot.lane.b32.xlu0 %v3455_v54, %s5217_s3 }
0x4041   :  { %v3458_v26 = vpop.permute.xlu0 %3457 }
0x4042   :  { %v3460_v57 = vadd.f32 %v3458_v26, %v3450_v28 }
0x4044   :  { %5059 = vtanh.f32 %v3460_v57  ;;  %v3556_v2 = vrot.slane %v3460_v57, 4 }
0x4051   :  { %v5060_v58 = vpop.eup %5059 }
0x4052   :  { %3463 = vrot.lane.b32.xlu1 %v5060_v58, %s5216_s14 }
0x40c4   :  { %v3464_v34 = vpop.permute.xlu1 %3463 }
0x40c5   :  { %v3466_v40 = vmul.f32 %v5058_v56, %v3464_v34 }
0x40c7   :  { %3468 = vrot.lane.b32.xlu0 %v3466_v40, %s5217_s3  ;;  %v3153_v40 = vadd.f32 %v5986_v46, %v5951_v41 }
0x4139   :  { %v3469_v5 = vpop.permute.xlu0 %3468 }
0x413a   :  { %3471 = vst.msk [vmem:[#allocation3 + $0x8] sm:$0xf] %vm337_vm2, %v3469_v5  ;;  %4774 = vmatmul.mubr.msk.f32.vlgmr.msra.gmra.mxu1 %vm234_vm3, %v3469_v5 }
0x413b   :  { %4788 = vmatpush3.msra.mxu1 %v5904_v24  ;;  %4795 = vmatprep.mubr.msk.f32.mxu1 %vm5215_vm0, %v5214_v1 }
0x413c   :  { %4789 = vmatprep.subr.mxu1 %v5214_v1 }
0x413d   :  { %4790 = vmatpush3.msra.mxu1 %v5908_v25 }
0x413e   :  { %4791 = vmatprep.subr.mxu1 %v5214_v1 }
0x413f   :  { %4792 = vmatpush3.msra.mxu1 %v5914_v20 }
0x4140   :  { %4793 = vmatprep.subr.mxu1 %v5214_v1 }
0x4141   :  { %4794 = vmatpush3.msra.mxu1 %v5919_v30 }
0x4142   :  { %4809 = vmatprep.subr.mxu1 %v5214_v1 }
0x41fa   :  { %v3540_v35 = vpop.f32.mrf.mxu1 }
0x41fb   :  { %v3545_v27 = vrot.slane %v3540_v35, 4 }
0x41fc   :  { %v4775_v59 = vpop.f32.mrf.mxu1 }
0x41fd   :  { %v3547_v42 = vadd.f32 %v3545_v27, %v3143_v44 }
0x41ff   :  { %5061 = vtanh.f32 %v3547_v42  ;;  %v4207_v61 = vmul.f32 -1.442695, %v3547_v42 }
0x4201   :  { %5063 = vpow2.f32 %v4207_v61 }
0x420c   :  { %v5062_v7 = vpop.eup %5061 }
0x420d   :  { %3560 = vrot.lane.b32.xlu1 %v5062_v7, %s5216_s14 }
0x420e   :  { %v5064_v62 = vpop.eup %5063 }
0x420f   :  { %v3551_v50 = vadd.f32 1.0, %v5064_v62 }
0x4211   :  { %5065 = vrcp.f32 %v3551_v50 }
0x421e   :  { %v5066_v9 = vpop.eup %5065 }
0x421f   :  { %v3558_v3 = vmul.f32 %v5066_v9, %v3556_v2 }
0x427f   :  { %v3561_v0 = vpop.permute.xlu1 %3560 }
0x4280   :  { %v3563_v10 = vmul.f32 %v5066_v9, %v3561_v0 }
0x4282   :  { %3565 = vrot.lane.b32.xlu0 %v3563_v10, %s5217_s3 }
0x42f4   :  { %v3566_v4 = vpop.permute.xlu0 %3565 }
0x42f5   :  { %v3568_v19 = vadd.f32 %v3566_v4, %v3558_v3 }
0x42f7   :  { %5067 = vtanh.f32 %v3568_v19  ;;  %v3664_v47 = vrot.slane %v3568_v19, 4 }
0x4304   :  { %v5068_v60 = vpop.eup %5067 }
0x4305   :  { %3571 = vrot.lane.b32.xlu1 %v5068_v60, %s5216_s14 }
0x4377   :  { %v3572_v6 = vpop.permute.xlu1 %3571 }
0x4378   :  { %v6030_v11 = vmul.f32 %v5066_v9, %v3572_v6 }
0x437a   :  { %v3580_v12 = vrot.slane %v6030_v11, 4 }
0x437c   :  { %3581 = vrot.lane.b32.xlu0 %v3580_v12, %s5217_s3 }
0x43ee   :  { %v3582_v14 = vpop.permute.xlu0 %3581 }
0x43ef   :  { %4785 = vmatmul.mubr.msk.f32.vlgmr.msra.gmra.mxu0 %vm234_vm3, %v3582_v14 }
0x43f0   :  { %4799 = vmatpush3.msra.mxu0 %v5904_v24  ;;  %4806 = vmatprep.mubr.msk.f32.mxu0 %vm5215_vm0, %v5214_v1 }
0x43f1   :  { %4800 = vmatprep.subr.mxu0 %v5214_v1 }
0x43f2   :  { %4801 = vmatpush3.msra.mxu0 %v5908_v25 }
0x43f3   :  { %4802 = vmatprep.subr.mxu0 %v5214_v1 }
0x43f4   :  { %4803 = vmatpush3.msra.mxu0 %v5914_v20 }
0x43f5   :  { %4804 = vmatprep.subr.mxu0 %v5214_v1 }
0x43f6   :  { %4805 = vmatpush3.msra.mxu0 %v5919_v30 }
0x44af   :  { %v3651_v17 = vpop.f32.mrf.mxu0 }
0x44b0   :  { %v3655_v63 = vadd.f32 %v3651_v17, %v3148_v15 }
0x44b1   :  { %v4786_v18 = vpop.f32.mrf.mxu0 }
0x44b2   :  { %5069 = vtanh.f32 %v3655_v63  ;;  %v4209_v22 = vmul.f32 -1.442695, %v3655_v63 }
0x44b4   :  { %5071 = vpow2.f32 %v4209_v22 }
0x44bf   :  { %v5070_v21 = vpop.eup %5069 }
0x44c0   :  { %3668 = vrot.lane.b32.xlu1 %v5070_v21, %s5216_s14 }
0x44c1   :  { %v5072_v23 = vpop.eup %5071 }
0x44c2   :  { %v3659_v43 = vadd.f32 1.0, %v5072_v23 }
0x44c4   :  { %5073 = vrcp.f32 %v3659_v43 }
0x44d1   :  { %v5074_v8 = vpop.eup %5073 }
0x44d2   :  { %v3666_v33 = vmul.f32 %v5074_v8, %v3664_v47 }
0x4532   :  { %v3669_v29 = vpop.permute.xlu1 %3668 }
0x4533   :  { %v3671_v31 = vmul.f32 %v5074_v8, %v3669_v29 }
0x4535   :  { %3673 = vrot.lane.b32.xlu0 %v3671_v31, %s5217_s3 }
0x45a7   :  { %v3674_v51 = vpop.permute.xlu0 %3673 }
0x45a8   :  { %v3676_v13 = vadd.f32 %v3674_v51, %v3666_v33  ;;  %v4019_v33 = vld [vmem:[%s6128_s13 + $0x18] sm:$0xff] }
0x45a9   :  { %4820 = vmatprep.subr.mxu0 %v4019_v33 }
0x45aa   :  { %5075 = vtanh.f32 %v3676_v13 }
0x45b7   :  { %v5076_v37 = vpop.eup %5075 }
0x45b8   :  { %3679 = vrot.lane.b32.xlu1 %v5076_v37, %s5216_s14  ;;  %v4016_v37 = vld [vmem:[%s6128_s13] sm:$0xff] }
0x462a   :  { %v3680_v39 = vpop.permute.xlu1 %3679 }
0x462b   :  { %v3682_v44 = vmul.f32 %v5074_v8, %v3680_v39 }
0x462d   :  { %3684 = vrot.lane.b32.xlu0 %v3682_v44, %s5217_s3 }
0x469f   :  { %v3685_v45 = vpop.permute.xlu0 %3684 }
0x46a0   :  { %3687 = vst.msk [vmem:[#allocation3 + $0x10] sm:$0xf] %vm337_vm2, %v3685_v45  ;;  %4796 = vmatmul.mubr.msk.f32.vlgmr.msra.gmra.mxu1 %vm234_vm3, %v3685_v45 }
0x46a1   :  { %4810 = vmatpush3.msra.mxu1 %v5904_v24  ;;  %4817 = vmatprep.mubr.msk.f32.mxu1 %vm5215_vm0, %v5214_v1 }
0x46a2   :  { %4811 = vmatprep.subr.mxu1 %v5214_v1 }
0x46a3   :  { %4812 = vmatpush3.msra.mxu1 %v5908_v25 }
0x46a4   :  { %4813 = vmatprep.subr.mxu1 %v5214_v1 }
0x46a5   :  { %4814 = vmatpush3.msra.mxu1 %v5914_v20 }
0x46a6   :  { %4815 = vmatprep.subr.mxu1 %v5214_v1  ;;  %v3772_v1 = vrot.slane %v3676_v13, 4  ;;  %v4017_v13 = vld [vmem:[%s6128_s13 + $0x8] sm:$0xff] }
0x46a7   :  { %4816 = vmatpush3.msra.mxu1 %v5919_v30 }
0x4760   :  { %v3756_v48 = vpop.f32.mrf.mxu1 }
0x4761   :  { %v3761_v49 = vrot.slane %v3756_v48, 4 }
0x4762   :  { %v4797_v52 = vpop.f32.mrf.mxu1 }
0x4763   :  { %v3763_v53 = vadd.f32 %v3761_v49, %v3148_v15 }
0x4765   :  { %5077 = vtanh.f32 %v3763_v53  ;;  %v4211_v32 = vmul.f32 -1.442695, %v3763_v53 }
0x4767   :  { %5079 = vpow2.f32 %v4211_v32 }
0x4772   :  { %v5078_v24 = vpop.eup %5077 }
0x4773   :  { %3776 = vrot.lane.b32.xlu1 %v5078_v24, %s5216_s14 }
0x4774   :  { %v5080_v55 = vpop.eup %5079 }
0x4775   :  { %v3767_v25 = vadd.f32 1.0, %v5080_v55 }
0x4777   :  { %5081 = vrcp.f32 %v3767_v25 }
0x4784   :  { %v5082_v56 = vpop.eup %5081 }
0x4785   :  { %v3774_v30 = vmul.f32 %v5082_v56, %v3772_v1 }
0x47e5   :  { %v3777_v38 = vpop.permute.xlu1 %3776 }
0x47e6   :  { %v3779_v20 = vmul.f32 %v5082_v56, %v3777_v38 }
0x47e8   :  { %3781 = vrot.lane.b32.xlu0 %v3779_v20, %s5217_s3 }
0x485a   :  { %v3782_v54 = vpop.permute.xlu0 %3781 }
0x485b   :  { %v3784_v16 = vadd.f32 %v3782_v54, %v3774_v30 }
0x485d   :  { %5083 = vtanh.f32 %v3784_v16  ;;  %v3880_v0 = vrot.slane %v3784_v16, 4 }
0x486a   :  { %v5084_v28 = vpop.eup %5083 }
0x486b   :  { %3787 = vrot.lane.b32.xlu1 %v5084_v28, %s5216_s14 }
0x48dd   :  { %v3788_v26 = vpop.permute.xlu1 %3787 }
0x48de   :  { %v3790_v57 = vmul.f32 %v5082_v56, %v3788_v26 }
0x48e0   :  { %v3796_v58 = vrot.slane %v3790_v57, 4 }
0x48e2   :  { %3797 = vrot.lane.b32.xlu0 %v3796_v58, %s5217_s3 }
0x4954   :  { %v3798_v34 = vpop.permute.xlu0 %3797 }
0x4955   :  { %4807 = vmatmul.mubr.msk.f32.vlgmr.msra.gmra.mxu0 %vm234_vm3, %v3798_v34 }
0x4956   :  { %4821 = vmatpush3.msra.mxu0 %v4019_v33 }
0x4a15   :  { %v3867_v5 = vpop.f32.mrf.mxu0 }
0x4a16   :  { %v3871_v35 = vadd.f32 %v3867_v5, %v3153_v40 }
0x4a17   :  { %v4808_v27 = vpop.f32.mrf.mxu0 }
0x4a18   :  { %5085 = vtanh.f32 %v3871_v35  ;;  %v4213_v42 = vmul.f32 -1.442695, %v3871_v35 }
0x4a1a   :  { %5087 = vpow2.f32 %v4213_v42 }
0x4a25   :  { %v5086_v59 = vpop.eup %5085 }
0x4a26   :  { %3884 = vrot.lane.b32.xlu1 %v5086_v59, %s5216_s14 }
0x4a27   :  { %v5088_v7 = vpop.eup %5087 }
0x4a28   :  { %v3875_v61 = vadd.f32 1.0, %v5088_v7 }
0x4a2a   :  { %5089 = vrcp.f32 %v3875_v61 }
0x4a37   :  { %v5090_v62 = vpop.eup %5089 }
0x4a38   :  { %v3882_v10 = vmul.f32 %v5090_v62, %v3880_v0 }
0x4a98   :  { %v3885_v50 = vpop.permute.xlu1 %3884 }
0x4a99   :  { %v3887_v9 = vmul.f32 %v5090_v62, %v3885_v50 }
0x4a9b   :  { %3889 = vrot.lane.b32.xlu0 %v3887_v9, %s5217_s3 }
0x4b0d   :  { %v3890_v41 = vpop.permute.xlu0 %3889 }
0x4b0e   :  { %v3892_v46 = vadd.f32 %v3890_v41, %v3882_v10 }
0x4b10   :  { %5091 = vtanh.f32 %v3892_v46  ;;  %v3988_v43 = vrot.slane %v3892_v46, 4 }
0x4b1d   :  { %v5092_v2 = vpop.eup %5091 }
0x4b1e   :  { %3895 = vrot.lane.b32.xlu1 %v5092_v2, %s5216_s14 }
0x4b90   :  { %v3896_v3 = vpop.permute.xlu1 %3895 }
0x4b91   :  { %v3898_v4 = vmul.f32 %v5090_v62, %v3896_v3 }
0x4b93   :  { %3900 = vrot.lane.b32.xlu0 %v3898_v4, %s5217_s3 }
0x4c05   :  { %v3901_v19 = vpop.permute.xlu0 %3900 }
0x4c06   :  { %3903 = vst.msk [vmem:[#allocation3 + $0x18] sm:$0xf] %vm337_vm2, %v3901_v19  ;;  %4818 = vmatmul.mubr.msk.f32.vlgmr.msra.gmra.mxu1 %vm234_vm3, %v3901_v19 }
0x4cc6   :  { %v3972_v60 = vpop.f32.mrf.mxu1 }
0x4cc7   :  { %v3977_v6 = vrot.slane %v3972_v60, 4 }
0x4cc8   :  { %v4819_v12 = vpop.f32.mrf.mxu1 }
0x4cc9   :  { %v3979_v14 = vadd.f32 %v3977_v6, %v3153_v40 }
0x4ccb   :  { %5093 = vtanh.f32 %v3979_v14  ;;  %v4215_v17 = vmul.f32 -1.442695, %v3979_v14 }
0x4ccd   :  { %5095 = vpow2.f32 %v4215_v17 }
0x4cd8   :  { %v5094_v15 = vpop.eup %5093 }
0x4cd9   :  { %3992 = vrot.lane.b32.xlu1 %v5094_v15, %s5216_s14 }
0x4cda   :  { %v5096_v63 = vpop.eup %5095 }
0x4cdb   :  { %v3983_v18 = vadd.f32 1.0, %v5096_v63 }
0x4cdd   :  { %5097 = vrcp.f32 %v3983_v18 }
0x4cea   :  { %v5098_v21 = vpop.eup %5097 }
0x4ceb   :  { %v3990_v8 = vmul.f32 %v5098_v21, %v3988_v43 }
0x4d4b   :  { %v3993_v22 = vpop.permute.xlu1 %3992 }
0x4d4c   :  { %v3995_v23 = vmul.f32 %v5098_v21, %v3993_v22 }
0x4d4e   :  { %3997 = vrot.lane.b32.xlu0 %v3995_v23, %s5217_s3 }
0x4d52   :  { %3360 = vrot.lane.b32.xlu0 %v5994_v36, %s5217_s3  ;;  %v4018_v36 = vld [vmem:[%s6128_s13 + $0x10] sm:$0xff] }
0x4d53   :  { %4822 = vmatprep.subr.mxu0 %v4018_v36 }
0x4d54   :  { %4823 = vmatpush3.msra.mxu0 %v4018_v36 }
0x4d55   :  { %4824 = vmatprep.subr.mxu0 %v4017_v13 }
0x4d56   :  { %3792 = vrot.lane.b32.xlu0 %v3790_v57, %s5217_s3  ;;  %4825 = vmatpush3.msra.mxu0 %v4017_v13 }
0x4d57   :  { %4826 = vmatprep.subr.mxu0 %v4016_v37 }
0x4d58   :  { %4827 = vmatpush3.msra.mxu0 %v4016_v37 }
0x4dc0   :  { %v3998_v29 = vpop.permute.xlu0 %3997 }
0x4dc1   :  { %v4000_v31 = vadd.f32 %v3998_v29, %v3990_v8 }
0x4dc3   :  { %5099 = vtanh.f32 %v4000_v31 }
0x4dc4   :  { %v3361_v47 = vpop.permute.xlu0 %3360 }
0x4dc5   :  { %3363 = vst.msk [vmem:[#allocation3] sm:$0xf0] %vm446_vm4, %v3361_v47 }
0x4dc8   :  { %v3793_v51 = vpop.permute.xlu0 %3792 }
0x4dc9   :  { %3795 = vst.msk [vmem:[#allocation3 + $0x10] sm:$0xf0] %vm446_vm4, %v3793_v51 }
0x4dcc   :  { %v4012_v39 = vld [vmem:[#allocation3] sm:$0xff] }
0x4dcd   :  { %4828 = vmatprep.mubr.msk.f32.mxu0 %vm234_vm3, %v4012_v39 }
0x4dd0   :  { %v5100_v44 = vpop.eup %5099  ;;  %v4014_v53 = vld [vmem:[#allocation3 + $0x10] sm:$0xff] }
0x4dd1   :  { %4003 = vrot.lane.b32.xlu1 %v5100_v44, %s5216_s14 }
0x4dd5   :  { %3576 = vrot.lane.b32.xlu1 %v6030_v11, %s5217_s3  ;;  %v4216_v11 = vld [vmem:[#allocation4] ss:$0 sm:$0xff] }
0x4e43   :  { %v4004_v45 = vpop.permute.xlu1 %4003 }
0x4e44   :  { %v4006_v48 = vmul.f32 %v5098_v21, %v4004_v45 }
0x4e46   :  { %4008 = vrot.lane.b32.xlu1 %v4006_v48, %s5217_s3 }
0x4e47   :  { %v3577_v49 = vpop.permute.xlu1 %3576 }
0x4e48   :  { %3579 = vst.msk [vmem:[#allocation3 + $0x8] sm:$0xf0] %vm446_vm4, %v3577_v49 }
0x4e4f   :  { %v4013_v52 = vld [vmem:[#allocation3 + $0x8] sm:$0xff] }
0x4e50   :  { %4829 = vmatmul.mubr.msk.f32.vlgmr.msra.gmra.mxu0 %vm234_vm3, %v4013_v52 }
0x4e51   :  { %4831 = vmatprep.mubr.msk.f32.mxu0 %vm234_vm3, %v4014_v53 }
0x4eb8   :  { %v4009_v24 = vpop.permute.xlu1 %4008 }
0x4eb9   :  { %4011 = vst.msk [vmem:[#allocation3 + $0x18] sm:$0xf0] %vm446_vm4, %v4009_v24 }
0x4ec0   :  { %v4015_v32 = vld [vmem:[#allocation3 + $0x18] sm:$0xff] }
0x4ec1   :  { %4832 = vmatmul.mubr.msk.f32.gmra.mxu0 %vm234_vm3, %v4015_v32 }
0x4f10   :  { %v4830_v55 = vpop.f32.mrf.mxu0 }
0x4f11   :  { %v4111_v25 = vadd.f32 %v4830_v55, %v4216_v11 }
0x4f12   :  { %v4105_v56 = vpop.f32.mrf.mxu0 }
0x4f13   :  { %4126 = vst.msk [vmem:[%s6130_s15 + $0x8] sm:$0xff] %vm4124_vm5, %v4111_v25  ;;  %v4106_v38 = vadd.f32 %v4216_v11, %v4105_v56 }
0x4f15   :  { %4125 = vst.msk [vmem:[%s6130_s15] sm:$0xff] %vm4124_vm5, %v4106_v38 }
0x4f81   :  { %v4833_v20 = vpop.f32.mrf.mxu0 }
0x4f82   :  { %v4121_v1 = vadd.f32 %v4833_v20, %v4216_v11 }
0x4f83   :  { %v4115_v30 = vpop.f32.mrf.mxu0 }
0x4f84   :  { %4128 = vst.msk [vmem:[%s6130_s15 + $0x18] sm:$0xff] %vm4124_vm5, %v4121_v1  ;;  %v4116_v54 = vadd.f32 %v4216_v11, %v4115_v30 }
0x4f86   :  { %4127 = vst.msk [vmem:[%s6130_s15 + $0x10] sm:$0xff] %vm4124_vm5, %v4116_v54 }
0x4f87   :  { %4133 = vsyncpa [#allocation6], 1 }
0x4f88   :  { %4134 = vsyncpa [#allocation8], 1 }
0x4f89   :  { %4135 = vsyncpa [#allocation11], 1 }

</bundles_post_ra>
